<compile_context>
chip_gen: v7x
topology: tpu7x:2x2x1
jax: 0.10.0
libtpu: 0.0.40
codegen_flags: <defaults>
</compile_context>

<pallas_src>
import functools

import jax
import jax.numpy as jnp
from jax.experimental import pallas as pl
from jax.experimental.pallas import tpu as pltpu

BN_EPS = 1e-5
LANE = 128
_VMEM_LIMIT = 48 << 20  # < v7x's 64 MiB physical VMEM, roomy on v5e/v6e


def _round_up(x, m):
    return (x + m - 1) // m * m


def _pick_rows(m, target=1024):
    """Largest multiple-of-8 divisor of m that is <= target (bigger tiles amortize the
    ~0.35us per-grid-step overhead).  Falls back to a single block of m rows if no such
    divisor exists (fine for the small shapes used here)."""
    d = min(target, m)
    d -= d % 8
    while d >= 8:
        if m % d == 0:
            return d
        d -= 8
    return m


# ---------------------------------------------------------------------------
# Kernel 1: (optional folded-BN affine + ReLU) -> zero-halo pad in VMEM ->
#           3x3 conv as shifted MXU matmuls -> raw bf16 output + per-image
#           BN partial statistics (sum, sum of squares).
# ---------------------------------------------------------------------------
def _conv_stats_kernel(x_ref, scale_ref, shift_ref, w_ref, y_ref, stats_ref,
                       apad_ref, *, ho, wo, stride, wide_k, preact):
    x = x_ref[0]                                     # (H, W, C)
    if preact:
        # Fused BN(stage-1) affine + ReLU, applied BEFORE padding so the halo is exact.
        a = jnp.maximum(x.astype(jnp.float32) * scale_ref[...] + shift_ref[...], 0.0)
    else:
        a = x.astype(jnp.float32)
    h, w, _ = a.shape

    # Build the zero-halo padded activation in VMEM scratch (no HBM round trip).
    apad_ref[...] = jnp.zeros_like(apad_ref)
    apad_ref[1:h + 1, 1:w + 1, :] = a
    xp = apad_ref[...].astype(jnp.bfloat16)          # bf16 MXU operand

    m = ho * wo
    cp = y_ref.shape[-1]
    hspan = (ho - 1) * stride + 1
    wspan = (wo - 1) * stride + 1

    # Hoist the width (sublane) shifts out of the tap loop: 3 shifted planes.
    if stride == 1:
        planes = [xp[:, kw:kw + wo, :] for kw in range(3)]
    else:
        planes = [xp[:, kw:kw + wspan:stride, :] for kw in range(3)]
    if wide_k:
        # Lane-aligned channels: concat on channels so each dot has K = 3*C.
        planes = [jnp.concatenate(planes, axis=-1)]  # (H+2, wo, 3C)

    acc = jnp.zeros((m, cp), jnp.float32)
    for kh in range(3):
        for t, plane in enumerate(planes):
            patch = plane[kh:kh + ho] if stride == 1 else plane[kh:kh + hspan:stride]
            wmat = w_ref[kh] if wide_k else w_ref[kh * 3 + t]
            acc = acc + jnp.dot(patch.reshape(m, patch.shape[-1]), wmat,
                                preferred_element_type=jnp.float32)

    y_ref[0] = acc.astype(y_ref.dtype)               # bf16 intermediate activation
    s0 = jnp.sum(acc, axis=0, keepdims=True)         # (1, Cp) per-image partial sum
    s1 = jnp.sum(acc * acc, axis=0, keepdims=True)   # (1, Cp) per-image partial sumsq
    stats_ref[0:1, 0:1, :] = s0.reshape(1, 1, cp)
    stats_ref[0:1, 1:2, :] = s1.reshape(1, 1, cp)


def _conv_stats_call(x, scale, shift, wts, *, stride, wide_k, preact):
    n, h, w, c = x.shape
    cp = wts.shape[-1]
    ho = (h - 1) // stride + 1
    wo = (w - 1) // stride + 1
    m = ho * wo
    cs = scale.shape[-1]
    kernel = functools.partial(_conv_stats_kernel, ho=ho, wo=wo, stride=stride,
                               wide_k=wide_k, preact=preact)
    return pl.pallas_call(
        kernel,
        out_shape=(jax.ShapeDtypeStruct((n, m, cp), jnp.bfloat16),
                   jax.ShapeDtypeStruct((n, 2, cp), jnp.float32)),
        grid_spec=pltpu.PrefetchScalarGridSpec(
            num_scalar_prefetch=0,
            grid=(n,),
            in_specs=[
                pl.BlockSpec((1, h, w, c), lambda i: (i, 0, 0, 0)),
                pl.BlockSpec((1, cs), lambda i: (0, 0)),
                pl.BlockSpec((1, cs), lambda i: (0, 0)),
                pl.BlockSpec(wts.shape, lambda i: (0,) * wts.ndim),
            ],
            out_specs=(
                pl.BlockSpec((1, m, cp), lambda i: (i, 0, 0)),
                pl.BlockSpec((1, 2, cp), lambda i: (i, 0, 0)),
            ),
            scratch_shapes=[pltpu.VMEM((h + 2, w + 2, c), jnp.float32)]),
        compiler_params=pltpu.CompilerParams(
            dimension_semantics=("parallel",),       # per-image partial stats -> no carry
            vmem_limit_bytes=_VMEM_LIMIT),
    )(x, scale, shift, wts)


# ---------------------------------------------------------------------------
# Kernel 2: lane-dense BatchNorm affine (y * scale + shift) + ReLU (final stage).
# ---------------------------------------------------------------------------
def _bn_relu_kernel(y_ref, scale_ref, shift_ref, o_ref):
    y = y_ref[...].astype(jnp.float32) * scale_ref[...] + shift_ref[...]
    o_ref[...] = jnp.maximum(y, 0.0).astype(o_ref.dtype)


def _bn_relu_call(y2d, scale, shift, out_dtype):
    mt, cp = y2d.shape
    tb = _pick_rows(mt)
    return pl.pallas_call(
        _bn_relu_kernel,
        out_shape=jax.ShapeDtypeStruct((mt, cp), out_dtype),
        grid_spec=pltpu.PrefetchScalarGridSpec(
            num_scalar_prefetch=0,
            grid=(mt // tb,),
            in_specs=[
                pl.BlockSpec((tb, cp), lambda i: (i, 0)),
                pl.BlockSpec((1, cp), lambda i: (0, 0)),
                pl.BlockSpec((1, cp), lambda i: (0, 0)),
            ],
            out_specs=pl.BlockSpec((tb, cp), lambda i: (i, 0))),
        compiler_params=pltpu.CompilerParams(
            dimension_semantics=("parallel",),
            vmem_limit_bytes=_VMEM_LIMIT),
    )(y2d, scale, shift)


def _fold_bn(stats, gamma, beta, count):
    """Fold batch-statistics BN (training mode, biased variance) + gamma/beta into a
    single per-channel scale/shift:  y_hat = y * scale + shift."""
    s = jnp.sum(stats, axis=0)                       # (2, Cp): [sum; sum of squares]
    mean = s[0] / count
    var = jnp.maximum(s[1] / count - mean * mean, 0.0)
    scale = gamma * jax.lax.rsqrt(var + BN_EPS)
    shift = beta - mean * scale
    return scale.reshape(1, -1).astype(jnp.float32), shift.reshape(1, -1).astype(jnp.float32)


@functools.partial(jax.jit, static_argnames=("stride",))
def res_block_forward(x_nhwc, params, stride=1):
    """ResBlock forward: relu(bn1(conv1(x))) -> relu(bn2(conv2(.))).
    Matches the given PyTorch forward() (which has no residual add)."""
    n, h, w, cin = x_nhwc.shape
    cout = params["w1"].shape[-1]
    cp = _round_up(cout, LANE)
    pad_c = cp - cout

    # Lane-pad conv output channels (and conv2 input channels); padded channels stay 0.
    w1pad = jnp.pad(params["w1"], ((0, 0), (0, 0), (0, 0), (0, pad_c))).astype(jnp.bfloat16)
    wide1 = (cin % LANE == 0)
    w1p = w1pad.reshape(3, 3 * cin, cp) if wide1 else w1pad.reshape(9, cin, cp)
    w2p = jnp.pad(params["w2"], ((0, 0), (0, 0), (0, pad_c), (0, pad_c))
                  ).astype(jnp.bfloat16).reshape(3, 3 * cp, cp)
    g1 = jnp.pad(params["g1"], (0, pad_c))
    b1 = jnp.pad(params["b1"], (0, pad_c))
    g2 = jnp.pad(params["g2"], (0, pad_c))
    b2 = jnp.pad(params["b2"], (0, pad_c))

    xb = x_nhwc.astype(jnp.bfloat16)                 # bf16 MXU operands

    # --- Stage 1: conv1 + per-image BN partial statistics (parallel over batch) ----
    dummy = jnp.zeros((1, cp), jnp.float32)          # unused when preact=False
    y1, stats1 = _conv_stats_call(xb, dummy, dummy, w1p,
                                  stride=stride, wide_k=wide1, preact=False)
    ho1 = (h - 1) // stride + 1
    wo1 = (w - 1) // stride + 1
    scale1, shift1 = _fold_bn(stats1, g1, b1, float(n * ho1 * wo1))

    # --- Stage 2: fused BN1-affine + ReLU + conv2 + BN2 partial statistics ---------
    y1r = y1.reshape(n, ho1, wo1, cp)                # contiguous (free) reshape
    y2, stats2 = _conv_stats_call(y1r, scale1, shift1, w2p,
                                  stride=1, wide_k=True, preact=True)
    scale2, shift2 = _fold_bn(stats2, g2, b2, float(n * ho1 * wo1))

    # --- Stage 3: BN2 affine + ReLU (lane-dense elementwise pass) ------------------
    out2d = _bn_relu_call(y2.reshape(n * ho1 * wo1, cp), scale2, shift2, jnp.float32)
    out = out2d.reshape(n, ho1, wo1, cp)
    return out[..., :cout]                           # no-op when cout % 128 == 0


def _reference_forward(x_nhwc, params, stride=1):
    """Plain-JAX reference mirroring the kernel's dtype policy (bf16 matmul operands,
    f32 accumulation & BN statistics, bf16 intermediate conv outputs) so the numerical
    check can be tight."""
    def conv(x, w, s):
        return jax.lax.conv_general_dilated(
            x.astype(jnp.bfloat16), w.astype(jnp.bfloat16),
            window_strides=(s, s), padding=((1, 1), (1, 1)),
            dimension_numbers=("NHWC", "HWIO", "NHWC"),
            preferred_element_type=jnp.float32)

    def bn_relu(y_f32, g, b):
        mean = jnp.mean(y_f32, axis=(0, 1, 2))
        var = jnp.maximum(jnp.mean(y_f32 * y_f32, axis=(0, 1, 2)) - mean * mean, 0.0)
        scale = g * jax.lax.rsqrt(var + BN_EPS)
        shift = b - mean * scale
        yb = y_f32.astype(jnp.bfloat16).astype(jnp.float32)   # kernels store y in bf16
        return jnp.maximum(yb * scale + shift, 0.0)

    y1 = conv(x_nhwc, params["w1"], stride)
    a1 = bn_relu(y1, params["g1"], params["b1"]).astype(jnp.bfloat16)
    y2 = conv(a1, params["w2"], 1)
    return bn_relu(y2, params["g2"], params["b2"])


def init_params(key, in_channels, out_channels):
    k1, k2 = jax.random.split(key)
    fan_in1 = 9 * in_channels
    fan_in2 = 9 * out_channels
    w1 = jax.random.uniform(k1, (3, 3, in_channels, out_channels), jnp.float32,
                            minval=-1.0, maxval=1.0) / jnp.sqrt(fan_in1)
    w2 = jax.random.uniform(k2, (3, 3, out_channels, out_channels), jnp.float32,
                            minval=-1.0, maxval=1.0) / jnp.sqrt(fan_in2)
    ones = jnp.ones((out_channels,), jnp.float32)    # PyTorch BN default weight
    zeros = jnp.zeros((out_channels,), jnp.float32)  # PyTorch BN default bias
    return {"w1": w1, "g1": ones, "b1": zeros,
            "w2": w2, "g2": ones, "b2": zeros}


if __name__ == "__main__":
    key = jax.random.PRNGKey(0)
    kx, kp = jax.random.split(key)

    N, Cin, H, W = 2, 4, 16, 16
    Cout, stride = 8, 1

    # Input generated in PyTorch's NCHW convention, transposed to NHWC for the kernel.
    x_nchw = jax.random.normal(kx, (N, Cin, H, W), jnp.float32)
    x_nhwc = jnp.transpose(x_nchw, (0, 2, 3, 1))

    params = init_params(kp, Cin, Cout)

    out = res_block_forward(x_nhwc, params, stride=stride)
    out = jax.block_until_ready(out)

    ref = _reference_forward(x_nhwc, params, stride=stride)
    assert out.shape == (N, H // stride, W // stride, Cout)
    err = float(jnp.max(jnp.abs(out - ref)))
    assert err < 1e-2, f"mismatch vs plain-JAX reference: {err}"

    print("KERNEL_OK")
</pallas_src>

<mosaic_0001>
module attributes {stable_mosaic.version = 11 : i64} {
  func.func @_conv_stats_kernel(%arg0: i32, %arg1: memref<1x16x16x4xbf16, #tpu.memory_space<vmem>>, %arg2: memref<1x128xf32, #tpu.memory_space<vmem>>, %arg3: memref<1x128xf32, #tpu.memory_space<vmem>>, %arg4: memref<9x4x128xbf16, #tpu.memory_space<vmem>>, %arg5: memref<1x256x128xbf16, #tpu.memory_space<vmem>>, %arg6: memref<1x2x128xf32, #tpu.memory_space<vmem>>, %arg7: memref<18x18x4xf32, #tpu.memory_space<vmem>>) attributes {dimension_semantics = [#tpu.dimension_semantics<parallel>], iteration_bounds = array<i64: 2>, scalar_prefetch = 0 : i64, scratch_operands = 1 : i64, tpu.core_type = #tpu.core_type<tc>, window_params = [{transform_indices = @transform_0, window_bounds = array<i64: 1, 16, 16, 4>}, {pipeline_mode = #tpu.pipeline_mode<synchronous>, transform_indices = @transform_1, window_bounds = array<i64: 1, 128>}, {pipeline_mode = #tpu.pipeline_mode<synchronous>, transform_indices = @transform_2, window_bounds = array<i64: 1, 128>}, {pipeline_mode = #tpu.pipeline_mode<synchronous>, transform_indices = @transform_3, window_bounds = array<i64: 9, 4, 128>}, {transform_indices = @transform_4, window_bounds = array<i64: 1, 256, 128>}, {transform_indices = @transform_5, window_bounds = array<i64: 1, 2, 128>}]} {
    %c0 = arith.constant 0 : index
    %c0_0 = arith.constant 0 : index
    %c0_1 = arith.constant 0 : index
    %c0_2 = arith.constant 0 : index
    %0 = vector.load %arg1[%c0, %c0_0, %c0_1, %c0_2] : memref<1x16x16x4xbf16, #tpu.memory_space<vmem>>, vector<1x16x16x4xbf16>
    %1 = vector.shape_cast %0 : vector<1x16x16x4xbf16> to vector<16x16x4xbf16>
    %2 = arith.extf %1 : vector<16x16x4xbf16> to vector<16x16x4xf32>
    %cst = arith.constant 0.000000e+00 : f32
    %3 = vector.broadcast %cst : f32 to vector<18x18x4xf32>
    %c0_3 = arith.constant 0 : index
    %c0_4 = arith.constant 0 : index
    %c0_5 = arith.constant 0 : index
    %4 = vector.load %arg7[%c0_3, %c0_4, %c0_5] : memref<18x18x4xf32, #tpu.memory_space<vmem>>, vector<18x18x4xf32>
    tpu.vector_store %arg7[%c0_3, %c0_4, %c0_5], %3 {strides = array<i32>} : memref<18x18x4xf32, #tpu.memory_space<vmem>>, vector<18x18x4xf32>,
    %c1 = arith.constant 1 : index
    %c1_6 = arith.constant 1 : index
    %c0_7 = arith.constant 0 : index
    %5 = vector.load %arg7[%c1, %c1_6, %c0_7] : memref<18x18x4xf32, #tpu.memory_space<vmem>>, vector<16x16x4xf32>
    tpu.vector_store %arg7[%c1, %c1_6, %c0_7], %2 {strides = array<i32>} : memref<18x18x4xf32, #tpu.memory_space<vmem>>, vector<16x16x4xf32>,
    %c0_8 = arith.constant 0 : index
    %c0_9 = arith.constant 0 : index
    %c0_10 = arith.constant 0 : index
    %6 = vector.load %arg7[%c0_8, %c0_9, %c0_10] : memref<18x18x4xf32, #tpu.memory_space<vmem>>, vector<18x18x4xf32>
    %7 = arith.truncf %6 : vector<18x18x4xf32> to vector<18x18x4xbf16>
    %8 = vector.extract_strided_slice %7 {offsets = [0, 0, 0], sizes = [18, 16, 4], strides = [1, 1, 1]} : vector<18x18x4xbf16> to vector<18x16x4xbf16>
    %9 = vector.extract_strided_slice %7 {offsets = [0, 1, 0], sizes = [18, 16, 4], strides = [1, 1, 1]} : vector<18x18x4xbf16> to vector<18x16x4xbf16>
    %10 = vector.extract_strided_slice %7 {offsets = [0, 2, 0], sizes = [18, 16, 4], strides = [1, 1, 1]} : vector<18x18x4xbf16> to vector<18x16x4xbf16>
    %cst_11 = arith.constant 0.000000e+00 : f32
    %11 = vector.broadcast %cst_11 : f32 to vector<256x128xf32>
    %12 = vector.extract_strided_slice %8 {offsets = [0, 0, 0], sizes = [16, 16, 4], strides = [1, 1, 1]} : vector<18x16x4xbf16> to vector<16x16x4xbf16>
    %c0_12 = arith.constant 0 : index
    %c0_13 = arith.constant 0 : index
    %c0_14 = arith.constant 0 : index
    %13 = vector.load %arg4[%c0_12, %c0_13, %c0_14] : memref<9x4x128xbf16, #tpu.memory_space<vmem>>, vector<1x4x128xbf16>
    %14 = vector.shape_cast %13 : vector<1x4x128xbf16> to vector<4x128xbf16>
    %15 = vector.shape_cast %12 : vector<16x16x4xbf16> to vector<256x4xbf16>
    %cst_15 = arith.constant dense<0.000000e+00> : vector<256x128xf32>
    %16 = tpu.matmul %15, %14, %cst_15 {dimension_numbers = #tpu.dot_dimension_numbers<[1], [0], [0], [1], [0, 0, 1, 1], [], []>} : vector<256x4xbf16>, vector<4x128xbf16>, vector<256x128xf32> -> vector<256x128xf32>
    %17 = arith.addf %11, %16 : vector<256x128xf32>
    %18 = vector.extract_strided_slice %9 {offsets = [0, 0, 0], sizes = [16, 16, 4], strides = [1, 1, 1]} : vector<18x16x4xbf16> to vector<16x16x4xbf16>
    %c1_16 = arith.constant 1 : index
    %c0_17 = arith.constant 0 : index
    %c0_18 = arith.constant 0 : index
    %19 = vector.load %arg4[%c1_16, %c0_17, %c0_18] : memref<9x4x128xbf16, #tpu.memory_space<vmem>>, vector<1x4x128xbf16>
    %20 = vector.shape_cast %19 : vector<1x4x128xbf16> to vector<4x128xbf16>
    %21 = vector.shape_cast %18 : vector<16x16x4xbf16> to vector<256x4xbf16>
    %cst_19 = arith.constant dense<0.000000e+00> : vector<256x128xf32>
    %22 = tpu.matmul %21, %20, %cst_19 {dimension_numbers = #tpu.dot_dimension_numbers<[1], [0], [0], [1], [0, 0, 1, 1], [], []>} : vector<256x4xbf16>, vector<4x128xbf16>, vector<256x128xf32> -> vector<256x128xf32>
    %23 = arith.addf %17, %22 : vector<256x128xf32>
    %24 = vector.extract_strided_slice %10 {offsets = [0, 0, 0], sizes = [16, 16, 4], strides = [1, 1, 1]} : vector<18x16x4xbf16> to vector<16x16x4xbf16>
    %c2 = arith.constant 2 : index
    %c0_20 = arith.constant 0 : index
    %c0_21 = arith.constant 0 : index
    %25 = vector.load %arg4[%c2, %c0_20, %c0_21] : memref<9x4x128xbf16, #tpu.memory_space<vmem>>, vector<1x4x128xbf16>
    %26 = vector.shape_cast %25 : vector<1x4x128xbf16> to vector<4x128xbf16>
    %27 = vector.shape_cast %24 : vector<16x16x4xbf16> to vector<256x4xbf16>
    %cst_22 = arith.constant dense<0.000000e+00> : vector<256x128xf32>
    %28 = tpu.matmul %27, %26, %cst_22 {dimension_numbers = #tpu.dot_dimension_numbers<[1], [0], [0], [1], [0, 0, 1, 1], [], []>} : vector<256x4xbf16>, vector<4x128xbf16>, vector<256x128xf32> -> vector<256x128xf32>
    %29 = arith.addf %23, %28 : vector<256x128xf32>
    %30 = vector.extract_strided_slice %8 {offsets = [1, 0, 0], sizes = [16, 16, 4], strides = [1, 1, 1]} : vector<18x16x4xbf16> to vector<16x16x4xbf16>
    %c3 = arith.constant 3 : index
    %c0_23 = arith.constant 0 : index
    %c0_24 = arith.constant 0 : index
    %31 = vector.load %arg4[%c3, %c0_23, %c0_24] : memref<9x4x128xbf16, #tpu.memory_space<vmem>>, vector<1x4x128xbf16>
    %32 = vector.shape_cast %31 : vector<1x4x128xbf16> to vector<4x128xbf16>
    %33 = vector.shape_cast %30 : vector<16x16x4xbf16> to vector<256x4xbf16>
    %cst_25 = arith.constant dense<0.000000e+00> : vector<256x128xf32>
    %34 = tpu.matmul %33, %32, %cst_25 {dimension_numbers = #tpu.dot_dimension_numbers<[1], [0], [0], [1], [0, 0, 1, 1], [], []>} : vector<256x4xbf16>, vector<4x128xbf16>, vector<256x128xf32> -> vector<256x128xf32>
    %35 = arith.addf %29, %34 : vector<256x128xf32>
    %36 = vector.extract_strided_slice %9 {offsets = [1, 0, 0], sizes = [16, 16, 4], strides = [1, 1, 1]} : vector<18x16x4xbf16> to vector<16x16x4xbf16>
    %c4 = arith.constant 4 : index
    %c0_26 = arith.constant 0 : index
    %c0_27 = arith.constant 0 : index
    %37 = vector.load %arg4[%c4, %c0_26, %c0_27] : memref<9x4x128xbf16, #tpu.memory_space<vmem>>, vector<1x4x128xbf16>
    %38 = vector.shape_cast %37 : vector<1x4x128xbf16> to vector<4x128xbf16>
    %39 = vector.shape_cast %36 : vector<16x16x4xbf16> to vector<256x4xbf16>
    %cst_28 = arith.constant dense<0.000000e+00> : vector<256x128xf32>
    %40 = tpu.matmul %39, %38, %cst_28 {dimension_numbers = #tpu.dot_dimension_numbers<[1], [0], [0], [1], [0, 0, 1, 1], [], []>} : vector<256x4xbf16>, vector<4x128xbf16>, vector<256x128xf32> -> vector<256x128xf32>
    %41 = arith.addf %35, %40 : vector<256x128xf32>
    %42 = vector.extract_strided_slice %10 {offsets = [1, 0, 0], sizes = [16, 16, 4], strides = [1, 1, 1]} : vector<18x16x4xbf16> to vector<16x16x4xbf16>
    %c5 = arith.constant 5 : index
    %c0_29 = arith.constant 0 : index
    %c0_30 = arith.constant 0 : index
    %43 = vector.load %arg4[%c5, %c0_29, %c0_30] : memref<9x4x128xbf16, #tpu.memory_space<vmem>>, vector<1x4x128xbf16>
    %44 = vector.shape_cast %43 : vector<1x4x128xbf16> to vector<4x128xbf16>
    %45 = vector.shape_cast %42 : vector<16x16x4xbf16> to vector<256x4xbf16>
    %cst_31 = arith.constant dense<0.000000e+00> : vector<256x128xf32>
    %46 = tpu.matmul %45, %44, %cst_31 {dimension_numbers = #tpu.dot_dimension_numbers<[1], [0], [0], [1], [0, 0, 1, 1], [], []>} : vector<256x4xbf16>, vector<4x128xbf16>, vector<256x128xf32> -> vector<256x128xf32>
    %47 = arith.addf %41, %46 : vector<256x128xf32>
    %48 = vector.extract_strided_slice %8 {offsets = [2, 0, 0], sizes = [16, 16, 4], strides = [1, 1, 1]} : vector<18x16x4xbf16> to vector<16x16x4xbf16>
    %c6 = arith.constant 6 : index
    %c0_32 = arith.constant 0 : index
    %c0_33 = arith.constant 0 : index
    %49 = vector.load %arg4[%c6, %c0_32, %c0_33] : memref<9x4x128xbf16, #tpu.memory_space<vmem>>, vector<1x4x128xbf16>
    %50 = vector.shape_cast %49 : vector<1x4x128xbf16> to vector<4x128xbf16>
    %51 = vector.shape_cast %48 : vector<16x16x4xbf16> to vector<256x4xbf16>
    %cst_34 = arith.constant dense<0.000000e+00> : vector<256x128xf32>
    %52 = tpu.matmul %51, %50, %cst_34 {dimension_numbers = #tpu.dot_dimension_numbers<[1], [0], [0], [1], [0, 0, 1, 1], [], []>} : vector<256x4xbf16>, vector<4x128xbf16>, vector<256x128xf32> -> vector<256x128xf32>
    %53 = arith.addf %47, %52 : vector<256x128xf32>
    %54 = vector.extract_strided_slice %9 {offsets = [2, 0, 0], sizes = [16, 16, 4], strides = [1, 1, 1]} : vector<18x16x4xbf16> to vector<16x16x4xbf16>
    %c7 = arith.constant 7 : index
    %c0_35 = arith.constant 0 : index
    %c0_36 = arith.constant 0 : index
    %55 = vector.load %arg4[%c7, %c0_35, %c0_36] : memref<9x4x128xbf16, #tpu.memory_space<vmem>>, vector<1x4x128xbf16>
    %56 = vector.shape_cast %55 : vector<1x4x128xbf16> to vector<4x128xbf16>
    %57 = vector.shape_cast %54 : vector<16x16x4xbf16> to vector<256x4xbf16>
    %cst_37 = arith.constant dense<0.000000e+00> : vector<256x128xf32>
    %58 = tpu.matmul %57, %56, %cst_37 {dimension_numbers = #tpu.dot_dimension_numbers<[1], [0], [0], [1], [0, 0, 1, 1], [], []>} : vector<256x4xbf16>, vector<4x128xbf16>, vector<256x128xf32> -> vector<256x128xf32>
    %59 = arith.addf %53, %58 : vector<256x128xf32>
    %60 = vector.extract_strided_slice %10 {offsets = [2, 0, 0], sizes = [16, 16, 4], strides = [1, 1, 1]} : vector<18x16x4xbf16> to vector<16x16x4xbf16>
    %c8 = arith.constant 8 : index
    %c0_38 = arith.constant 0 : index
    %c0_39 = arith.constant 0 : index
    %61 = vector.load %arg4[%c8, %c0_38, %c0_39] : memref<9x4x128xbf16, #tpu.memory_space<vmem>>, vector<1x4x128xbf16>
    %62 = vector.shape_cast %61 : vector<1x4x128xbf16> to vector<4x128xbf16>
    %63 = vector.shape_cast %60 : vector<16x16x4xbf16> to vector<256x4xbf16>
    %cst_40 = arith.constant dense<0.000000e+00> : vector<256x128xf32>
    %64 = tpu.matmul %63, %62, %cst_40 {dimension_numbers = #tpu.dot_dimension_numbers<[1], [0], [0], [1], [0, 0, 1, 1], [], []>} : vector<256x4xbf16>, vector<4x128xbf16>, vector<256x128xf32> -> vector<256x128xf32>
    %65 = arith.addf %59, %64 : vector<256x128xf32>
    %66 = arith.truncf %65 : vector<256x128xf32> to vector<256x128xbf16>
    %c0_41 = arith.constant 0 : index
    %c0_42 = arith.constant 0 : index
    %c0_43 = arith.constant 0 : index
    %67 = vector.load %arg5[%c0_41, %c0_42, %c0_43] : memref<1x256x128xbf16, #tpu.memory_space<vmem>>, vector<1x256x128xbf16>
    %68 = vector.shape_cast %67 : vector<1x256x128xbf16> to vector<256x128xbf16>
    %69 = vector.shape_cast %66 : vector<256x128xbf16> to vector<1x256x128xbf16>
    tpu.vector_store %arg5[%c0_41, %c0_42, %c0_43], %69 {strides = array<i32>} : memref<1x256x128xbf16, #tpu.memory_space<vmem>>, vector<1x256x128xbf16>,
    %cst_44 = arith.constant dense<0.000000e+00> : vector<128xf32>
    %70 = vector.multi_reduction <add>, %65, %cst_44 [0] : vector<256x128xf32> to vector<128xf32>
    %71 = vector.shape_cast %70 : vector<128xf32> to vector<1x128xf32>
    %72 = arith.mulf %65, %65 : vector<256x128xf32>
    %cst_45 = arith.constant dense<0.000000e+00> : vector<128xf32>
    %73 = vector.multi_reduction <add>, %72, %cst_45 [0] : vector<256x128xf32> to vector<128xf32>
    %74 = vector.shape_cast %73 : vector<128xf32> to vector<1x128xf32>
    %75 = vector.shape_cast %71 : vector<1x128xf32> to vector<1x1x128xf32>
    %c0_46 = arith.constant 0 : index
    %c0_47 = arith.constant 0 : index
    %c0_48 = arith.constant 0 : index
    %76 = vector.load %arg6[%c0_46, %c0_47, %c0_48] : memref<1x2x128xf32, #tpu.memory_space<vmem>>, vector<1x1x128xf32>
    tpu.vector_store %arg6[%c0_46, %c0_47, %c0_48], %75 {strides = array<i32>} : memref<1x2x128xf32, #tpu.memory_space<vmem>>, vector<1x1x128xf32>,
    %77 = vector.shape_cast %74 : vector<1x128xf32> to vector<1x1x128xf32>
    %c0_49 = arith.constant 0 : index
    %c1_50 = arith.constant 1 : index
    %c0_51 = arith.constant 0 : index
    %78 = vector.load %arg6[%c0_49, %c1_50, %c0_51] : memref<1x2x128xf32, #tpu.memory_space<vmem>>, vector<1x1x128xf32>
    tpu.vector_store %arg6[%c0_49, %c1_50, %c0_51], %77 {strides = array<i32>} : memref<1x2x128xf32, #tpu.memory_space<vmem>>, vector<1x1x128xf32>,
    return
  }
  func.func @transform_0(%arg0: i32) -> (i32, i32, i32, i32) {
    %c0_i32 = arith.constant 0 : i32
    %c0_i32_0 = arith.constant 0 : i32
    %c0_i32_1 = arith.constant 0 : i32
    %c0_i32_2 = arith.constant 0 : i32
    return %arg0, %c0_i32, %c0_i32_0, %c0_i32_1 : i32, i32, i32, i32
  }
  func.func @transform_1(%arg0: i32) -> (i32, i32) {
    %c0_i32 = arith.constant 0 : i32
    %c0_i32_0 = arith.constant 0 : i32
    %c0_i32_1 = arith.constant 0 : i32
    return %c0_i32, %c0_i32_0 : i32, i32
  }
  func.func @transform_2(%arg0: i32) -> (i32, i32) {
    %c0_i32 = arith.constant 0 : i32
    %c0_i32_0 = arith.constant 0 : i32
    %c0_i32_1 = arith.constant 0 : i32
    return %c0_i32, %c0_i32_0 : i32, i32
  }
  func.func @transform_3(%arg0: i32) -> (i32, i32, i32) {
    %c0_i32 = arith.constant 0 : i32
    %c0_i32_0 = arith.constant 0 : i32
    %c0_i32_1 = arith.constant 0 : i32
    %c0_i32_2 = arith.constant 0 : i32
    return %c0_i32, %c0_i32_0, %c0_i32_1 : i32, i32, i32
  }
  func.func @transform_4(%arg0: i32) -> (i32, i32, i32) {
    %c0_i32 = arith.constant 0 : i32
    %c0_i32_0 = arith.constant 0 : i32
    %c0_i32_1 = arith.constant 0 : i32
    return %arg0, %c0_i32, %c0_i32_0 : i32, i32, i32
  }
  func.func @transform_5(%arg0: i32) -> (i32, i32, i32) {
    %c0_i32 = arith.constant 0 : i32
    %c0_i32_0 = arith.constant 0 : i32
    %c0_i32_1 = arith.constant 0 : i32
    return %arg0, %c0_i32, %c0_i32_0 : i32, i32, i32
  }
}

module attributes {stable_mosaic.version = 11 : i64} {
  func.func @_conv_stats_kernel(%arg0: i32, %arg1: memref<1x16x16x128xbf16, #tpu.memory_space<vmem>>, %arg2: memref<1x128xf32, #tpu.memory_space<vmem>>, %arg3: memref<1x128xf32, #tpu.memory_space<vmem>>, %arg4: memref<3x384x128xbf16, #tpu.memory_space<vmem>>, %arg5: memref<1x256x128xbf16, #tpu.memory_space<vmem>>, %arg6: memref<1x2x128xf32, #tpu.memory_space<vmem>>, %arg7: memref<18x18x128xf32, #tpu.memory_space<vmem>>) attributes {dimension_semantics = [#tpu.dimension_semantics<parallel>], iteration_bounds = array<i64: 2>, scalar_prefetch = 0 : i64, scratch_operands = 1 : i64, tpu.core_type = #tpu.core_type<tc>, window_params = [{transform_indices = @transform_0, window_bounds = array<i64: 1, 16, 16, 128>}, {pipeline_mode = #tpu.pipeline_mode<synchronous>, transform_indices = @transform_1, window_bounds = array<i64: 1, 128>}, {pipeline_mode = #tpu.pipeline_mode<synchronous>, transform_indices = @transform_2, window_bounds = array<i64: 1, 128>}, {pipeline_mode = #tpu.pipeline_mode<synchronous>, transform_indices = @transform_3, window_bounds = array<i64: 3, 384, 128>}, {transform_indices = @transform_4, window_bounds = array<i64: 1, 256, 128>}, {transform_indices = @transform_5, window_bounds = array<i64: 1, 2, 128>}]} {
    %c0 = arith.constant 0 : index
    %c0_0 = arith.constant 0 : index
    %c0_1 = arith.constant 0 : index
    %c0_2 = arith.constant 0 : index
    %0 = vector.load %arg1[%c0, %c0_0, %c0_1, %c0_2] : memref<1x16x16x128xbf16, #tpu.memory_space<vmem>>, vector<1x16x16x128xbf16>
    %1 = vector.shape_cast %0 : vector<1x16x16x128xbf16> to vector<16x16x128xbf16>
    %2 = arith.extf %1 : vector<16x16x128xbf16> to vector<16x16x128xf32>
    %c0_3 = arith.constant 0 : index
    %c0_4 = arith.constant 0 : index
    %3 = vector.load %arg2[%c0_3, %c0_4] : memref<1x128xf32, #tpu.memory_space<vmem>>, vector<1x128xf32>
    %4 = vector.shape_cast %3 : vector<1x128xf32> to vector<1x1x128xf32>
    %5 = vector.broadcast %4 : vector<1x1x128xf32> to vector<16x16x128xf32>
    %6 = arith.mulf %2, %5 : vector<16x16x128xf32>
    %c0_5 = arith.constant 0 : index
    %c0_6 = arith.constant 0 : index
    %7 = vector.load %arg3[%c0_5, %c0_6] : memref<1x128xf32, #tpu.memory_space<vmem>>, vector<1x128xf32>
    %8 = vector.shape_cast %7 : vector<1x128xf32> to vector<1x1x128xf32>
    %9 = vector.broadcast %8 : vector<1x1x128xf32> to vector<16x16x128xf32>
    %10 = arith.addf %6, %9 : vector<16x16x128xf32>
    %cst = arith.constant 0.000000e+00 : f32
    %11 = vector.broadcast %cst : f32 to vector<16x16x128xf32>
    %12 = arith.maximumf %10, %11 : vector<16x16x128xf32>
    %cst_7 = arith.constant 0.000000e+00 : f32
    %13 = vector.broadcast %cst_7 : f32 to vector<18x18x128xf32>
    %c0_8 = arith.constant 0 : index
    %c0_9 = arith.constant 0 : index
    %c0_10 = arith.constant 0 : index
    %14 = vector.load %arg7[%c0_8, %c0_9, %c0_10] : memref<18x18x128xf32, #tpu.memory_space<vmem>>, vector<18x18x128xf32>
    tpu.vector_store %arg7[%c0_8, %c0_9, %c0_10], %13 {strides = array<i32>} : memref<18x18x128xf32, #tpu.memory_space<vmem>>, vector<18x18x128xf32>,
    %c1 = arith.constant 1 : index
    %c1_11 = arith.constant 1 : index
    %c0_12 = arith.constant 0 : index
    %15 = vector.load %arg7[%c1, %c1_11, %c0_12] : memref<18x18x128xf32, #tpu.memory_space<vmem>>, vector<16x16x128xf32>
    tpu.vector_store %arg7[%c1, %c1_11, %c0_12], %12 {strides = array<i32>} : memref<18x18x128xf32, #tpu.memory_space<vmem>>, vector<16x16x128xf32>,
    %c0_13 = arith.constant 0 : index
    %c0_14 = arith.constant 0 : index
    %c0_15 = arith.constant 0 : index
    %16 = vector.load %arg7[%c0_13, %c0_14, %c0_15] : memref<18x18x128xf32, #tpu.memory_space<vmem>>, vector<18x18x128xf32>
    %17 = arith.truncf %16 : vector<18x18x128xf32> to vector<18x18x128xbf16>
    %18 = vector.extract_strided_slice %17 {offsets = [0, 0, 0], sizes = [18, 16, 128], strides = [1, 1, 1]} : vector<18x18x128xbf16> to vector<18x16x128xbf16>
    %19 = vector.extract_strided_slice %17 {offsets = [0, 1, 0], sizes = [18, 16, 128], strides = [1, 1, 1]} : vector<18x18x128xbf16> to vector<18x16x128xbf16>
    %20 = vector.extract_strided_slice %17 {offsets = [0, 2, 0], sizes = [18, 16, 128], strides = [1, 1, 1]} : vector<18x18x128xbf16> to vector<18x16x128xbf16>
    %21 = tpu.concatenate %18, %19, %20 in 2 : vector<18x16x128xbf16>, vector<18x16x128xbf16>, vector<18x16x128xbf16> -> vector<18x16x384xbf16>
    %cst_16 = arith.constant 0.000000e+00 : f32
    %22 = vector.broadcast %cst_16 : f32 to vector<256x128xf32>
    %23 = vector.extract_strided_slice %21 {offsets = [0, 0, 0], sizes = [16, 16, 384], strides = [1, 1, 1]} : vector<18x16x384xbf16> to vector<16x16x384xbf16>
    %c0_17 = arith.constant 0 : index
    %c0_18 = arith.constant 0 : index
    %c0_19 = arith.constant 0 : index
    %24 = vector.load %arg4[%c0_17, %c0_18, %c0_19] : memref<3x384x128xbf16, #tpu.memory_space<vmem>>, vector<1x384x128xbf16>
    %25 = vector.shape_cast %24 : vector<1x384x128xbf16> to vector<384x128xbf16>
    %26 = vector.shape_cast %23 : vector<16x16x384xbf16> to vector<256x384xbf16>
    %cst_20 = arith.constant dense<0.000000e+00> : vector<256x128xf32>
    %27 = tpu.matmul %26, %25, %cst_20 {dimension_numbers = #tpu.dot_dimension_numbers<[1], [0], [0], [1], [0, 0, 1, 1], [], []>} : vector<256x384xbf16>, vector<384x128xbf16>, vector<256x128xf32> -> vector<256x128xf32>
    %28 = arith.addf %22, %27 : vector<256x128xf32>
    %29 = vector.extract_strided_slice %21 {offsets = [1, 0, 0], sizes = [16, 16, 384], strides = [1, 1, 1]} : vector<18x16x384xbf16> to vector<16x16x384xbf16>
    %c1_21 = arith.constant 1 : index
    %c0_22 = arith.constant 0 : index
    %c0_23 = arith.constant 0 : index
    %30 = vector.load %arg4[%c1_21, %c0_22, %c0_23] : memref<3x384x128xbf16, #tpu.memory_space<vmem>>, vector<1x384x128xbf16>
    %31 = vector.shape_cast %30 : vector<1x384x128xbf16> to vector<384x128xbf16>
    %32 = vector.shape_cast %29 : vector<16x16x384xbf16> to vector<256x384xbf16>
    %cst_24 = arith.constant dense<0.000000e+00> : vector<256x128xf32>
    %33 = tpu.matmul %32, %31, %cst_24 {dimension_numbers = #tpu.dot_dimension_numbers<[1], [0], [0], [1], [0, 0, 1, 1], [], []>} : vector<256x384xbf16>, vector<384x128xbf16>, vector<256x128xf32> -> vector<256x128xf32>
    %34 = arith.addf %28, %33 : vector<256x128xf32>
    %35 = vector.extract_strided_slice %21 {offsets = [2, 0, 0], sizes = [16, 16, 384], strides = [1, 1, 1]} : vector<18x16x384xbf16> to vector<16x16x384xbf16>
    %c2 = arith.constant 2 : index
    %c0_25 = arith.constant 0 : index
    %c0_26 = arith.constant 0 : index
    %36 = vector.load %arg4[%c2, %c0_25, %c0_26] : memref<3x384x128xbf16, #tpu.memory_space<vmem>>, vector<1x384x128xbf16>
    %37 = vector.shape_cast %36 : vector<1x384x128xbf16> to vector<384x128xbf16>
    %38 = vector.shape_cast %35 : vector<16x16x384xbf16> to vector<256x384xbf16>
    %cst_27 = arith.constant dense<0.000000e+00> : vector<256x128xf32>
    %39 = tpu.matmul %38, %37, %cst_27 {dimension_numbers = #tpu.dot_dimension_numbers<[1], [0], [0], [1], [0, 0, 1, 1], [], []>} : vector<256x384xbf16>, vector<384x128xbf16>, vector<256x128xf32> -> vector<256x128xf32>
    %40 = arith.addf %34, %39 : vector<256x128xf32>
    %41 = arith.truncf %40 : vector<256x128xf32> to vector<256x128xbf16>
    %c0_28 = arith.constant 0 : index
    %c0_29 = arith.constant 0 : index
    %c0_30 = arith.constant 0 : index
    %42 = vector.load %arg5[%c0_28, %c0_29, %c0_30] : memref<1x256x128xbf16, #tpu.memory_space<vmem>>, vector<1x256x128xbf16>
    %43 = vector.shape_cast %42 : vector<1x256x128xbf16> to vector<256x128xbf16>
    %44 = vector.shape_cast %41 : vector<256x128xbf16> to vector<1x256x128xbf16>
    tpu.vector_store %arg5[%c0_28, %c0_29, %c0_30], %44 {strides = array<i32>} : memref<1x256x128xbf16, #tpu.memory_space<vmem>>, vector<1x256x128xbf16>,
    %cst_31 = arith.constant dense<0.000000e+00> : vector<128xf32>
    %45 = vector.multi_reduction <add>, %40, %cst_31 [0] : vector<256x128xf32> to vector<128xf32>
    %46 = vector.shape_cast %45 : vector<128xf32> to vector<1x128xf32>
    %47 = arith.mulf %40, %40 : vector<256x128xf32>
    %cst_32 = arith.constant dense<0.000000e+00> : vector<128xf32>
    %48 = vector.multi_reduction <add>, %47, %cst_32 [0] : vector<256x128xf32> to vector<128xf32>
    %49 = vector.shape_cast %48 : vector<128xf32> to vector<1x128xf32>
    %50 = vector.shape_cast %46 : vector<1x128xf32> to vector<1x1x128xf32>
    %c0_33 = arith.constant 0 : index
    %c0_34 = arith.constant 0 : index
    %c0_35 = arith.constant 0 : index
    %51 = vector.load %arg6[%c0_33, %c0_34, %c0_35] : memref<1x2x128xf32, #tpu.memory_space<vmem>>, vector<1x1x128xf32>
    tpu.vector_store %arg6[%c0_33, %c0_34, %c0_35], %50 {strides = array<i32>} : memref<1x2x128xf32, #tpu.memory_space<vmem>>, vector<1x1x128xf32>,
    %52 = vector.shape_cast %49 : vector<1x128xf32> to vector<1x1x128xf32>
    %c0_36 = arith.constant 0 : index
    %c1_37 = arith.constant 1 : index
    %c0_38 = arith.constant 0 : index
    %53 = vector.load %arg6[%c0_36, %c1_37, %c0_38] : memref<1x2x128xf32, #tpu.memory_space<vmem>>, vector<1x1x128xf32>
    tpu.vector_store %arg6[%c0_36, %c1_37, %c0_38], %52 {strides = array<i32>} : memref<1x2x128xf32, #tpu.memory_space<vmem>>, vector<1x1x128xf32>,
    return
  }
  func.func @transform_0(%arg0: i32) -> (i32, i32, i32, i32) {
    %c0_i32 = arith.constant 0 : i32
    %c0_i32_0 = arith.constant 0 : i32
    %c0_i32_1 = arith.constant 0 : i32
    %c0_i32_2 = arith.constant 0 : i32
    return %arg0, %c0_i32, %c0_i32_0, %c0_i32_1 : i32, i32, i32, i32
  }
  func.func @transform_1(%arg0: i32) -> (i32, i32) {
    %c0_i32 = arith.constant 0 : i32
    %c0_i32_0 = arith.constant 0 : i32
    %c0_i32_1 = arith.constant 0 : i32
    return %c0_i32, %c0_i32_0 : i32, i32
  }
  func.func @transform_2(%arg0: i32) -> (i32, i32) {
    %c0_i32 = arith.constant 0 : i32
    %c0_i32_0 = arith.constant 0 : i32
    %c0_i32_1 = arith.constant 0 : i32
    return %c0_i32, %c0_i32_0 : i32, i32
  }
  func.func @transform_3(%arg0: i32) -> (i32, i32, i32) {
    %c0_i32 = arith.constant 0 : i32
    %c0_i32_0 = arith.constant 0 : i32
    %c0_i32_1 = arith.constant 0 : i32
    %c0_i32_2 = arith.constant 0 : i32
    return %c0_i32, %c0_i32_0, %c0_i32_1 : i32, i32, i32
  }
  func.func @transform_4(%arg0: i32) -> (i32, i32, i32) {
    %c0_i32 = arith.constant 0 : i32
    %c0_i32_0 = arith.constant 0 : i32
    %c0_i32_1 = arith.constant 0 : i32
    return %arg0, %c0_i32, %c0_i32_0 : i32, i32, i32
  }
  func.func @transform_5(%arg0: i32) -> (i32, i32, i32) {
    %c0_i32 = arith.constant 0 : i32
    %c0_i32_0 = arith.constant 0 : i32
    %c0_i32_1 = arith.constant 0 : i32
    return %arg0, %c0_i32, %c0_i32_0 : i32, i32, i32
  }
}

module attributes {stable_mosaic.version = 11 : i64} {
  func.func @_bn_relu_kernel(%arg0: i32, %arg1: memref<512x128xbf16, #tpu.memory_space<vmem>>, %arg2: memref<1x128xf32, #tpu.memory_space<vmem>>, %arg3: memref<1x128xf32, #tpu.memory_space<vmem>>, %arg4: memref<512x128xf32, #tpu.memory_space<vmem>>) attributes {dimension_semantics = [#tpu.dimension_semantics<parallel>], iteration_bounds = array<i64: 1>, scalar_prefetch = 0 : i64, scratch_operands = 0 : i64, tpu.core_type = #tpu.core_type<tc>, window_params = [{transform_indices = @transform_0, window_bounds = array<i64: 512, 128>}, {pipeline_mode = #tpu.pipeline_mode<synchronous>, transform_indices = @transform_1, window_bounds = array<i64: 1, 128>}, {pipeline_mode = #tpu.pipeline_mode<synchronous>, transform_indices = @transform_2, window_bounds = array<i64: 1, 128>}, {transform_indices = @transform_3, window_bounds = array<i64: 512, 128>}]} {
    %c0 = arith.constant 0 : index
    %c0_0 = arith.constant 0 : index
    %0 = vector.load %arg1[%c0, %c0_0] : memref<512x128xbf16, #tpu.memory_space<vmem>>, vector<512x128xbf16>
    %1 = arith.extf %0 : vector<512x128xbf16> to vector<512x128xf32>
    %c0_1 = arith.constant 0 : index
    %c0_2 = arith.constant 0 : index
    %2 = vector.load %arg2[%c0_1, %c0_2] : memref<1x128xf32, #tpu.memory_space<vmem>>, vector<1x128xf32>
    %3 = vector.broadcast %2 : vector<1x128xf32> to vector<512x128xf32>
    %4 = arith.mulf %1, %3 : vector<512x128xf32>
    %c0_3 = arith.constant 0 : index
    %c0_4 = arith.constant 0 : index
    %5 = vector.load %arg3[%c0_3, %c0_4] : memref<1x128xf32, #tpu.memory_space<vmem>>, vector<1x128xf32>
    %6 = vector.broadcast %5 : vector<1x128xf32> to vector<512x128xf32>
    %7 = arith.addf %4, %6 : vector<512x128xf32>
    %cst = arith.constant 0.000000e+00 : f32
    %8 = vector.broadcast %cst : f32 to vector<512x128xf32>
    %9 = arith.maximumf %7, %8 : vector<512x128xf32>
    %c0_5 = arith.constant 0 : index
    %c0_6 = arith.constant 0 : index
    %10 = vector.load %arg4[%c0_5, %c0_6] : memref<512x128xf32, #tpu.memory_space<vmem>>, vector<512x128xf32>
    tpu.vector_store %arg4[%c0_5, %c0_6], %9 {strides = array<i32>} : memref<512x128xf32, #tpu.memory_space<vmem>>, vector<512x128xf32>,
    return
  }
  func.func @transform_0(%arg0: i32) -> (i32, i32) {
    %c0_i32 = arith.constant 0 : i32
    %c0_i32_0 = arith.constant 0 : i32
    return %arg0, %c0_i32 : i32, i32
  }
  func.func @transform_1(%arg0: i32) -> (i32, i32) {
    %c0_i32 = arith.constant 0 : i32
    %c0_i32_0 = arith.constant 0 : i32
    %c0_i32_1 = arith.constant 0 : i32
    return %c0_i32, %c0_i32_0 : i32, i32
  }
  func.func @transform_2(%arg0: i32) -> (i32, i32) {
    %c0_i32 = arith.constant 0 : i32
    %c0_i32_0 = arith.constant 0 : i32
    %c0_i32_1 = arith.constant 0 : i32
    return %c0_i32, %c0_i32_0 : i32, i32
  }
  func.func @transform_3(%arg0: i32) -> (i32, i32) {
    %c0_i32 = arith.constant 0 : i32
    %c0_i32_0 = arith.constant 0 : i32
    return %arg0, %c0_i32 : i32, i32
  }
}

</mosaic_0001>

<bundles_post_ra>
// kernel: res_block_forward.5
= control target key start
LH: loop header
LB: loop body
LE: loop exit
PB: predicated region body
PF: predicated region fallthrough
CT: control target
= control target key end

     0   :  { %s1023_s0 = inlined_call_operand.vmem [shape: bf16[512,128], index: 0, kind: input, shape index: {}]   ;;  %s1024_s1 = inlined_call_operand.vmem [shape: f32[1,128], index: 1, kind: input, shape index: {}]   ;;  %s1025_s2 = inlined_call_operand.vmem [shape: f32[1,128], index: 2, kind: input, shape index: {}]   ;;  %s1026_s3 = inlined_call_operand.vmem [shape: f32[512,128], index: 3, kind: output, shape index: {}]  }
   0x1   :  { %v419_v0 = vld [vmem:[%s1023_s0] sm:$0xff]   ;;  %v546_v4 = vld [vmem:[%s1023_s0 + $0x8] sm:$0xff]   ;;  %v547_v5 = vld [vmem:[%s1023_s0 + $0x10] sm:$0xff]  }
   0x2   :  { %v603_v1 = vld [vmem:[%s1024_s1] ss:$0 sm:$0xff]  ;;  %v420_v2 = vunpack.c.l.bf16 %v419_v0  ;;  %v421_v3 = vunpack.c.h.bf16 %v419_v0  ;;  %v548_v6 = vld [vmem:[%s1023_s0 + $0x18] sm:$0xff]   ;;  %v424_v8 = vunpack.c.l.bf16 %v546_v4  ;;  %v425_v9 = vunpack.c.h.bf16 %v546_v4  ;;  %v550_v33 = vld [vmem:[%s1023_s0 + $0x28] sm:$0xff]  }
   0x3   :  { %v617_v7 = vld [vmem:[%s1025_s2] ss:$0 sm:$0xff]  ;;  %v428_v10 = vunpack.c.l.bf16 %v547_v5  ;;  %v429_v11 = vunpack.c.h.bf16 %v547_v5  ;;  %v432_v14 = vunpack.c.l.bf16 %v548_v6  ;;  %v433_v15 = vunpack.c.h.bf16 %v548_v6  ;;  %v551_v34 = vld [vmem:[%s1023_s0 + $0x30] sm:$0xff]   ;;  %v552_v39 = vld [vmem:[%s1023_s0 + $0x38] sm:$0xff]  }
   0x4   :  { %v149_v12 = vmul.f32 %v420_v2, %v603_v1  ;;  %v150_v13 = vmul.f32 %v421_v3, %v603_v1  ;;  %v151_v16 = vmul.f32 %v424_v8, %v603_v1  ;;  %v152_v17 = vmul.f32 %v425_v9, %v603_v1  ;;  %v549_v28 = vld [vmem:[%s1023_s0 + $0x20] sm:$0xff]   ;;  %v554_v6 = vld [vmem:[%s1023_s0 + $0x48] sm:$0xff]   ;;  %v555_v8 = vld [vmem:[%s1023_s0 + $0x50] sm:$0xff]  }
   0x5   :  { %v153_v18 = vmul.f32 %v428_v10, %v603_v1  ;;  %v154_v19 = vmul.f32 %v429_v11, %v603_v1  ;;  %v155_v22 = vmul.f32 %v432_v14, %v603_v1  ;;  %v156_v23 = vmul.f32 %v433_v15, %v603_v1  ;;  %v553_v0 = vld [vmem:[%s1023_s0 + $0x40] sm:$0xff]  }
   0x6   :  { %v220_v20 = vadd.f32 %v617_v7, %v149_v12  ;;  %v221_v21 = vadd.f32 %v617_v7, %v150_v13  ;;  %v222_v24 = vadd.f32 %v617_v7, %v151_v16  ;;  %v223_v25 = vadd.f32 %v617_v7, %v152_v17  ;;  %v556_v13 = vld [vmem:[%s1023_s0 + $0x58] sm:$0xff]  }
   0x7   :  { %v224_v26 = vadd.f32 %v617_v7, %v153_v18  ;;  %v225_v27 = vadd.f32 %v617_v7, %v154_v19  ;;  %v226_v31 = vadd.f32 %v617_v7, %v155_v22  ;;  %v227_v32 = vadd.f32 %v617_v7, %v156_v23 }
   0x8   :  { %v284_v29 = vmax.f32 %v220_v20, 0.0  ;;  %v285_v30 = vmax.f32 %v221_v21, 0.0  ;;  %v286_v35 = vmax.f32 %v222_v24, 0.0  ;;  %v287_v36 = vmax.f32 %v223_v25, 0.0 }
   0x9   :  { %v288_v37 = vmax.f32 %v224_v26, 0.0  ;;  %v289_v38 = vmax.f32 %v225_v27, 0.0  ;;  %v290_v40 = vmax.f32 %v226_v31, 0.0  ;;  %v291_v41 = vmax.f32 %v227_v32, 0.0 }
   0xa   :  { %348 = vst [vmem:[%s1026_s3] sm:$0xff] %v284_v29  ;;  %349 = vst [vmem:[%s1026_s3 + $0x8] sm:$0xff] %v285_v30  ;;  %v436_v42 = vunpack.c.l.bf16 %v549_v28  ;;  %v437_v43 = vunpack.c.h.bf16 %v549_v28  ;;  %v440_v44 = vunpack.c.l.bf16 %v550_v33  ;;  %v441_v45 = vunpack.c.h.bf16 %v550_v33 }
   0xb   :  { %350 = vst [vmem:[%s1026_s3 + $0x10] sm:$0xff] %v286_v35  ;;  %351 = vst [vmem:[%s1026_s3 + $0x18] sm:$0xff] %v287_v36  ;;  %v444_v46 = vunpack.c.l.bf16 %v551_v34  ;;  %v445_v47 = vunpack.c.h.bf16 %v551_v34  ;;  %v448_v50 = vunpack.c.l.bf16 %v552_v39  ;;  %v449_v51 = vunpack.c.h.bf16 %v552_v39 }
   0xc   :  { %352 = vst [vmem:[%s1026_s3 + $0x20] sm:$0xff] %v288_v37  ;;  %353 = vst [vmem:[%s1026_s3 + $0x28] sm:$0xff] %v289_v38  ;;  %v157_v48 = vmul.f32 %v436_v42, %v603_v1  ;;  %v158_v49 = vmul.f32 %v437_v43, %v603_v1  ;;  %v159_v52 = vmul.f32 %v440_v44, %v603_v1  ;;  %v452_v16 = vunpack.c.l.bf16 %v553_v0  ;;  %v557_v38 = vld [vmem:[%s1023_s0 + $0x60] sm:$0xff]   ;;  %v558_v43 = vld [vmem:[%s1023_s0 + $0x68] sm:$0xff]  }
   0xd   :  { %354 = vst [vmem:[%s1026_s3 + $0x30] sm:$0xff] %v290_v40  ;;  %355 = vst [vmem:[%s1026_s3 + $0x38] sm:$0xff] %v291_v41  ;;  %v160_v53 = vmul.f32 %v441_v45, %v603_v1  ;;  %v161_v54 = vmul.f32 %v444_v46, %v603_v1  ;;  %v162_v55 = vmul.f32 %v445_v47, %v603_v1  ;;  %v453_v17 = vunpack.c.h.bf16 %v553_v0  ;;  %v559_v44 = vld [vmem:[%s1023_s0 + $0x70] sm:$0xff]  }
   0xe   :  { %v228_v56 = vadd.f32 %v617_v7, %v157_v48  ;;  %v229_v57 = vadd.f32 %v617_v7, %v158_v49  ;;  %v163_v58 = vmul.f32 %v448_v50, %v603_v1  ;;  %v164_v59 = vmul.f32 %v449_v51, %v603_v1  ;;  %v560_v49 = vld [vmem:[%s1023_s0 + $0x78] sm:$0xff]  }
   0xf   :  { %v230_v60 = vadd.f32 %v617_v7, %v159_v52  ;;  %v231_v61 = vadd.f32 %v617_v7, %v160_v53  ;;  %v232_v62 = vadd.f32 %v617_v7, %v161_v54  ;;  %v233_v63 = vadd.f32 %v617_v7, %v162_v55 }
  0x10   :  { %v292_v2 = vmax.f32 %v228_v56, 0.0  ;;  %v293_v3 = vmax.f32 %v229_v57, 0.0  ;;  %v234_v4 = vadd.f32 %v617_v7, %v163_v58  ;;  %v235_v5 = vadd.f32 %v617_v7, %v164_v59 }
  0x11   :  { %v294_v9 = vmax.f32 %v230_v60, 0.0  ;;  %v295_v10 = vmax.f32 %v231_v61, 0.0  ;;  %v296_v11 = vmax.f32 %v232_v62, 0.0  ;;  %v297_v12 = vmax.f32 %v233_v63, 0.0 }
  0x12   :  { %356 = vst [vmem:[%s1026_s3 + $0x40] sm:$0xff] %v292_v2  ;;  %357 = vst [vmem:[%s1026_s3 + $0x48] sm:$0xff] %v293_v3  ;;  %v298_v14 = vmax.f32 %v234_v4, 0.0  ;;  %v299_v15 = vmax.f32 %v235_v5, 0.0  ;;  %v456_v18 = vunpack.c.l.bf16 %v554_v6  ;;  %v457_v19 = vunpack.c.h.bf16 %v554_v6 }
  0x13   :  { %358 = vst [vmem:[%s1026_s3 + $0x50] sm:$0xff] %v294_v9  ;;  %359 = vst [vmem:[%s1026_s3 + $0x58] sm:$0xff] %v295_v10  ;;  %v460_v20 = vunpack.c.l.bf16 %v555_v8  ;;  %v461_v21 = vunpack.c.h.bf16 %v555_v8  ;;  %v165_v22 = vmul.f32 %v452_v16, %v603_v1  ;;  %v166_v23 = vmul.f32 %v453_v17, %v603_v1  ;;  %v562_v17 = vld [vmem:[%s1023_s0 + $0x88] sm:$0xff]  }
  0x14   :  { %360 = vst [vmem:[%s1026_s3 + $0x60] sm:$0xff] %v296_v11  ;;  %361 = vst [vmem:[%s1026_s3 + $0x68] sm:$0xff] %v297_v12  ;;  %v464_v24 = vunpack.c.l.bf16 %v556_v13  ;;  %v465_v25 = vunpack.c.h.bf16 %v556_v13  ;;  %v167_v26 = vmul.f32 %v456_v18, %v603_v1  ;;  %v168_v27 = vmul.f32 %v457_v19, %v603_v1  ;;  %v561_v12 = vld [vmem:[%s1023_s0 + $0x80] sm:$0xff]   ;;  %v563_v18 = vld [vmem:[%s1023_s0 + $0x90] sm:$0xff]  }
  0x15   :  { %362 = vst [vmem:[%s1026_s3 + $0x70] sm:$0xff] %v298_v14  ;;  %363 = vst [vmem:[%s1026_s3 + $0x78] sm:$0xff] %v299_v15  ;;  %v169_v28 = vmul.f32 %v460_v20, %v603_v1  ;;  %v170_v29 = vmul.f32 %v461_v21, %v603_v1  ;;  %v236_v30 = vadd.f32 %v617_v7, %v165_v22  ;;  %v468_v52 = vunpack.c.l.bf16 %v557_v38 }
  0x16   :  { %v237_v31 = vadd.f32 %v617_v7, %v166_v23  ;;  %v171_v32 = vmul.f32 %v464_v24, %v603_v1  ;;  %v172_v33 = vmul.f32 %v465_v25, %v603_v1  ;;  %v238_v34 = vadd.f32 %v617_v7, %v167_v26  ;;  %v564_v23 = vld [vmem:[%s1023_s0 + $0x98] sm:$0xff]  }
  0x17   :  { %v239_v35 = vadd.f32 %v617_v7, %v168_v27  ;;  %v240_v36 = vadd.f32 %v617_v7, %v169_v28  ;;  %v241_v37 = vadd.f32 %v617_v7, %v170_v29  ;;  %v300_v39 = vmax.f32 %v236_v30, 0.0 }
  0x18   :  { %v301_v40 = vmax.f32 %v237_v31, 0.0  ;;  %v242_v41 = vadd.f32 %v617_v7, %v171_v32  ;;  %v243_v42 = vadd.f32 %v617_v7, %v172_v33  ;;  %v302_v45 = vmax.f32 %v238_v34, 0.0 }
  0x19   :  { %v303_v46 = vmax.f32 %v239_v35, 0.0  ;;  %v304_v47 = vmax.f32 %v240_v36, 0.0  ;;  %v305_v48 = vmax.f32 %v241_v37, 0.0  ;;  %364 = vst [vmem:[%s1026_s3 + $0x80] sm:$0xff] %v300_v39  ;;  %v469_v53 = vunpack.c.h.bf16 %v557_v38 }
  0x1a   :  { %365 = vst [vmem:[%s1026_s3 + $0x88] sm:$0xff] %v301_v40  ;;  %v306_v50 = vmax.f32 %v242_v41, 0.0  ;;  %v307_v51 = vmax.f32 %v243_v42, 0.0  ;;  %366 = vst [vmem:[%s1026_s3 + $0x90] sm:$0xff] %v302_v45  ;;  %v472_v54 = vunpack.c.l.bf16 %v558_v43  ;;  %v473_v55 = vunpack.c.h.bf16 %v558_v43 }
  0x1b   :  { %367 = vst [vmem:[%s1026_s3 + $0x98] sm:$0xff] %v303_v46  ;;  %368 = vst [vmem:[%s1026_s3 + $0xa0] sm:$0xff] %v304_v47  ;;  %v476_v56 = vunpack.c.l.bf16 %v559_v44  ;;  %v477_v57 = vunpack.c.h.bf16 %v559_v44  ;;  %v173_v58 = vmul.f32 %v468_v52, %v603_v1  ;;  %v174_v59 = vmul.f32 %v469_v53, %v603_v1  ;;  %v566_v53 = vld [vmem:[%s1023_s0 + $0xa8] sm:$0xff]  }
  0x1c   :  { %369 = vst [vmem:[%s1026_s3 + $0xa8] sm:$0xff] %v305_v48  ;;  %370 = vst [vmem:[%s1026_s3 + $0xb0] sm:$0xff] %v306_v50  ;;  %v480_v60 = vunpack.c.l.bf16 %v560_v49  ;;  %v481_v61 = vunpack.c.h.bf16 %v560_v49  ;;  %v175_v62 = vmul.f32 %v472_v54, %v603_v1  ;;  %v176_v63 = vmul.f32 %v473_v55, %v603_v1  ;;  %v565_v48 = vld [vmem:[%s1023_s0 + $0xa0] sm:$0xff]   ;;  %v567_v54 = vld [vmem:[%s1023_s0 + $0xb0] sm:$0xff]  }
  0x1d   :  { %371 = vst [vmem:[%s1026_s3 + $0xb8] sm:$0xff] %v307_v51  ;;  %v177_v0 = vmul.f32 %v476_v56, %v603_v1  ;;  %v178_v2 = vmul.f32 %v477_v57, %v603_v1  ;;  %v244_v3 = vadd.f32 %v617_v7, %v173_v58  ;;  %v245_v4 = vadd.f32 %v617_v7, %v174_v59  ;;  %v568_v59 = vld [vmem:[%s1023_s0 + $0xb8] sm:$0xff]  }
  0x1e   :  { %v179_v5 = vmul.f32 %v480_v60, %v603_v1  ;;  %v180_v6 = vmul.f32 %v481_v61, %v603_v1  ;;  %v246_v8 = vadd.f32 %v617_v7, %v175_v62  ;;  %v247_v9 = vadd.f32 %v617_v7, %v176_v63 }
  0x1f   :  { %v248_v10 = vadd.f32 %v617_v7, %v177_v0  ;;  %v249_v11 = vadd.f32 %v617_v7, %v178_v2  ;;  %v308_v13 = vmax.f32 %v244_v3, 0.0  ;;  %v309_v14 = vmax.f32 %v245_v4, 0.0 }
  0x20   :  { %v250_v15 = vadd.f32 %v617_v7, %v179_v5  ;;  %v251_v16 = vadd.f32 %v617_v7, %v180_v6  ;;  %v310_v19 = vmax.f32 %v246_v8, 0.0  ;;  %v311_v20 = vmax.f32 %v247_v9, 0.0 }
  0x21   :  { %v312_v21 = vmax.f32 %v248_v10, 0.0  ;;  %v313_v22 = vmax.f32 %v249_v11, 0.0  ;;  %372 = vst [vmem:[%s1026_s3 + $0xc0] sm:$0xff] %v308_v13  ;;  %373 = vst [vmem:[%s1026_s3 + $0xc8] sm:$0xff] %v309_v14  ;;  %v484_v26 = vunpack.c.l.bf16 %v561_v12  ;;  %v485_v27 = vunpack.c.h.bf16 %v561_v12 }
  0x22   :  { %v314_v24 = vmax.f32 %v250_v15, 0.0  ;;  %v315_v25 = vmax.f32 %v251_v16, 0.0  ;;  %374 = vst [vmem:[%s1026_s3 + $0xd0] sm:$0xff] %v310_v19  ;;  %375 = vst [vmem:[%s1026_s3 + $0xd8] sm:$0xff] %v311_v20  ;;  %v488_v28 = vunpack.c.l.bf16 %v562_v17  ;;  %v489_v29 = vunpack.c.h.bf16 %v562_v17 }
  0x23   :  { %376 = vst [vmem:[%s1026_s3 + $0xe0] sm:$0xff] %v312_v21  ;;  %377 = vst [vmem:[%s1026_s3 + $0xe8] sm:$0xff] %v313_v22  ;;  %v492_v30 = vunpack.c.l.bf16 %v563_v18  ;;  %v493_v31 = vunpack.c.h.bf16 %v563_v18  ;;  %v181_v32 = vmul.f32 %v484_v26, %v603_v1  ;;  %v182_v33 = vmul.f32 %v485_v27, %v603_v1  ;;  %v569_v22 = vld [vmem:[%s1023_s0 + $0xc0] sm:$0xff]   ;;  %v570_v27 = vld [vmem:[%s1023_s0 + $0xc8] sm:$0xff]  }
  0x24   :  { %378 = vst [vmem:[%s1026_s3 + $0xf0] sm:$0xff] %v314_v24  ;;  %379 = vst [vmem:[%s1026_s3 + $0xf8] sm:$0xff] %v315_v25  ;;  %v496_v34 = vunpack.c.l.bf16 %v564_v23  ;;  %v497_v35 = vunpack.c.h.bf16 %v564_v23  ;;  %v183_v36 = vmul.f32 %v488_v28, %v603_v1  ;;  %v184_v37 = vmul.f32 %v489_v29, %v603_v1  ;;  %v571_v28 = vld [vmem:[%s1023_s0 + $0xd0] sm:$0xff]  }
  0x25   :  { %v185_v38 = vmul.f32 %v492_v30, %v603_v1  ;;  %v186_v39 = vmul.f32 %v493_v31, %v603_v1  ;;  %v252_v40 = vadd.f32 %v617_v7, %v181_v32  ;;  %v253_v41 = vadd.f32 %v617_v7, %v182_v33  ;;  %v572_v33 = vld [vmem:[%s1023_s0 + $0xd8] sm:$0xff]  }
  0x26   :  { %v187_v42 = vmul.f32 %v496_v34, %v603_v1  ;;  %v188_v43 = vmul.f32 %v497_v35, %v603_v1  ;;  %v254_v44 = vadd.f32 %v617_v7, %v183_v36  ;;  %v255_v45 = vadd.f32 %v617_v7, %v184_v37 }
  0x27   :  { %v256_v46 = vadd.f32 %v617_v7, %v185_v38  ;;  %v257_v47 = vadd.f32 %v617_v7, %v186_v39  ;;  %v316_v49 = vmax.f32 %v252_v40, 0.0  ;;  %v317_v50 = vmax.f32 %v253_v41, 0.0 }
  0x28   :  { %v258_v51 = vadd.f32 %v617_v7, %v187_v42  ;;  %v259_v52 = vadd.f32 %v617_v7, %v188_v43  ;;  %v318_v55 = vmax.f32 %v254_v44, 0.0  ;;  %v319_v56 = vmax.f32 %v255_v45, 0.0 }
  0x29   :  { %v320_v57 = vmax.f32 %v256_v46, 0.0  ;;  %v321_v58 = vmax.f32 %v257_v47, 0.0  ;;  %380 = vst [vmem:[%s1026_s3 + $0x100] sm:$0xff] %v316_v49  ;;  %381 = vst [vmem:[%s1026_s3 + $0x108] sm:$0xff] %v317_v50  ;;  %v500_v62 = vunpack.c.l.bf16 %v565_v48  ;;  %v501_v63 = vunpack.c.h.bf16 %v565_v48 }
  0x2a   :  { %v322_v60 = vmax.f32 %v258_v51, 0.0  ;;  %v323_v61 = vmax.f32 %v259_v52, 0.0  ;;  %382 = vst [vmem:[%s1026_s3 + $0x110] sm:$0xff] %v318_v55  ;;  %383 = vst [vmem:[%s1026_s3 + $0x118] sm:$0xff] %v319_v56  ;;  %v504_v0 = vunpack.c.l.bf16 %v566_v53  ;;  %v505_v2 = vunpack.c.h.bf16 %v566_v53 }
  0x2b   :  { %384 = vst [vmem:[%s1026_s3 + $0x120] sm:$0xff] %v320_v57  ;;  %385 = vst [vmem:[%s1026_s3 + $0x128] sm:$0xff] %v321_v58  ;;  %v508_v3 = vunpack.c.l.bf16 %v567_v54  ;;  %v509_v4 = vunpack.c.h.bf16 %v567_v54  ;;  %v189_v5 = vmul.f32 %v500_v62, %v603_v1  ;;  %v190_v6 = vmul.f32 %v501_v63, %v603_v1  ;;  %v573_v58 = vld [vmem:[%s1023_s0 + $0xe0] sm:$0xff]   ;;  %v574_v63 = vld [vmem:[%s1023_s0 + $0xe8] sm:$0xff]  }
  0x2c   :  { %386 = vst [vmem:[%s1026_s3 + $0x130] sm:$0xff] %v322_v60  ;;  %387 = vst [vmem:[%s1026_s3 + $0x138] sm:$0xff] %v323_v61  ;;  %v512_v8 = vunpack.c.l.bf16 %v568_v59  ;;  %v513_v9 = vunpack.c.h.bf16 %v568_v59  ;;  %v191_v10 = vmul.f32 %v504_v0, %v603_v1  ;;  %v192_v11 = vmul.f32 %v505_v2, %v603_v1  ;;  %v575_v0 = vld [vmem:[%s1023_s0 + $0xf0] sm:$0xff]  }
  0x2d   :  { %v193_v12 = vmul.f32 %v508_v3, %v603_v1  ;;  %v194_v13 = vmul.f32 %v509_v4, %v603_v1  ;;  %v260_v14 = vadd.f32 %v617_v7, %v189_v5  ;;  %v261_v15 = vadd.f32 %v617_v7, %v190_v6  ;;  %v576_v6 = vld [vmem:[%s1023_s0 + $0xf8] sm:$0xff]  }
  0x2e   :  { %v195_v16 = vmul.f32 %v512_v8, %v603_v1  ;;  %v196_v17 = vmul.f32 %v513_v9, %v603_v1  ;;  %v262_v18 = vadd.f32 %v617_v7, %v191_v10  ;;  %v263_v19 = vadd.f32 %v617_v7, %v192_v11 }
  0x2f   :  { %v264_v20 = vadd.f32 %v617_v7, %v193_v12  ;;  %v265_v21 = vadd.f32 %v617_v7, %v194_v13  ;;  %v324_v23 = vmax.f32 %v260_v14, 0.0  ;;  %v325_v24 = vmax.f32 %v261_v15, 0.0 }
  0x30   :  { %v266_v25 = vadd.f32 %v617_v7, %v195_v16  ;;  %v267_v26 = vadd.f32 %v617_v7, %v196_v17  ;;  %v326_v29 = vmax.f32 %v262_v18, 0.0  ;;  %v327_v30 = vmax.f32 %v263_v19, 0.0 }
  0x31   :  { %v328_v31 = vmax.f32 %v264_v20, 0.0  ;;  %v329_v32 = vmax.f32 %v265_v21, 0.0  ;;  %388 = vst [vmem:[%s1026_s3 + $0x140] sm:$0xff] %v324_v23  ;;  %389 = vst [vmem:[%s1026_s3 + $0x148] sm:$0xff] %v325_v24  ;;  %v516_v36 = vunpack.c.l.bf16 %v569_v22  ;;  %v517_v37 = vunpack.c.h.bf16 %v569_v22 }
  0x32   :  { %v330_v34 = vmax.f32 %v266_v25, 0.0  ;;  %v331_v35 = vmax.f32 %v267_v26, 0.0  ;;  %390 = vst [vmem:[%s1026_s3 + $0x150] sm:$0xff] %v326_v29  ;;  %391 = vst [vmem:[%s1026_s3 + $0x158] sm:$0xff] %v327_v30  ;;  %v520_v38 = vunpack.c.l.bf16 %v570_v27  ;;  %v521_v39 = vunpack.c.h.bf16 %v570_v27 }
  0x33   :  { %392 = vst [vmem:[%s1026_s3 + $0x160] sm:$0xff] %v328_v31  ;;  %393 = vst [vmem:[%s1026_s3 + $0x168] sm:$0xff] %v329_v32  ;;  %v524_v40 = vunpack.c.l.bf16 %v571_v28  ;;  %v525_v41 = vunpack.c.h.bf16 %v571_v28  ;;  %v197_v42 = vmul.f32 %v516_v36, %v603_v1  ;;  %v198_v43 = vmul.f32 %v517_v37, %v603_v1 }
  0x34   :  { %394 = vst [vmem:[%s1026_s3 + $0x170] sm:$0xff] %v330_v34  ;;  %395 = vst [vmem:[%s1026_s3 + $0x178] sm:$0xff] %v331_v35  ;;  %v528_v44 = vunpack.c.l.bf16 %v572_v33  ;;  %v529_v45 = vunpack.c.h.bf16 %v572_v33  ;;  %v199_v46 = vmul.f32 %v520_v38, %v603_v1  ;;  %v200_v47 = vmul.f32 %v521_v39, %v603_v1 }
  0x35   :  { %v201_v48 = vmul.f32 %v524_v40, %v603_v1  ;;  %v202_v49 = vmul.f32 %v525_v41, %v603_v1  ;;  %v268_v50 = vadd.f32 %v617_v7, %v197_v42  ;;  %v269_v51 = vadd.f32 %v617_v7, %v198_v43 }
  0x36   :  { %v203_v52 = vmul.f32 %v528_v44, %v603_v1  ;;  %v204_v53 = vmul.f32 %v529_v45, %v603_v1  ;;  %v270_v54 = vadd.f32 %v617_v7, %v199_v46  ;;  %v271_v55 = vadd.f32 %v617_v7, %v200_v47 }
  0x37   :  { %v272_v56 = vadd.f32 %v617_v7, %v201_v48  ;;  %v273_v57 = vadd.f32 %v617_v7, %v202_v49  ;;  %v332_v59 = vmax.f32 %v268_v50, 0.0  ;;  %v333_v60 = vmax.f32 %v269_v51, 0.0 }
  0x38   :  { %v274_v61 = vadd.f32 %v617_v7, %v203_v52  ;;  %v275_v62 = vadd.f32 %v617_v7, %v204_v53  ;;  %v334_v2 = vmax.f32 %v270_v54, 0.0  ;;  %v335_v3 = vmax.f32 %v271_v55, 0.0 }
  0x39   :  { %v336_v4 = vmax.f32 %v272_v56, 0.0  ;;  %v337_v5 = vmax.f32 %v273_v57, 0.0  ;;  %396 = vst [vmem:[%s1026_s3 + $0x180] sm:$0xff] %v332_v59  ;;  %397 = vst [vmem:[%s1026_s3 + $0x188] sm:$0xff] %v333_v60  ;;  %v532_v10 = vunpack.c.l.bf16 %v573_v58  ;;  %v533_v11 = vunpack.c.h.bf16 %v573_v58 }
  0x3a   :  { %v338_v8 = vmax.f32 %v274_v61, 0.0  ;;  %v339_v9 = vmax.f32 %v275_v62, 0.0  ;;  %398 = vst [vmem:[%s1026_s3 + $0x190] sm:$0xff] %v334_v2  ;;  %399 = vst [vmem:[%s1026_s3 + $0x198] sm:$0xff] %v335_v3  ;;  %v536_v12 = vunpack.c.l.bf16 %v574_v63  ;;  %v537_v13 = vunpack.c.h.bf16 %v574_v63 }
  0x3b   :  { %400 = vst [vmem:[%s1026_s3 + $0x1a0] sm:$0xff] %v336_v4  ;;  %401 = vst [vmem:[%s1026_s3 + $0x1a8] sm:$0xff] %v337_v5  ;;  %v540_v14 = vunpack.c.l.bf16 %v575_v0  ;;  %v541_v15 = vunpack.c.h.bf16 %v575_v0  ;;  %v205_v16 = vmul.f32 %v532_v10, %v603_v1  ;;  %v206_v17 = vmul.f32 %v533_v11, %v603_v1 }
  0x3c   :  { %402 = vst [vmem:[%s1026_s3 + $0x1b0] sm:$0xff] %v338_v8  ;;  %403 = vst [vmem:[%s1026_s3 + $0x1b8] sm:$0xff] %v339_v9  ;;  %v544_v18 = vunpack.c.l.bf16 %v576_v6  ;;  %v545_v19 = vunpack.c.h.bf16 %v576_v6  ;;  %v207_v20 = vmul.f32 %v536_v12, %v603_v1  ;;  %v208_v21 = vmul.f32 %v537_v13, %v603_v1 }
  0x3d   :  { %v209_v22 = vmul.f32 %v540_v14, %v603_v1  ;;  %v210_v23 = vmul.f32 %v541_v15, %v603_v1  ;;  %v276_v24 = vadd.f32 %v617_v7, %v205_v16  ;;  %v277_v25 = vadd.f32 %v617_v7, %v206_v17 }
  0x3e   :  { %v211_v26 = vmul.f32 %v544_v18, %v603_v1  ;;  %v212_v27 = vmul.f32 %v545_v19, %v603_v1  ;;  %v278_v28 = vadd.f32 %v617_v7, %v207_v20  ;;  %v279_v29 = vadd.f32 %v617_v7, %v208_v21 }
  0x3f   :  { %v280_v30 = vadd.f32 %v617_v7, %v209_v22  ;;  %v281_v31 = vadd.f32 %v617_v7, %v210_v23  ;;  %v340_v32 = vmax.f32 %v276_v24, 0.0  ;;  %v341_v33 = vmax.f32 %v277_v25, 0.0 }
  0x40   :  { %v282_v34 = vadd.f32 %v617_v7, %v211_v26  ;;  %v283_v35 = vadd.f32 %v617_v7, %v212_v27  ;;  %v342_v36 = vmax.f32 %v278_v28, 0.0  ;;  %v343_v37 = vmax.f32 %v279_v29, 0.0 }
  0x41   :  { %v344_v38 = vmax.f32 %v280_v30, 0.0  ;;  %v345_v39 = vmax.f32 %v281_v31, 0.0  ;;  %404 = vst [vmem:[%s1026_s3 + $0x1c0] sm:$0xff] %v340_v32  ;;  %405 = vst [vmem:[%s1026_s3 + $0x1c8] sm:$0xff] %v341_v33 }
  0x42   :  { %v346_v1 = vmax.f32 %v282_v34, 0.0  ;;  %v347_v40 = vmax.f32 %v283_v35, 0.0  ;;  %406 = vst [vmem:[%s1026_s3 + $0x1d0] sm:$0xff] %v342_v36  ;;  %407 = vst [vmem:[%s1026_s3 + $0x1d8] sm:$0xff] %v343_v37 }
  0x43   :  { %408 = vst [vmem:[%s1026_s3 + $0x1e0] sm:$0xff] %v344_v38  ;;  %409 = vst [vmem:[%s1026_s3 + $0x1e8] sm:$0xff] %v345_v39 }
  0x44   :  { %410 = vst [vmem:[%s1026_s3 + $0x1f0] sm:$0xff] %v346_v1  ;;  %411 = vst [vmem:[%s1026_s3 + $0x1f8] sm:$0xff] %v347_v40 }

// kernel: res_block_forward.3
= control target key start
LH: loop header
LB: loop body
LE: loop exit
PB: predicated region body
PF: predicated region fallthrough
CT: control target
= control target key end

     0   :  { %s4183_s18 = smov 0   ;;  %s4964_s0 = inlined_call_operand.vmem [shape: bf16[2,16,16,4], index: 0, kind: input, shape index: {}]   ;;  %s4965_s1 = inlined_call_operand.vmem [shape: f32[1,128], index: 1, kind: input, shape index: {}, may-alias: {1,2}]   ;;  %s4966_s2 = inlined_call_operand.vmem [shape: f32[1,128], index: 2, kind: input, shape index: {}, may-alias: {1,2}]   ;;  %s4967_s3 = inlined_call_operand.vmem [shape: bf16[9,4,128], index: 3, kind: input, shape index: {}]   ;;  %s4968_s4 = inlined_call_operand.vmem [shape: bf16[2,256,128], index: 4, kind: output, shape index: {0}]   ;;  %s4969_s5 = inlined_call_operand.vmem [shape: f32[2,2,128], index: 5, kind: output, shape index: {1}]  }
   0x1 LB: > { %s3004_s1 = sadd.s32 4294967295, %s4150_s18   ;;  %p3008_p0 = scmp.ge.s32.totalorder %s4150_s18, 1  ;;  %s4150_s18 = sphi %s4183_s18, %s16_s18  }
   0x2   : > { %p190_p1 = scmp.lt.s32.totalorder %s4150_s18, 3 }
   0x4   : > { %p191_p2 = pnand %p3008_p0, %p190_p1 }
   0x6   : > { %194 = sbr.rel (%p191_p2) target bundleno = 579 (0x243), region = 36 }
   0xd   : > { %v3014_v0 = vld [vmem:[%s4967_s3 + $0x2] sm:$0x3]  ;;  %vm724_vm0 = vcmask 1041408   ;;  %v4197_v1 = vld [vmem:[%s4967_s3 + $0x8] sm:$0x3]  ;;  %vm301_vm1 = vcmask 31744  }
   0xe   : > { %4125 = vmatprep.subr.msk.bf16.mxu1 %vm724_vm0, %v3014_v0  ;;  %4129 = vmatprep.subr.msk.bf16.mxu0 %vm724_vm0, %v4197_v1  ;;  %v726_v2 = vsel %vm724_vm0, %v3014_v0, 0  ;;  %v4205_v3 = vsel %vm724_vm0, %v4197_v1, 0  ;;  %vm304_vm2 = vcmask 25600   ;;  %p4209_p3 = scmp.lt.s32.totalorder %s3004_s1, 1  ;;  %v4152_v4 = vmov 0.0  }
   0xf   : > { %3562 = vmatpush3.bf16.msra.mxu1 %v726_v2  ;;  %3698 = vmatpush3.bf16.msra.mxu0 %v4205_v3  ;;  %302 = vst.msk [vmem:[#allocation2] sm:$0xff] %vm301_vm1, %v4152_v4  ;;  %303 = vst.msk [vmem:[#allocation2 + $0x8] sm:$0xff] %vm301_vm1, %v4152_v4  ;;  %v4271_v5 = vld [vmem:[%s4967_s3] sm:$0x3]  ;;  %v4276_v6 = vld [vmem:[%s4967_s3 + $0xa] sm:$0x3] }
  0x10   : > { %305 = vst.msk [vmem:[#allocation2 + $0x10] sm:$0x3] %vm304_vm2, %v4152_v4  ;;  %308 = vst.msk [vmem:[#allocation2 + $0x28] sm:$0x3] %vm304_vm2, %v4152_v4  ;;  %s4976_s1 = smov (!%p4209_p3, %s3004_s1), 1  ;;  %4126 = vmatprep.subr.msk.bf16.mxu1 %vm724_vm0, %v4271_v5  ;;  %4131 = vmatprep.subr.msk.bf16.mxu0 %vm724_vm0, %v4276_v6  ;;  %vm1119_vm4 = vcmask 1046528  }
  0x11   : > { %306 = vst.msk [vmem:[#allocation2 + $0x18] sm:$0xff] %vm301_vm1, %v4152_v4  ;;  %307 = vst.msk [vmem:[#allocation2 + $0x20] sm:$0xff] %vm301_vm1, %v4152_v4  ;;  %s3200_s27 = sshll.u32 %s4976_s1, 7  ;;  %vm483_vm3 = vsmask.f32 7424  ;;  %s3013_s19 = sshll.u32 %s4976_s1, 1 }
  0x12   : > { %309 = vst.msk [vmem:[#allocation2 + $0x30] sm:$0xff] %vm301_vm1, %v4152_v4  ;;  %310 = vst.msk [vmem:[#allocation2 + $0x38] sm:$0xff] %vm301_vm1, %v4152_v4  ;;  %s4294_s30 = scalar_lea.vmem %s4964_s0, %s3200_s27  ;;  %s4935_s2 = scalar_lea.vmem %s4968_s4, %s3200_s27 }
  0x13   : > { %311 = vst.msk [vmem:[#allocation2 + $0x40] sm:$0x3] %vm304_vm2, %v4152_v4  ;;  %314 = vst.msk [vmem:[#allocation2 + $0x58] sm:$0x3] %vm304_vm2, %v4152_v4  ;;  %v3235_v7 = vld [vmem:[%s4294_s30] sm:$0xff]   ;;  %v3378_v8 = vld [vmem:[%s4294_s30 + $0x8] sm:$0xff]   ;;  %s235_s22 = scalar_lea.vmem %s4969_s5, %s3013_s19 }
  0x14   : > { %312 = vst.msk [vmem:[#allocation2 + $0x48] sm:$0xff] %vm301_vm1, %v4152_v4  ;;  %313 = vst.msk [vmem:[#allocation2 + $0x50] sm:$0xff] %vm301_vm1, %v4152_v4  ;;  %v3379_v9 = vld [vmem:[%s4294_s30 + $0x10] sm:$0xff]   ;;  %v3236_v10 = vunpack.c.l.bf16 %v3235_v7  ;;  %v3237_v11 = vunpack.c.h.bf16 %v3235_v7  ;;  %v3240_v12 = vunpack.c.l.bf16 %v3378_v8  ;;  %v3241_v13 = vunpack.c.h.bf16 %v3378_v8  ;;  %v3380_v14 = vld [vmem:[%s4294_s30 + $0x18] sm:$0xff]  }
  0x15   : > { %315 = vst.msk [vmem:[#allocation2 + $0x60] sm:$0xff] %vm301_vm1, %v4152_v4  ;;  %316 = vst.msk [vmem:[#allocation2 + $0x68] sm:$0xff] %vm301_vm1, %v4152_v4  ;;  %v3381_v15 = vld [vmem:[%s4294_s30 + $0x20] sm:$0xff]   ;;  %v3382_v16 = vld [vmem:[%s4294_s30 + $0x28] sm:$0xff]   ;;  %v3244_v20 = vunpack.c.l.bf16 %v3379_v9  ;;  %v3245_v21 = vunpack.c.h.bf16 %v3379_v9  ;;  %v3248_v22 = vunpack.c.l.bf16 %v3380_v14  ;;  %v3249_v23 = vunpack.c.h.bf16 %v3380_v14 }
  0x16   : > { %317 = vst.msk [vmem:[#allocation2 + $0x70] sm:$0x3] %vm304_vm2, %v4152_v4  ;;  %320 = vst.msk [vmem:[#allocation2 + $0x88] sm:$0x3] %vm304_vm2, %v4152_v4  ;;  %v390_v17 = vld [vmem:[#allocation2] sm:$0xff]  ;;  %v391_v18 = vld [vmem:[#allocation2 + $0x8] sm:$0xff]  ;;  %v3252_v26 = vunpack.c.l.bf16 %v3381_v15  ;;  %v3253_v27 = vunpack.c.h.bf16 %v3381_v15  ;;  %v3256_v31 = vunpack.c.l.bf16 %v3382_v16  ;;  %v3257_v32 = vunpack.c.h.bf16 %v3382_v16 }
  0x17   : > { %318 = vst.msk [vmem:[#allocation2 + $0x78] sm:$0xff] %vm301_vm1, %v4152_v4  ;;  %319 = vst.msk [vmem:[#allocation2 + $0x80] sm:$0xff] %vm301_vm1, %v4152_v4  ;;  %v392_v19 = vld [vmem:[#allocation2 + $0x10] sm:$0x3]  ;;  %v4302_v24 = vpack.c.bf16 %v391_v18, %v390_v17  ;;  %v3384_v29 = vld [vmem:[%s4294_s30 + $0x38] sm:$0xff]   ;;  %v922_v15 = vsel %vm724_vm0, %v4271_v5, 0 }
  0x18   : > { %321 = vst.msk [vmem:[#allocation2 + $0x90] sm:$0xff] %vm301_vm1, %v4152_v4  ;;  %322 = vst.msk [vmem:[#allocation2 + $0x98] sm:$0xff] %vm301_vm1, %v4152_v4  ;;  %v4304_v25 = vpack.c.bf16 %v392_v19, %v392_v19  ;;  %v3383_v28 = vld [vmem:[%s4294_s30 + $0x30] sm:$0xff]   ;;  %v3385_v30 = vld [vmem:[%s4294_s30 + $0x40] sm:$0xff]   ;;  %v3264_v40 = vunpack.c.l.bf16 %v3384_v29  ;;  %v3265_v43 = vunpack.c.h.bf16 %v3384_v29  ;;  %v1836_v18 = vsel %vm724_vm0, %v4276_v6, 0 }
  0x19   : > { %323 = vst.msk [vmem:[#allocation2 + $0xa0] sm:$0x3] %vm304_vm2, %v4152_v4  ;;  %326 = vst.msk [vmem:[#allocation2 + $0xb8] sm:$0x3] %vm304_vm2, %v4152_v4  ;;  %v3260_v33 = vunpack.c.l.bf16 %v3383_v28  ;;  %v3261_v34 = vunpack.c.h.bf16 %v3383_v28  ;;  %v3386_v35 = vld [vmem:[%s4294_s30 + $0x48] sm:$0xff]   ;;  %v3387_v36 = vld [vmem:[%s4294_s30 + $0x50] sm:$0xff]   ;;  %v3268_v44 = vunpack.c.l.bf16 %v3385_v30  ;;  %v3269_v45 = vunpack.c.h.bf16 %v3385_v30 }
  0x1a   : > { %324 = vst.msk [vmem:[#allocation2 + $0xa8] sm:$0xff] %vm301_vm1, %v4152_v4  ;;  %325 = vst.msk [vmem:[#allocation2 + $0xb0] sm:$0xff] %vm301_vm1, %v4152_v4  ;;  %v485_v37 = vshrl.u32 %v4302_v24, 16  ;;  %v487_v38 = vshll.u32 %v4302_v24, 16  ;;  %v492_v39 = vshll.u32 %v4304_v25, 16  ;;  %v3388_v41 = vld [vmem:[%s4294_s30 + $0x58] sm:$0xff]   ;;  %v3272_v46 = vunpack.c.l.bf16 %v3386_v35 }
  0x1b   : > { %327 = vst.msk [vmem:[#allocation2 + $0xc0] sm:$0xff] %vm301_vm1, %v4152_v4  ;;  %328 = vst.msk [vmem:[#allocation2 + $0xc8] sm:$0xff] %vm301_vm1, %v4152_v4  ;;  %v3389_v42 = vld [vmem:[%s4294_s30 + $0x60] sm:$0xff]   ;;  %v3390_v47 = vld [vmem:[%s4294_s30 + $0x68] sm:$0xff]   ;;  %v3273_v50 = vunpack.c.h.bf16 %v3386_v35  ;;  %v3276_v51 = vunpack.c.l.bf16 %v3387_v36  ;;  %v3277_v54 = vunpack.c.h.bf16 %v3387_v36  ;;  %v3280_v55 = vunpack.c.l.bf16 %v3388_v41 }
  0x1c   : > { %329 = vst.msk [vmem:[#allocation2 + $0xd0] sm:$0x3] %vm304_vm2, %v4152_v4  ;;  %332 = vst.msk [vmem:[#allocation2 + $0xe8] sm:$0x3] %vm304_vm2, %v4152_v4  ;;  %v489_v48 = vrot.slane %v487_v38, 1  ;;  %v494_v49 = vrot.slane %v492_v39, 1  ;;  %v3281_v56 = vunpack.c.h.bf16 %v3388_v41  ;;  %v3284_v57 = vunpack.c.l.bf16 %v3389_v42 }
  0x1d   : > { %330 = vst.msk [vmem:[#allocation2 + $0xd8] sm:$0xff] %vm301_vm1, %v4152_v4  ;;  %331 = vst.msk [vmem:[#allocation2 + $0xe0] sm:$0xff] %vm301_vm1, %v4152_v4  ;;  %v3391_v52 = vld [vmem:[%s4294_s30 + $0x70] sm:$0xff]   ;;  %v3392_v53 = vld [vmem:[%s4294_s30 + $0x78] sm:$0xff]   ;;  %v3285_v59 = vunpack.c.h.bf16 %v3389_v42  ;;  %v3288_v60 = vunpack.c.l.bf16 %v3390_v47  ;;  %v3289_v61 = vunpack.c.h.bf16 %v3390_v47 }
  0x1e   : > { %333 = vst.msk [vmem:[#allocation2 + $0xf0] sm:$0xff] %vm301_vm1, %v4152_v4  ;;  %334 = vst.msk [vmem:[#allocation2 + $0xf8] sm:$0xff] %vm301_vm1, %v4152_v4  ;;  %v490_v58 = vor.u32 %v489_v48, %v485_v37  ;;  %v3292_v2 = vunpack.c.l.bf16 %v3391_v52  ;;  %v3296_v7 = vunpack.c.l.bf16 %v3392_v53  ;;  %v3297_v8 = vunpack.c.h.bf16 %v3392_v53 }
  0x1f   : > { %335 = vst.msk [vmem:[#allocation2 + $0x100] sm:$0x3] %vm304_vm2, %v4152_v4  ;;  %338 = vst.msk [vmem:[#allocation2 + $0x118] sm:$0x3] %vm304_vm2, %v4152_v4 }
  0x20   : > { %336 = vst.msk [vmem:[#allocation2 + $0x108] sm:$0xff] %vm301_vm1, %v4152_v4  ;;  %337 = vst.msk [vmem:[#allocation2 + $0x110] sm:$0xff] %vm301_vm1, %v4152_v4  ;;  %v495_v9 = vsel %vm483_vm3, %v490_v58, %v494_v49  ;;  %v4393_v58 = vld [vmem:[%s4967_s3 + $0xc] sm:$0x3] }
  0x21   : > { %339 = vst.msk [vmem:[#allocation2 + $0x120] sm:$0xff] %vm301_vm1, %v4152_v4  ;;  %340 = vst.msk [vmem:[#allocation2 + $0x128] sm:$0xff] %vm301_vm1, %v4152_v4  ;;  %3563 = vmatprep.mubr.msk.bf16.mxu1 %vm301_vm1, %v495_v9 }
  0x22   : > { %341 = vst.msk [vmem:[#allocation2 + $0x130] sm:$0x3] %vm304_vm2, %v4152_v4  ;;  %344 = vst.msk [vmem:[#allocation2 + $0x148] sm:$0x3] %vm304_vm2, %v4152_v4 }
  0x23   : > { %342 = vst.msk [vmem:[#allocation2 + $0x138] sm:$0xff] %vm301_vm1, %v4152_v4  ;;  %343 = vst.msk [vmem:[#allocation2 + $0x140] sm:$0xff] %vm301_vm1, %v4152_v4 }
  0x24   : > { %345 = vst.msk [vmem:[#allocation2 + $0x150] sm:$0xff] %vm301_vm1, %v4152_v4  ;;  %346 = vst.msk [vmem:[#allocation2 + $0x158] sm:$0xff] %vm301_vm1, %v4152_v4 }
  0x25   : > { %347 = vst.msk [vmem:[#allocation2 + $0x160] sm:$0x3] %vm304_vm2, %v4152_v4  ;;  %350 = vst.msk [vmem:[#allocation2 + $0x178] sm:$0x3] %vm304_vm2, %v4152_v4 }
  0x26   : > { %348 = vst.msk [vmem:[#allocation2 + $0x168] sm:$0xff] %vm301_vm1, %v4152_v4  ;;  %349 = vst.msk [vmem:[#allocation2 + $0x170] sm:$0xff] %vm301_vm1, %v4152_v4 }
  0x27   : > { %351 = vst.msk [vmem:[#allocation2 + $0x180] sm:$0xff] %vm301_vm1, %v4152_v4  ;;  %352 = vst.msk [vmem:[#allocation2 + $0x188] sm:$0xff] %vm301_vm1, %v4152_v4 }
  0x28   : > { %353 = vst.msk [vmem:[#allocation2 + $0x190] sm:$0x3] %vm304_vm2, %v4152_v4  ;;  %356 = vst.msk [vmem:[#allocation2 + $0x1a8] sm:$0x3] %vm304_vm2, %v4152_v4 }
  0x29   : > { %354 = vst.msk [vmem:[#allocation2 + $0x198] sm:$0xff] %vm301_vm1, %v4152_v4  ;;  %355 = vst.msk [vmem:[#allocation2 + $0x1a0] sm:$0xff] %vm301_vm1, %v4152_v4  ;;  %v3293_v4 = vunpack.c.h.bf16 %v3391_v52 }
  0x2a   : > { %358 = vst.msk [vmem:[#allocation2 + $0x19] sm:$0xff] %vm301_vm1, %v3236_v10  ;;  %359 = vst.msk [vmem:[#allocation2 + $0x21] sm:$0xff] %vm301_vm1, %v3237_v11 }
  0x2b   : > { %360 = vst.msk [vmem:[#allocation2 + $0x31] sm:$0xff] %vm301_vm1, %v3240_v12  ;;  %361 = vst.msk [vmem:[#allocation2 + $0x39] sm:$0xff] %vm301_vm1, %v3241_v13 }
  0x2c   : > { %362 = vst.msk [vmem:[#allocation2 + $0x49] sm:$0xff] %vm301_vm1, %v3244_v20  ;;  %363 = vst.msk [vmem:[#allocation2 + $0x51] sm:$0xff] %vm301_vm1, %v3245_v21 }
  0x2d   : > { %364 = vst.msk [vmem:[#allocation2 + $0x61] sm:$0xff] %vm301_vm1, %v3248_v22  ;;  %365 = vst.msk [vmem:[#allocation2 + $0x69] sm:$0xff] %vm301_vm1, %v3249_v23 }
  0x2e   : > { %366 = vst.msk [vmem:[#allocation2 + $0x79] sm:$0xff] %vm301_vm1, %v3252_v26  ;;  %367 = vst.msk [vmem:[#allocation2 + $0x81] sm:$0xff] %vm301_vm1, %v3253_v27 }
  0x2f   : > { %368 = vst.msk [vmem:[#allocation2 + $0x91] sm:$0xff] %vm301_vm1, %v3256_v31  ;;  %369 = vst.msk [vmem:[#allocation2 + $0x99] sm:$0xff] %vm301_vm1, %v3257_v32 }
  0x30   : > { %370 = vst.msk [vmem:[#allocation2 + $0xa9] sm:$0xff] %vm301_vm1, %v3260_v33  ;;  %371 = vst.msk [vmem:[#allocation2 + $0xb1] sm:$0xff] %vm301_vm1, %v3261_v34 }
  0x31   : > { %372 = vst.msk [vmem:[#allocation2 + $0xc1] sm:$0xff] %vm301_vm1, %v3264_v40  ;;  %373 = vst.msk [vmem:[#allocation2 + $0xc9] sm:$0xff] %vm301_vm1, %v3265_v43  ;;  %v393_v62 = vld [vmem:[#allocation2 + $0x18] sm:$0xff]  ;;  %v394_v63 = vld [vmem:[#allocation2 + $0x20] sm:$0xff] }
  0x32   : > { %374 = vst.msk [vmem:[#allocation2 + $0xd9] sm:$0xff] %vm301_vm1, %v3268_v44  ;;  %375 = vst.msk [vmem:[#allocation2 + $0xe1] sm:$0xff] %vm301_vm1, %v3269_v45  ;;  %v395_v0 = vld [vmem:[#allocation2 + $0x28] sm:$0x3]  ;;  %v4345_v10 = vpack.c.bf16 %v394_v63, %v393_v62  ;;  %v396_v12 = vld [vmem:[#allocation2 + $0x30] sm:$0xff] }
  0x33   : > { %376 = vst.msk [vmem:[#allocation2 + $0xf1] sm:$0xff] %vm301_vm1, %v3272_v46  ;;  %377 = vst.msk [vmem:[#allocation2 + $0xf9] sm:$0xff] %vm301_vm1, %v3273_v50  ;;  %v4347_v11 = vpack.c.bf16 %v395_v0, %v395_v0  ;;  %v397_v13 = vld [vmem:[#allocation2 + $0x38] sm:$0xff]  ;;  %v398_v14 = vld [vmem:[#allocation2 + $0x40] sm:$0x3] }
  0x34   : > { %378 = vst.msk [vmem:[#allocation2 + $0x109] sm:$0xff] %vm301_vm1, %v3276_v51  ;;  %379 = vst.msk [vmem:[#allocation2 + $0x111] sm:$0xff] %vm301_vm1, %v3277_v54  ;;  %v4355_v16 = vpack.c.bf16 %v397_v13, %v396_v12  ;;  %v4357_v17 = vpack.c.bf16 %v398_v14, %v398_v14  ;;  %v399_v19 = vld [vmem:[#allocation2 + $0x48] sm:$0xff]  ;;  %v400_v20 = vld [vmem:[#allocation2 + $0x50] sm:$0xff]  ;;  %v497_v5 = vshrl.u32 %v4345_v10, 16  ;;  %v499_v22 = vshll.u32 %v4345_v10, 16 }
  0x35   : > { %380 = vst.msk [vmem:[#allocation2 + $0x121] sm:$0xff] %vm301_vm1, %v3280_v55  ;;  %381 = vst.msk [vmem:[#allocation2 + $0x129] sm:$0xff] %vm301_vm1, %v3281_v56  ;;  %v401_v21 = vld [vmem:[#allocation2 + $0x58] sm:$0x3]  ;;  %v504_v23 = vshll.u32 %v4347_v11, 16  ;;  %v4368_v26 = vpack.c.bf16 %v400_v20, %v399_v19  ;;  %v402_v6 = vld [vmem:[#allocation2 + $0x60] sm:$0xff] }
  0x36   : > { %382 = vst.msk [vmem:[#allocation2 + $0x139] sm:$0xff] %vm301_vm1, %v3284_v57  ;;  %383 = vst.msk [vmem:[#allocation2 + $0x141] sm:$0xff] %vm301_vm1, %v3285_v59  ;;  %v403_v27 = vld [vmem:[#allocation2 + $0x68] sm:$0xff]  ;;  %v509_v28 = vshrl.u32 %v4355_v16, 16  ;;  %v511_v29 = vshll.u32 %v4355_v16, 16  ;;  %v516_v30 = vshll.u32 %v4357_v17, 16  ;;  %v4373_v35 = vpack.c.bf16 %v401_v21, %v401_v21 }
  0x37   : > { %384 = vst.msk [vmem:[#allocation2 + $0x151] sm:$0xff] %vm301_vm1, %v3288_v60  ;;  %385 = vst.msk [vmem:[#allocation2 + $0x159] sm:$0xff] %vm301_vm1, %v3289_v61  ;;  %v404_v31 = vld [vmem:[#allocation2 + $0x70] sm:$0x3]  ;;  %v405_v32 = vld [vmem:[#allocation2 + $0x78] sm:$0xff]  ;;  %v501_v33 = vrot.slane %v499_v22, 1  ;;  %v4377_v41 = vpack.c.bf16 %v403_v27, %v402_v6 }
  0x38   : > { %386 = vst.msk [vmem:[#allocation2 + $0x169] sm:$0xff] %vm301_vm1, %v3292_v2  ;;  %387 = vst.msk [vmem:[#allocation2 + $0x171] sm:$0xff] %vm301_vm1, %v3293_v4  ;;  %v506_v34 = vrot.slane %v504_v23, 1  ;;  %v521_v36 = vshrl.u32 %v4368_v26, 16  ;;  %v406_v37 = vld [vmem:[#allocation2 + $0x80] sm:$0xff]  ;;  %v513_v38 = vrot.slane %v511_v29, 1  ;;  %v4380_v45 = vpack.c.bf16 %v404_v31, %v404_v31 }
  0x39   : > { %388 = vst.msk [vmem:[#allocation2 + $0x181] sm:$0xff] %vm301_vm1, %v3296_v7  ;;  %389 = vst.msk [vmem:[#allocation2 + $0x189] sm:$0xff] %vm301_vm1, %v3297_v8  ;;  %v518_v39 = vrot.slane %v516_v30, 1  ;;  %v523_v40 = vshll.u32 %v4368_v26, 16  ;;  %v407_v42 = vld [vmem:[#allocation2 + $0x88] sm:$0x3]  ;;  %v502_v43 = vor.u32 %v501_v33, %v497_v5  ;;  %v4382_v46 = vpack.c.bf16 %v406_v37, %v405_v32 }
  0x3a   : > { %v528_v44 = vshll.u32 %v4373_v35, 16  ;;  %v514_v47 = vor.u32 %v513_v38, %v509_v28  ;;  %v533_v49 = vshrl.u32 %v4377_v41, 16  ;;  %v535_v50 = vshll.u32 %v4377_v41, 16  ;;  %v408_v51 = vld [vmem:[#allocation2 + $0x90] sm:$0xff]  ;;  %v409_v52 = vld [vmem:[#allocation2 + $0x98] sm:$0xff]  ;;  %v411_v63 = vld [vmem:[#allocation2 + $0xa8] sm:$0xff] }
  0x3b   : > { %v525_v48 = vrot.slane %v523_v40, 1  ;;  %v507_v53 = vsel %vm483_vm3, %v502_v43, %v506_v34  ;;  %v540_v55 = vshll.u32 %v4380_v45, 16  ;;  %v4388_v56 = vpack.c.bf16 %v407_v42, %v407_v42  ;;  %v410_v57 = vld [vmem:[#allocation2 + $0xa0] sm:$0x3]  ;;  %v4404_v0 = vld [vmem:[%s4967_s3 + $0x4] sm:$0x3] }
  0x3c   : > { %v530_v54 = vrot.slane %v528_v44, 1  ;;  %3564 = vmatmul.mubr.msk.bf16.vlgmr.msra.gmra.mrb[0].mxu1 %vm301_vm1, %v507_v53  ;;  %3699 = vmatprep.mubr.msk.bf16.mxu0 %vm301_vm1, %v507_v53  ;;  %v4398_v59 = vsel %vm483_vm3, %v514_v47, %v518_v39  ;;  %v537_v61 = vrot.slane %v535_v50, 1  ;;  %v545_v62 = vshrl.u32 %v4382_v46, 16  ;;  %v412_v9 = vld [vmem:[#allocation2 + $0xb0] sm:$0xff]  ;;  %v413_v12 = vld [vmem:[#allocation2 + $0xb8] sm:$0x3] }
  0x3d   : > { %v526_v60 = vor.u32 %v525_v48, %v521_v36  ;;  %3596 = vmatpush3.bf16.msra.mxu1 %v922_v15  ;;  %3700 = vmatmul.mubr.msk.bf16.vlgmr.msra.gmra.mrb[0].mxu0 %vm301_vm1, %v4398_v59  ;;  %v542_v2 = vrot.slane %v540_v55, 1  ;;  %v547_v4 = vshll.u32 %v4382_v46, 16  ;;  %v552_v7 = vshll.u32 %v4388_v56, 16  ;;  %v414_v5 = vld [vmem:[#allocation2 + $0xc0] sm:$0xff]  ;;  %v415_v22 = vld [vmem:[#allocation2 + $0xc8] sm:$0xff]  ;;  %v417_v39 = vld [vmem:[#allocation2 + $0xd8] sm:$0xff] }
  0x3e   : > { %v4410_v8 = vpack.c.bf16 %v409_v52, %v408_v51  ;;  %3732 = vmatpush3.bf16.msra.mxu0 %v1836_v18  ;;  %3567 = vmatprep.mubr.msk.bf16.mxu1 %vm301_vm1, %v4398_v59  ;;  %v538_v14 = vor.u32 %v537_v61, %v533_v49  ;;  %v4417_v15 = vpack.c.bf16 %v410_v57, %v410_v57  ;;  %v416_v37 = vld [vmem:[#allocation2 + $0xd0] sm:$0x3]  ;;  %v418_v47 = vld [vmem:[#allocation2 + $0xe0] sm:$0xff]  ;;  %v421_v49 = vld [vmem:[#allocation2 + $0xf8] sm:$0xff] }
  0x3f   : > { %v4415_v13 = vsel %vm483_vm3, %v526_v60, %v530_v54  ;;  %v549_v19 = vrot.slane %v547_v4, 1  ;;  %v554_v20 = vrot.slane %v552_v7, 1  ;;  %4132 = vmatprep.subr.msk.bf16.mxu0 %vm724_vm0, %v4393_v58  ;;  %v4424_v18 = vpack.c.bf16 %v412_v9, %v411_v63  ;;  %4127 = vmatprep.subr.msk.bf16.mxu1 %vm724_vm0, %v4404_v0  ;;  %v420_v48 = vld [vmem:[#allocation2 + $0xf0] sm:$0xff]  ;;  %v419_v52 = vld [vmem:[#allocation2 + $0xe8] sm:$0x3] }
  0x40   : > { %3703 = vmatprep.mubr.msk.bf16.mxu0 %vm301_vm1, %v4415_v13  ;;  %v559_v21 = vshll.u32 %v4410_v8, 16  ;;  %v4426_v23 = vpack.c.bf16 %v413_v12, %v413_v12  ;;  %v4431_v6 = vsel %vm483_vm3, %v538_v14, %v542_v2  ;;  %v557_v28 = vshrl.u32 %v4410_v8, 16  ;;  %v423_v12 = vld [vmem:[#allocation2 + $0x108] sm:$0xff]  ;;  %v424_v14 = vld [vmem:[#allocation2 + $0x110] sm:$0xff] }
  0x41   : > { %v550_v27 = vor.u32 %v549_v19, %v545_v62  ;;  %v564_v30 = vshll.u32 %v4417_v15, 16  ;;  %v571_v31 = vshll.u32 %v4424_v18, 16  ;;  %v4436_v32 = vpack.c.bf16 %v415_v22, %v414_v5  ;;  %v422_v62 = vld [vmem:[#allocation2 + $0x100] sm:$0x3] }
  0x42   : > { %v561_v29 = vrot.slane %v559_v21, 1  ;;  %v569_v34 = vshrl.u32 %v4424_v18, 16  ;;  %v576_v36 = vshll.u32 %v4426_v23, 16  ;;  %v4451_v43 = vpack.c.bf16 %v416_v37, %v416_v37  ;;  %v426_v22 = vld [vmem:[#allocation2 + $0x120] sm:$0xff] }
  0x43   : > { %v4439_v33 = vsel %vm483_vm3, %v550_v27, %v554_v20  ;;  %v573_v38 = vrot.slane %v571_v31, 1  ;;  %v566_v42 = vrot.slane %v564_v30, 1  ;;  %v583_v44 = vshll.u32 %v4436_v32, 16  ;;  %v427_v27 = vld [vmem:[#allocation2 + $0x128] sm:$0xff] }
  0x44   : > { %3568 = vmatmul.mubr.msk.bf16.gmra.mrb[4].mxu1 %vm301_vm1, %v4415_v13  ;;  %v562_v40 = vor.u32 %v561_v29, %v557_v28  ;;  %v578_v51 = vrot.slane %v576_v36, 1  ;;  %v4454_v53 = vpack.c.bf16 %v418_v47, %v417_v39  ;;  %v4456_v54 = vpack.c.bf16 %v421_v49, %v420_v48 }
  0x45   : > { %3704 = vmatmul.mubr.msk.bf16.gmra.mrb[4].mxu0 %vm301_vm1, %v4431_v6  ;;  %3571 = vmatprep.mubr.msk.bf16.mxu1 %vm301_vm1, %v4431_v6  ;;  %v574_v50 = vor.u32 %v573_v38, %v569_v34  ;;  %v581_v57 = vshrl.u32 %v4436_v32, 16  ;;  %v585_v60 = vrot.slane %v583_v44, 1  ;;  %v588_v61 = vshll.u32 %v4451_v43, 16  ;;  %v425_v38 = vld [vmem:[#allocation2 + $0x118] sm:$0x3] }
  0x46   : > { %3707 = vmatprep.mubr.msk.bf16.mxu0 %vm301_vm1, %v4439_v33  ;;  %v4459_v55 = vsel %vm483_vm3, %v562_v40, %v566_v42  ;;  %v4468_v2 = vpack.c.bf16 %v419_v52, %v419_v52  ;;  %v595_v4 = vshll.u32 %v4454_v53, 16  ;;  %v4475_v7 = vpack.c.bf16 %v422_v62, %v422_v62  ;;  %v428_v42 = vld [vmem:[#allocation2 + $0x130] sm:$0x3]  ;;  %v430_v62 = vld [vmem:[#allocation2 + $0x140] sm:$0xff] }
  0x47   : > { %v4464_v63 = vsel %vm483_vm3, %v574_v50, %v578_v51  ;;  %v607_v9 = vshll.u32 %v4456_v54, 16  ;;  %v586_v19 = vor.u32 %v585_v60, %v581_v57  ;;  %v590_v20 = vrot.slane %v588_v61, 1  ;;  %v429_v61 = vld [vmem:[#allocation2 + $0x138] sm:$0xff] }
  0x48   : > { %v1123_v21 = vrot.slane %v4345_v10, 1  ;;  %v1124_v5 = vrot.slane %v4347_v11, 1  ;;  %v593_v28 = vshrl.u32 %v4454_v53, 16  ;;  %v600_v29 = vshll.u32 %v4468_v2, 16 }
  0x49   : > { %v4484_v30 = vpack.c.bf16 %v424_v14, %v423_v12  ;;  %v597_v31 = vrot.slane %v595_v4, 1  ;;  %v605_v34 = vshrl.u32 %v4456_v54, 16  ;;  %v609_v36 = vrot.slane %v607_v9, 1  ;;  %v432_v12 = vld [vmem:[#allocation2 + $0x150] sm:$0xff]  ;;  %v433_v14 = vld [vmem:[#allocation2 + $0x158] sm:$0xff] }
  0x4a   : > { %v612_v37 = vshll.u32 %v4475_v7, 16  ;;  %v4489_v39 = vsel %vm483_vm3, %v586_v19, %v590_v20  ;;  %v4491_v11 = vpack.c.bf16 %v427_v27, %v426_v22  ;;  %v4494_v40 = vsel %vm1119_vm4, %v1123_v21, %v1124_v5 }
  0x4b   : > { %v1127_v44 = vrot.slane %v4357_v17, 1  ;;  %v1126_v47 = vrot.slane %v4355_v16, 1  ;;  %v4500_v48 = vpack.c.bf16 %v425_v38, %v425_v38  ;;  %v619_v49 = vshll.u32 %v4484_v30, 16 }
  0x4c   : > { %3572 = vmatmul.mubr.msk.bf16.gmra.mrb[8].mxu1 %vm301_vm1, %v4439_v33  ;;  %v598_v50 = vor.u32 %v597_v31, %v593_v28  ;;  %v602_v51 = vrot.slane %v600_v29, 1  ;;  %v610_v52 = vor.u32 %v609_v36, %v605_v34  ;;  %v614_v57 = vrot.slane %v612_v37, 1  ;;  %v431_v34 = vld [vmem:[#allocation2 + $0x148] sm:$0x3] }
  0x4d   : > { %3708 = vmatmul.mubr.msk.bf16.gmra.mrb[8].mxu0 %vm301_vm1, %v4459_v55  ;;  %3575 = vmatprep.mubr.msk.bf16.mxu1 %vm301_vm1, %v4459_v55  ;;  %v4509_v17 = vpack.c.bf16 %v428_v42, %v428_v42  ;;  %v631_v60 = vshll.u32 %v4491_v11, 16  ;;  %v1129_v4 = vrot.slane %v4368_v26, 1  ;;  %v1130_v9 = vrot.slane %v4373_v35, 1  ;;  %v434_v42 = vld [vmem:[#allocation2 + $0x160] sm:$0x3] }
  0x4e   : > { %3711 = vmatprep.mubr.msk.bf16.mxu0 %vm301_vm1, %v4464_v63  ;;  %v617_v19 = vshrl.u32 %v4484_v30, 16  ;;  %v621_v20 = vrot.slane %v619_v49, 1  ;;  %v624_v21 = vshll.u32 %v4500_v48, 16  ;;  %v4517_v5 = vsel %vm483_vm3, %v598_v50, %v602_v51  ;;  %v4543_v51 = vld [vmem:[%s4967_s3 + $0xe] sm:$0x3] }
  0x4f   : > { %v4520_v22 = vsel %vm1119_vm4, %v1126_v47, %v1127_v44  ;;  %v4523_v27 = vsel %vm483_vm3, %v610_v52, %v614_v57  ;;  %v4525_v28 = vpack.c.bf16 %v430_v62, %v429_v61  ;;  %v629_v35 = vshrl.u32 %v4491_v11, 16  ;;  %v435_v62 = vld [vmem:[#allocation2 + $0x168] sm:$0xff] }
  0x50   : > { %v633_v29 = vrot.slane %v631_v60, 1  ;;  %v636_v31 = vshll.u32 %v4509_v17, 16  ;;  %v4529_v36 = vpack.c.bf16 %v433_v14, %v432_v12  ;;  %v2037_v37 = vsel %vm724_vm0, %v4393_v58, 0 }
  0x51   : > { %v4534_v38 = vsel %vm1119_vm4, %v1129_v4, %v1130_v9  ;;  %v622_v44 = vor.u32 %v621_v20, %v617_v19  ;;  %v626_v47 = vrot.slane %v624_v21, 1  ;;  %v1132_v49 = vrot.slane %v4377_v41, 1  ;;  %v436_v4 = vld [vmem:[#allocation2 + $0x170] sm:$0xff] }
  0x52   : > { %v1133_v50 = vrot.slane %v4380_v45, 1  ;;  %v4549_v58 = vpack.c.bf16 %v431_v34, %v431_v34  ;;  %v643_v52 = vshll.u32 %v4525_v28, 16  ;;  %v634_v45 = vor.u32 %v633_v29, %v629_v35 }
  0x53   : > { %v638_v57 = vrot.slane %v636_v31, 1  ;;  %v4554_v60 = vpack.c.bf16 %v434_v42, %v434_v42  ;;  %v655_v61 = vshll.u32 %v4529_v36, 16  ;;  %v1135_v9 = vrot.slane %v4382_v46, 1  ;;  %v437_v42 = vld [vmem:[#allocation2 + $0x178] sm:$0x3] }
  0x54   : > { %3576 = vmatmul.mubr.msk.bf16.gmra.mrb[12].mxu1 %vm301_vm1, %v4464_v63  ;;  %v1136_v12 = vrot.slane %v4388_v56, 1  ;;  %v4562_v14 = vsel %vm483_vm3, %v622_v44, %v626_v47  ;;  %v4565_v19 = vsel %vm1119_vm4, %v1132_v49, %v1133_v50  ;;  %v641_v20 = vshrl.u32 %v4525_v28, 16 }
  0x55   : > { %3712 = vmatmul.mubr.msk.bf16.gmra.mrb[12].mxu0 %vm301_vm1, %v4489_v39  ;;  %3579 = vmatprep.mubr.msk.bf16.mxu1 %vm301_vm1, %v4489_v39  ;;  %v645_v21 = vrot.slane %v643_v52, 1  ;;  %v648_v35 = vshll.u32 %v4549_v58, 16  ;;  %v4569_v29 = vpack.c.bf16 %v436_v4, %v435_v62  ;;  %v4572_v31 = vsel %vm483_vm3, %v634_v45, %v638_v57 }
  0x56   : > { %3733 = vmatprep.mubr.msk.bf16.mxu0 %vm301_vm1, %v4494_v40  ;;  %4973 = vst [vmem:[#allocation3_spill] sm:$0xff] %v4572_v31  ;;  %v653_v56 = vshrl.u32 %v4529_v36, 16  ;;  %v657_v34 = vrot.slane %v655_v61, 1  ;;  %v4577_v44 = vsel %vm1119_vm4, %v1135_v9, %v1136_v12  ;;  %v4585_v50 = vpack.c.bf16 %v437_v42, %v437_v42 }
  0x57   : > { %v646_v47 = vor.u32 %v645_v21, %v641_v20  ;;  %v650_v49 = vrot.slane %v648_v35, 1  ;;  %v667_v52 = vshll.u32 %v4569_v29, 16  ;;  %v1138_v45 = vrot.slane %v4410_v8, 1 }
  0x58   : > { %v1139_v57 = vrot.slane %v4417_v15, 1  ;;  %v658_v61 = vor.u32 %v657_v34, %v653_v56  ;;  %v1141_v4 = vrot.slane %v4424_v18, 1  ;;  %v1142_v9 = vrot.slane %v4426_v23, 1 }
  0x59   : > { %v4595_v12 = vsel %vm483_vm3, %v646_v47, %v650_v49  ;;  %v665_v20 = vshrl.u32 %v4569_v29, 16  ;;  %v669_v21 = vrot.slane %v667_v52, 1  ;;  %v672_v35 = vshll.u32 %v4585_v50, 16 }
  0x5a   : > { %v4600_v42 = vsel %vm1119_vm4, %v1138_v45, %v1139_v57  ;;  %v4606_v15 = vsel %vm1119_vm4, %v1141_v4, %v1142_v9  ;;  %v1144_v34 = vrot.slane %v4436_v32, 1  ;;  %v1147_v47 = vrot.slane %v4454_v53, 1 }
  0x5b   : > { %v670_v23 = vor.u32 %v669_v21, %v665_v20  ;;  %v674_v56 = vrot.slane %v672_v35, 1  ;;  %v1148_v49 = vrot.slane %v4468_v2, 1  ;;  %v1151_v2 = vrot.slane %v4475_v7, 1  ;;  %v3064_v7 = vld [vmem:[%s4967_s3 + $0x6] sm:$0x3] }
  0x5c   : > { %3580 = vmatmul.mubr.msk.bf16.gmra.mrb[16].mxu1 %vm301_vm1, %v4517_v5  ;;  %v1217_v4 = vsel %vm724_vm0, %v4404_v0, 0  ;;  %v1156_v0 = vrot.slane %v4491_v11, 1  ;;  %v1159_v21 = vrot.slane %v4525_v28, 1  ;;  %v1160_v35 = vrot.slane %v4549_v58, 1 }
  0x5d   : > { %3734 = vmatmul.mubr.msk.bf16.vlgmr.msra.gmra.mrb[0].mxu0 %vm301_vm1, %v4520_v22  ;;  %3583 = vmatprep.mubr.msk.bf16.mxu1 %vm301_vm1, %v4523_v27  ;;  %v4621_v52 = vsel %vm483_vm3, %v670_v23, %v674_v56  ;;  %v4627_v57 = vsel %vm1119_vm4, %v1147_v47, %v1148_v49  ;;  %v1163_v58 = vrot.slane %v4554_v60, 1  ;;  %v438_v47 = vld [vmem:[#allocation2 + $0x180] sm:$0xff]  ;;  %v439_v49 = vld [vmem:[#allocation2 + $0x188] sm:$0xff] }
  0x5e   : > { %3766 = vmatpush3.bf16.msra.mxu0 %v2037_v37  ;;  %3737 = vmatprep.mubr.msk.bf16.mxu0 %vm301_vm1, %v4534_v38  ;;  %v660_v37 = vshll.u32 %v4554_v60, 16  ;;  %v4669_v56 = vsel %vm1119_vm4, %v1159_v21, %v1160_v35  ;;  %v3149_v21 = vld [vmem:[%s4967_s3 + $0x10] sm:$0x3]  ;;  %v1121_v35 = vrot.slane %v4304_v25, 1 }
  0x5f   : > { %4133 = vmatprep.subr.msk.bf16.mxu0 %vm724_vm0, %v4543_v51 }
  0x60   : > { %v662_v62 = vrot.slane %v660_v37, 1  ;;  %v1145_v37 = vrot.slane %v4451_v43, 1  ;;  %v1150_v43 = vrot.slane %v4456_v54, 1 }
  0x62   : > { %v4624_v45 = vsel %vm1119_vm4, %v1144_v34, %v1145_v37  ;;  %v4644_v9 = vsel %vm1119_vm4, %v1150_v43, %v1151_v2  ;;  %v1165_v34 = vrot.slane %v4569_v29, 1  ;;  %v1166_v37 = vrot.slane %v4585_v50, 1  ;;  %v440_v43 = vld [vmem:[#allocation2 + $0x190] sm:$0x3] }
  0x64   : > { %3584 = vmatmul.mubr.msk.bf16.gmra.mrb[20].mxu1 %vm301_vm1, %v4562_v14 }
  0x65   : > { %3738 = vmatmul.mubr.msk.bf16.gmra.mrb[4].mxu0 %vm301_vm1, %v4565_v19  ;;  %3587 = vmatprep.mubr.msk.bf16.mxu1 %vm301_vm1, %v4572_v31  ;;  %v4603_v31 = vsel %vm483_vm3, %v658_v61, %v662_v62  ;;  %v1153_v61 = vrot.slane %v4484_v30, 1  ;;  %v1154_v62 = vrot.slane %v4500_v48, 1  ;;  %v1157_v48 = vrot.slane %v4509_v17, 1 }
  0x66   : > { %3741 = vmatprep.mubr.msk.bf16.mxu0 %vm301_vm1, %v4577_v44  ;;  %v1162_v17 = vrot.slane %v4529_v36, 1 }
  0x67   : > { %v4647_v20 = vsel %vm1119_vm4, %v1153_v61, %v1154_v62  ;;  %v4666_v23 = vsel %vm1119_vm4, %v1156_v0, %v1157_v48  ;;  %v4686_v61 = vpack.c.bf16 %v439_v49, %v438_v47  ;;  %v4688_v62 = vpack.c.bf16 %v440_v43, %v440_v43 }
  0x68   : > { %v4684_v2 = vsel %vm1119_vm4, %v1162_v17, %v1163_v58  ;;  %v2249_v48 = vsel %vm724_vm0, %v4543_v51, 0  ;;  %v1120_v51 = vrot.slane %v4302_v24, 1  ;;  %v1418_v58 = vsel %vm724_vm0, %v3064_v7, 0 }
  0x69   : > { %v1829_v60 = vrot.slane %v4686_v61, 1  ;;  %v1830_v50 = vrot.slane %v4688_v62, 1 }
  0x6a   : > { %v1122_v17 = vsel %vm1119_vm4, %v1120_v51, %v1121_v35 }
  0x6b   : > { %v4704_v0 = vsel %vm1119_vm4, %v1829_v60, %v1830_v50 }
  0x6c   : > { %3588 = vmatmul.mubr.msk.bf16.gmra.mrb[24].mxu1 %vm301_vm1, %v4595_v12 }
  0x6d   : > { %3742 = vmatmul.mubr.msk.bf16.gmra.mrb[8].mxu0 %vm301_vm1, %v4600_v42  ;;  %3591 = vmatprep.mubr.msk.bf16.mxu1 %vm301_vm1, %v4603_v31 }
  0x6e   : > { %3745 = vmatprep.mubr.msk.bf16.mxu0 %vm301_vm1, %v4606_v15 }
  0x74   : > { %3592 = vmatmul.mubr.msk.bf16.gmra.mrb[28].mxu1 %vm301_vm1, %v4621_v52 }
  0x75   : > { %3746 = vmatmul.mubr.msk.bf16.gmra.mrb[12].mxu0 %vm301_vm1, %v4624_v45  ;;  %3597 = vmatprep.mubr.msk.bf16.mxu1 %vm301_vm1, %v4302_v24  ;;  %v442_v24 = vld [vmem:[#allocation2 + $0x1a0] sm:$0xff] }
  0x76   : > { %3749 = vmatprep.mubr.msk.bf16.mxu0 %vm301_vm1, %v4627_v57 }
  0x7c   : > { %3598 = vmatmul.mubr.msk.bf16.vlgmr.msra.gmra.mrb[0].mxu1 %vm301_vm1, %v4345_v10 }
  0x7d   : > { %3630 = vmatpush3.bf16.msra.mxu1 %v1217_v4  ;;  %3750 = vmatmul.mubr.msk.bf16.gmra.mrb[16].mxu0 %vm301_vm1, %v4644_v9  ;;  %v4691_v4 = vsel %vm1119_vm4, %v1165_v34, %v1166_v37 }
  0x7e   : > { %3601 = vmatprep.mubr.msk.bf16.mxu1 %vm301_vm1, %v4355_v16  ;;  %3753 = vmatprep.mubr.msk.bf16.mxu0 %vm301_vm1, %v4647_v20 }
  0x7f   : > { %4128 = vmatprep.subr.msk.bf16.mxu1 %vm724_vm0, %v3064_v7 }
  0x84   : > { %3602 = vmatmul.mubr.msk.bf16.gmra.mrb[4].mxu1 %vm301_vm1, %v4368_v26 }
  0x85   : > { %3754 = vmatmul.mubr.msk.bf16.gmra.mrb[20].mxu0 %vm301_vm1, %v4666_v23  ;;  %3605 = vmatprep.mubr.msk.bf16.mxu1 %vm301_vm1, %v4377_v41 }
  0x86   : > { %3757 = vmatprep.mubr.msk.bf16.mxu0 %vm301_vm1, %v4669_v56 }
  0x8c   : > { %3606 = vmatmul.mubr.msk.bf16.gmra.mrb[8].mxu1 %vm301_vm1, %v4382_v46 }
  0x8d   : > { %3758 = vmatmul.mubr.msk.bf16.gmra.mrb[24].mxu0 %vm301_vm1, %v4684_v2  ;;  %3609 = vmatprep.mubr.msk.bf16.mxu1 %vm301_vm1, %v4410_v8 }
  0x8e   : > { %3761 = vmatprep.mubr.msk.bf16.mxu0 %vm301_vm1, %v4691_v4 }
  0x94   : > { %3610 = vmatmul.mubr.msk.bf16.gmra.mrb[12].mxu1 %vm301_vm1, %v4424_v18 }
  0x95   : > { %3762 = vmatmul.mubr.msk.bf16.gmra.mrb[28].mxu0 %vm301_vm1, %v4704_v0  ;;  %3613 = vmatprep.mubr.msk.bf16.mxu1 %vm301_vm1, %v4436_v32 }
  0x96   : > { %3767 = vmatprep.mubr.msk.bf16.mxu0 %vm301_vm1, %v4355_v16 }
  0x9c   : > { %3614 = vmatmul.mubr.msk.bf16.gmra.mrb[16].mxu1 %vm301_vm1, %v4454_v53 }
  0x9d   : > { %3768 = vmatmul.mubr.msk.bf16.vlgmr.msra.gmra.mrb[0].mxu0 %vm301_vm1, %v4368_v26  ;;  %3617 = vmatprep.mubr.msk.bf16.mxu1 %vm301_vm1, %v4456_v54 }
  0x9e   : > { %3800 = vmatpush3.bf16.msra.mxu0 %v2249_v48  ;;  %3771 = vmatprep.mubr.msk.bf16.mxu0 %vm301_vm1, %v4377_v41 }
  0x9f   : > { %4134 = vmatprep.subr.msk.bf16.mxu0 %vm724_vm0, %v3149_v21 }
  0xa4   : > { %3618 = vmatmul.mubr.msk.bf16.gmra.mrb[20].mxu1 %vm301_vm1, %v4484_v30 }
  0xa5   : > { %3772 = vmatmul.mubr.msk.bf16.gmra.mrb[4].mxu0 %vm301_vm1, %v4382_v46  ;;  %3621 = vmatprep.mubr.msk.bf16.mxu1 %vm301_vm1, %v4491_v11 }
  0xa6   : > { %3775 = vmatprep.mubr.msk.bf16.mxu0 %vm301_vm1, %v4410_v8 }
  0xac   : > { %3622 = vmatmul.mubr.msk.bf16.gmra.mrb[24].mxu1 %vm301_vm1, %v4525_v28 }
  0xad   : > { %3776 = vmatmul.mubr.msk.bf16.gmra.mrb[8].mxu0 %vm301_vm1, %v4424_v18  ;;  %3625 = vmatprep.mubr.msk.bf16.mxu1 %vm301_vm1, %v4529_v36 }
  0xae   : > { %3779 = vmatprep.mubr.msk.bf16.mxu0 %vm301_vm1, %v4436_v32 }
  0xb4   : > { %3626 = vmatmul.mubr.msk.bf16.gmra.mrb[28].mxu1 %vm301_vm1, %v4569_v29 }
  0xb5   : > { %3780 = vmatmul.mubr.msk.bf16.gmra.mrb[12].mxu0 %vm301_vm1, %v4454_v53  ;;  %3631 = vmatprep.mubr.msk.bf16.mxu1 %vm301_vm1, %v1122_v17 }
  0xb6   : > { %3783 = vmatprep.mubr.msk.bf16.mxu0 %vm301_vm1, %v4456_v54 }
  0xbc   : > { %3632 = vmatmul.mubr.msk.bf16.vlgmr.msra.gmra.mrb[0].mxu1 %vm301_vm1, %v4494_v40  ;;  %v2455_v40 = vsel %vm724_vm0, %v3149_v21, 0 }
  0xbd   : > { %3664 = vmatpush3.bf16.msra.mxu1 %v1418_v58  ;;  %3784 = vmatmul.mubr.msk.bf16.gmra.mrb[16].mxu0 %vm301_vm1, %v4484_v30 }
  0xbe   : > { %3635 = vmatprep.mubr.msk.bf16.mxu1 %vm301_vm1, %v4520_v22  ;;  %3787 = vmatprep.mubr.msk.bf16.mxu0 %vm301_vm1, %v4491_v11 }
  0xbf   : > { %4130 = vmatprep.subr.msk.bf16.mxu1 %vm724_vm0, %v4197_v1  ;;  %v441_v1 = vld [vmem:[#allocation2 + $0x198] sm:$0xff] }
  0xc0   : > { %v4781_v25 = vpack.c.bf16 %v442_v24, %v441_v1 }
  0xc4   : > { %3636 = vmatmul.mubr.msk.bf16.gmra.mrb[4].mxu1 %vm301_vm1, %v4534_v38 }
  0xc5   : > { %3788 = vmatmul.mubr.msk.bf16.gmra.mrb[20].mxu0 %vm301_vm1, %v4525_v28  ;;  %3639 = vmatprep.mubr.msk.bf16.mxu1 %vm301_vm1, %v4565_v19 }
  0xc6   : > { %3791 = vmatprep.mubr.msk.bf16.mxu0 %vm301_vm1, %v4529_v36 }
  0xcc   : > { %3640 = vmatmul.mubr.msk.bf16.gmra.mrb[8].mxu1 %vm301_vm1, %v4577_v44 }
  0xcd   : > { %3792 = vmatmul.mubr.msk.bf16.gmra.mrb[24].mxu0 %vm301_vm1, %v4569_v29  ;;  %3643 = vmatprep.mubr.msk.bf16.mxu1 %vm301_vm1, %v4600_v42 }
  0xce   : > { %3795 = vmatprep.mubr.msk.bf16.mxu0 %vm301_vm1, %v4686_v61 }
  0xd4   : > { %3644 = vmatmul.mubr.msk.bf16.gmra.mrb[12].mxu1 %vm301_vm1, %v4606_v15 }
  0xd5   : > { %3796 = vmatmul.mubr.msk.bf16.gmra.mrb[28].mxu0 %vm301_vm1, %v4781_v25  ;;  %3647 = vmatprep.mubr.msk.bf16.mxu1 %vm301_vm1, %v4624_v45 }
  0xd6   : > { %3801 = vmatprep.mubr.msk.bf16.mxu0 %vm301_vm1, %v4398_v59  ;;  %v4974_v59 = vld [vmem:[#allocation3_spill] sm:$0xff] }
  0xdc   : > { %3648 = vmatmul.mubr.msk.bf16.gmra.mrb[16].mxu1 %vm301_vm1, %v4627_v57 }
  0xdd   : > { %3802 = vmatmul.mubr.msk.bf16.vlgmr.msra.gmra.mrb[0].mxu0 %vm301_vm1, %v4415_v13  ;;  %3651 = vmatprep.mubr.msk.bf16.mxu1 %vm301_vm1, %v4644_v9  ;;  %v1617_v13 = vshll.u32 %v4686_v61, 16 }
  0xde   : > { %3834 = vmatpush3.bf16.msra.mxu0 %v2455_v40  ;;  %3805 = vmatprep.mubr.msk.bf16.mxu0 %vm301_vm1, %v4431_v6 }
  0xdf   : > { %v1619_v6 = vrot.slane %v1617_v13, 1 }
  0xe4   : > { %3652 = vmatmul.mubr.msk.bf16.gmra.mrb[20].mxu1 %vm301_vm1, %v4647_v20 }
  0xe5   : > { %3806 = vmatmul.mubr.msk.bf16.gmra.mrb[4].mxu0 %vm301_vm1, %v4439_v33  ;;  %3655 = vmatprep.mubr.msk.bf16.mxu1 %vm301_vm1, %v4666_v23  ;;  %v1622_v33 = vshll.u32 %v4688_v62, 16 }
  0xe6   : > { %3809 = vmatprep.mubr.msk.bf16.mxu0 %vm301_vm1, %v4459_v55  ;;  %v443_v55 = vld [vmem:[#allocation2 + $0x1a8] sm:$0x3] }
  0xec   : > { %3656 = vmatmul.mubr.msk.bf16.gmra.mrb[24].mxu1 %vm301_vm1, %v4669_v56 }
  0xed   : > { %3810 = vmatmul.mubr.msk.bf16.gmra.mrb[8].mxu0 %vm301_vm1, %v4464_v63  ;;  %3659 = vmatprep.mubr.msk.bf16.mxu1 %vm301_vm1, %v4684_v2  ;;  %v1624_v63 = vrot.slane %v1622_v33, 1 }
  0xee   : > { %3813 = vmatprep.mubr.msk.bf16.mxu0 %vm301_vm1, %v4489_v39  ;;  %v2234_v39 = vshrl.u32 %v4781_v25, 16 }
  0xf4   : > { %3660 = vmatmul.mubr.msk.bf16.gmra.mrb[28].mxu1 %vm301_vm1, %v4691_v4 }
  0xf5   : > { %3814 = vmatmul.mubr.msk.bf16.gmra.mrb[12].mxu0 %vm301_vm1, %v4517_v5  ;;  %3665 = vmatprep.mubr.msk.bf16.mxu1 %vm301_vm1, %v4345_v10  ;;  %v1615_v10 = vshrl.u32 %v4686_v61, 16 }
  0xf6   : > { %3817 = vmatprep.mubr.msk.bf16.mxu0 %vm301_vm1, %v4523_v27 }
  0xfc   : > { %3666 = vmatmul.mubr.msk.bf16.vlgmr.msra.gmra.mrb[0].mxu1 %vm301_vm1, %v4355_v16  ;;  %v2236_v16 = vshll.u32 %v4781_v25, 16 }
  0xfd   : > { %3868 = vmatpush3.bf16.msra.mxu1 %v4205_v3  ;;  %3818 = vmatmul.mubr.msk.bf16.gmra.mrb[16].mxu0 %vm301_vm1, %v4562_v14  ;;  %v479_v3 = vpack.c.bf16 %v443_v55, %v443_v55 }
  0xfe   : > { %3669 = vmatprep.mubr.msk.bf16.mxu1 %vm301_vm1, %v4368_v26  ;;  %3821 = vmatprep.mubr.msk.bf16.mxu0 %vm301_vm1, %v4974_v59  ;;  %v1620_v26 = vor.u32 %v1619_v6, %v1615_v10  ;;  %v2238_v7 = vrot.slane %v2236_v16, 1 }
  0xff   : > { %v2241_v34 = vshll.u32 %v479_v3, 16 }
 0x101   : > { %v2243_v37 = vrot.slane %v2241_v34, 1 }
 0x104   : > { %3670 = vmatmul.mubr.msk.bf16.gmra.mrb[4].mxu1 %vm301_vm1, %v4377_v41  ;;  %v1625_v41 = vsel %vm483_vm3, %v1620_v26, %v1624_v63 }
 0x105   : > { %3822 = vmatmul.mubr.msk.bf16.gmra.mrb[20].mxu0 %vm301_vm1, %v4595_v12  ;;  %3673 = vmatprep.mubr.msk.bf16.mxu1 %vm301_vm1, %v4382_v46  ;;  %v2239_v46 = vor.u32 %v2238_v7, %v2234_v39 }
 0x106   : > { %3825 = vmatprep.mubr.msk.bf16.mxu0 %vm301_vm1, %v4603_v31 }
 0x107   : > { %v2244_v47 = vsel %vm483_vm3, %v2239_v46, %v2243_v37 }
 0x10c   : > { %3674 = vmatmul.mubr.msk.bf16.gmra.mrb[8].mxu1 %vm301_vm1, %v4410_v8  ;;  %v2448_v8 = vrot.slane %v4781_v25, 1 }
 0x10d   : > { %3826 = vmatmul.mubr.msk.bf16.gmra.mrb[24].mxu0 %vm301_vm1, %v4621_v52  ;;  %3677 = vmatprep.mubr.msk.bf16.mxu1 %vm301_vm1, %v4424_v18  ;;  %v2449_v18 = vrot.slane %v479_v3, 1 }
 0x10e   : > { %3829 = vmatprep.mubr.msk.bf16.mxu0 %vm301_vm1, %v1625_v41 }
 0x114   : > { %3678 = vmatmul.mubr.msk.bf16.gmra.mrb[12].mxu1 %vm301_vm1, %v4436_v32  ;;  %v2450_v32 = vsel %vm1119_vm4, %v2448_v8, %v2449_v18 }
 0x115   : > { %3830 = vmatmul.mubr.msk.bf16.gmra.mrb[28].mxu0 %vm301_vm1, %v2244_v47  ;;  %3681 = vmatprep.mubr.msk.bf16.mxu1 %vm301_vm1, %v4454_v53 }
 0x116   : > { %3835 = vmatprep.mubr.msk.bf16.mxu0 %vm301_vm1, %v4520_v22 }
 0x11c   : > { %3682 = vmatmul.mubr.msk.bf16.gmra.mrb[16].mxu1 %vm301_vm1, %v4456_v54 }
 0x11d   : > { %3836 = vmatmul.mubr.msk.bf16.vlgmr.msra.gmra.mrb[0].mxu0 %vm301_vm1, %v4534_v38  ;;  %3685 = vmatprep.mubr.msk.bf16.mxu1 %vm301_vm1, %v4484_v30 }
 0x11e   : > { %3839 = vmatprep.mubr.msk.bf16.mxu0 %vm301_vm1, %v4565_v19 }
 0x124   : > { %3686 = vmatmul.mubr.msk.bf16.gmra.mrb[20].mxu1 %vm301_vm1, %v4491_v11 }
 0x125   : > { %3840 = vmatmul.mubr.msk.bf16.gmra.mrb[4].mxu0 %vm301_vm1, %v4577_v44  ;;  %3689 = vmatprep.mubr.msk.bf16.mxu1 %vm301_vm1, %v4525_v28 }
 0x126   : > { %3843 = vmatprep.mubr.msk.bf16.mxu0 %vm301_vm1, %v4600_v42 }
 0x12c   : > { %3690 = vmatmul.mubr.msk.bf16.gmra.mrb[24].mxu1 %vm301_vm1, %v4529_v36 }
 0x12d   : > { %3844 = vmatmul.mubr.msk.bf16.gmra.mrb[8].mxu0 %vm301_vm1, %v4606_v15  ;;  %3693 = vmatprep.mubr.msk.bf16.mxu1 %vm301_vm1, %v4569_v29 }
 0x12e   : > { %3847 = vmatprep.mubr.msk.bf16.mxu0 %vm301_vm1, %v4624_v45 }
 0x134   : > { %3694 = vmatmul.mubr.msk.bf16.gmra.mrb[28].mxu1 %vm301_vm1, %v4686_v61 }
 0x135   : > { %3848 = vmatmul.mubr.msk.bf16.gmra.mrb[12].mxu0 %vm301_vm1, %v4627_v57  ;;  %3715 = vmatprep.mubr.msk.bf16.mxu1 %vm301_vm1, %v4517_v5 }
 0x136   : > { %3851 = vmatprep.mubr.msk.bf16.mxu0 %vm301_vm1, %v4644_v9 }
 0x13c   : > { %3716 = vmatmul.mubr.msk.bf16.vlgmr.msra.gmra.mrb[16].mxu1 %vm301_vm1, %v4523_v27 }
 0x13d   : > { %3852 = vmatmul.mubr.msk.bf16.gmra.mrb[16].mxu0 %vm301_vm1, %v4647_v20  ;;  %3719 = vmatprep.mubr.msk.bf16.mxu1 %vm301_vm1, %v4562_v14 }
 0x13e   : > { %3855 = vmatprep.mubr.msk.bf16.mxu0 %vm301_vm1, %v4666_v23 }
 0x144   : > { %3720 = vmatmul.mubr.msk.bf16.gmra.mrb[20].mxu1 %vm301_vm1, %v4974_v59 }
 0x145   : > { %3856 = vmatmul.mubr.msk.bf16.gmra.mrb[20].mxu0 %vm301_vm1, %v4669_v56  ;;  %3723 = vmatprep.mubr.msk.bf16.mxu1 %vm301_vm1, %v4595_v12 }
 0x146   : > { %3859 = vmatprep.mubr.msk.bf16.mxu0 %vm301_vm1, %v4684_v2 }
 0x14c   : > { %3724 = vmatmul.mubr.msk.bf16.gmra.mrb[24].mxu1 %vm301_vm1, %v4603_v31 }
 0x14d   : > { %3860 = vmatmul.mubr.msk.bf16.gmra.mrb[24].mxu0 %vm301_vm1, %v4691_v4  ;;  %3727 = vmatprep.mubr.msk.bf16.mxu1 %vm301_vm1, %v4621_v52 }
 0x14e   : > { %3863 = vmatprep.mubr.msk.bf16.mxu0 %vm301_vm1, %v4704_v0 }
 0x154   : > { %3728 = vmatmul.mubr.msk.bf16.gmra.mrb[28].mxu1 %vm301_vm1, %v1625_v41 }
 0x155   : > { %3864 = vmatmul.mubr.msk.bf16.gmra.mrb[28].mxu0 %vm301_vm1, %v2450_v32 }
 0x1cf   : > { %v3667_v53 = vpop.f32.mrb[0].mxu1 }
 0x1d0   : > { %v1454_v54 = vpop.f32.mrb[1].mxu1 }
 0x1d1   : > { %v3668_v30 = vpop.f32.mrb[2].mxu1 }
 0x1d2   : > { %v1457_v11 = vpop.f32.mrb[3].mxu1 }
 0x1d7   : > { %v3671_v5 = vpop.f32.mrb[4].mxu1 }
 0x1d8   : > { %v1470_v22 = vpop.f32.mrb[5].mxu1 }
 0x1d9   : > { %v3672_v27 = vpop.f32.mrb[6].mxu1 }
 0x1da   : > { %v1473_v28 = vpop.f32.mrb[7].mxu1 }
 0x1df   : > { %v3675_v36 = vpop.f32.mrb[8].mxu1 }
 0x1e0   : > { %v1486_v38 = vpop.f32.mrb[9].mxu1 }
 0x1e1   : > { %v3676_v14 = vpop.f32.mrb[10].mxu1 }
 0x1e2   : > { %v1489_v19 = vpop.f32.mrb[11].mxu1 }
 0x1e7   : > { %v4922_v29 = vpop.f32.mrb[12].mxu1 }
 0x1e8   : > { %v4924_v31 = vpop.f32.mrb[13].mxu1 }
 0x1e9   : > { %v4926_v44 = vpop.f32.mrb[14].mxu1 }
 0x1ea   : > { %v4928_v12 = vpop.f32.mrb[15].mxu1 }
 0x1f0   : > { %v3837_v42 = vpop.f32.mrb[0].mxu0 }
 0x1f1   : > { %v3869_v15 = vadd.f32 %v3837_v42, %v3667_v53  ;;  %v2491_v52 = vpop.f32.mrb[1].mxu0 }
 0x1f2   : > { %v3870_v45 = vadd.f32 %v2491_v52, %v1454_v54  ;;  %v3838_v57 = vpop.f32.mrb[2].mxu0 }
 0x1f3   : > { %v3871_v9 = vadd.f32 %v3838_v57, %v3668_v30  ;;  %v2494_v20 = vpop.f32.mrb[3].mxu0  ;;  %v2849_v62 = vmul.f32 %v3869_v15, %v3869_v15 }
 0x1f4   : > { %v3872_v23 = vadd.f32 %v2494_v20, %v1457_v11  ;;  %v2847_v49 = vmul.f32 %v3870_v45, %v3870_v45 }
 0x1f5   : > { %v3306_v56 = vpack.c.bf16 %v3871_v9, %v3869_v15  ;;  %v2850_v21 = vmul.f32 %v3871_v9, %v3871_v9 }
 0x1f6   : > { %v3301_v43 = vpack.c.bf16 %v3872_v23, %v3870_v45  ;;  %v2810_v2 = vadd.f32 %v3872_v23, %v3870_v45  ;;  %v2848_v61 = vmul.f32 %v3872_v23, %v3872_v23 }
 0x1f7   : > { %3393 = vst [vmem:[%s4935_s2 + $0x8] sm:$0xff] %v3306_v56  }
 0x1f8   : > { %3302 = vst [vmem:[%s4935_s2] sm:$0xff] %v3301_v43   ;;  %v2811_v4 = vadd.f32 %v3869_v15, %v2810_v2  ;;  %v2879_v60 = vadd.f32 %v2848_v61, %v2847_v49  ;;  %v3841_v50 = vpop.f32.mrb[4].mxu0 }
 0x1f9   : > { %v3873_v0 = vadd.f32 %v3841_v50, %v3671_v5  ;;  %v2507_v48 = vpop.f32.mrb[5].mxu0 }
 0x1fa   : > { %v2880_v51 = vadd.f32 %v2879_v60, %v2849_v62  ;;  %v3874_v35 = vadd.f32 %v2507_v48, %v1470_v22  ;;  %v2812_v17 = vadd.f32 %v3871_v9, %v2811_v4  ;;  %v3842_v58 = vpop.f32.mrb[6].mxu0 }
 0x1fb   : > { %v3875_v1 = vadd.f32 %v3842_v58, %v3672_v27  ;;  %v2510_v24 = vpop.f32.mrb[7].mxu0  ;;  %v2853_v16 = vmul.f32 %v3873_v0, %v3873_v0 }
 0x1fc   : > { %v2813_v25 = vadd.f32 %v3874_v35, %v2812_v17  ;;  %v2851_v40 = vmul.f32 %v3874_v35, %v3874_v35  ;;  %v2881_v59 = vadd.f32 %v2880_v51, %v2850_v21  ;;  %v3876_v13 = vadd.f32 %v2510_v24, %v1473_v28 }
 0x1fd   : > { %v3316_v10 = vpack.c.bf16 %v3875_v1, %v3873_v0  ;;  %v2854_v41 = vmul.f32 %v3875_v1, %v3875_v1 }
 0x1fe   : > { %v2882_v6 = vadd.f32 %v2881_v59, %v2851_v40  ;;  %v3311_v33 = vpack.c.bf16 %v3876_v13, %v3874_v35  ;;  %v2814_v55 = vadd.f32 %v3876_v13, %v2813_v25  ;;  %v2852_v3 = vmul.f32 %v3876_v13, %v3876_v13 }
 0x1ff   : > { %3395 = vst [vmem:[%s4935_s2 + $0x18] sm:$0xff] %v3316_v10  }
 0x200   : > { %3394 = vst [vmem:[%s4935_s2 + $0x10] sm:$0xff] %v3311_v33   ;;  %v2815_v26 = vadd.f32 %v3873_v0, %v2814_v55  ;;  %v2883_v63 = vadd.f32 %v2882_v6, %v2852_v3  ;;  %v3845_v39 = vpop.f32.mrb[8].mxu0 }
 0x201   : > { %v3877_v7 = vadd.f32 %v3845_v39, %v3675_v36  ;;  %v2523_v34 = vpop.f32.mrb[9].mxu0 }
 0x202   : > { %v2884_v46 = vadd.f32 %v2883_v63, %v2853_v16  ;;  %v3878_v37 = vadd.f32 %v2523_v34, %v1486_v38  ;;  %v2816_v47 = vadd.f32 %v3875_v1, %v2815_v26  ;;  %v3846_v8 = vpop.f32.mrb[10].mxu0 }
 0x203   : > { %v3879_v18 = vadd.f32 %v3846_v8, %v3676_v14  ;;  %v2526_v32 = vpop.f32.mrb[11].mxu0  ;;  %v2857_v36 = vmul.f32 %v3877_v7, %v3877_v7 }
 0x204   : > { %v2817_v53 = vadd.f32 %v3878_v37, %v2816_v47  ;;  %v2855_v54 = vmul.f32 %v3878_v37, %v3878_v37  ;;  %v2885_v30 = vadd.f32 %v2884_v46, %v2854_v41  ;;  %v3880_v11 = vadd.f32 %v2526_v32, %v1489_v19 }
 0x205   : > { %v3326_v5 = vpack.c.bf16 %v3879_v18, %v3877_v7  ;;  %v2858_v14 = vmul.f32 %v3879_v18, %v3879_v18 }
 0x206   : > { %v2886_v22 = vadd.f32 %v2885_v30, %v2855_v54  ;;  %v3321_v27 = vpack.c.bf16 %v3880_v11, %v3878_v37  ;;  %v2818_v28 = vadd.f32 %v3880_v11, %v2817_v53  ;;  %v2856_v42 = vmul.f32 %v3880_v11, %v3880_v11 }
 0x207   : > { %3397 = vst [vmem:[%s4935_s2 + $0x28] sm:$0xff] %v3326_v5  }
 0x208   : > { %3396 = vst [vmem:[%s4935_s2 + $0x20] sm:$0xff] %v3321_v27   ;;  %v2819_v15 = vadd.f32 %v3877_v7, %v2818_v28  ;;  %v2887_v52 = vadd.f32 %v2886_v22, %v2856_v42  ;;  %v3849_v38 = vpop.f32.mrb[12].mxu0 }
 0x209   : > { %v3881_v45 = vadd.f32 %v3849_v38, %v4922_v29  ;;  %v2539_v57 = vpop.f32.mrb[13].mxu0 }
 0x20a   : > { %v2888_v9 = vadd.f32 %v2887_v52, %v2857_v36  ;;  %v3882_v20 = vadd.f32 %v2539_v57, %v4924_v31  ;;  %v2820_v19 = vadd.f32 %v3879_v18, %v2819_v15  ;;  %v3850_v23 = vpop.f32.mrb[14].mxu0 }
 0x20b   : > { %v3883_v56 = vadd.f32 %v3850_v23, %v4926_v44  ;;  %v2542_v49 = vpop.f32.mrb[15].mxu0  ;;  %v2861_v21 = vmul.f32 %v3881_v45, %v3881_v45 }
 0x20c   : > { %v2821_v43 = vadd.f32 %v3882_v20, %v2820_v19  ;;  %v2859_v2 = vmul.f32 %v3882_v20, %v3882_v20  ;;  %v2889_v61 = vadd.f32 %v2888_v9, %v2858_v14  ;;  %v3884_v62 = vadd.f32 %v2542_v49, %v4928_v12 }
 0x20d   : > { %v3336_v4 = vpack.c.bf16 %v3883_v56, %v3881_v45  ;;  %v2862_v24 = vmul.f32 %v3883_v56, %v3883_v56 }
 0x20e   : > { %v2890_v60 = vadd.f32 %v2889_v61, %v2859_v2  ;;  %v3331_v29 = vpack.c.bf16 %v3884_v62, %v3882_v20  ;;  %v2822_v50 = vadd.f32 %v3884_v62, %v2821_v43  ;;  %v2860_v0 = vmul.f32 %v3884_v62, %v3884_v62 }
 0x20f   : > { %3399 = vst [vmem:[%s4935_s2 + $0x38] sm:$0xff] %v3336_v4   ;;  %v3717_v48 = vpop.f32.mrb[16].mxu1 }
 0x210   : > { %3398 = vst [vmem:[%s4935_s2 + $0x30] sm:$0xff] %v3331_v29   ;;  %v2823_v31 = vadd.f32 %v3881_v45, %v2822_v50  ;;  %v2891_v51 = vadd.f32 %v2890_v60, %v2860_v0  ;;  %v1730_v35 = vpop.f32.mrb[17].mxu1  ;;  %v3853_v17 = vpop.f32.mrb[16].mxu0 }
 0x211   : > { %v3885_v44 = vadd.f32 %v3853_v17, %v3717_v48  ;;  %v3718_v58 = vpop.f32.mrb[18].mxu1  ;;  %v2555_v1 = vpop.f32.mrb[17].mxu0 }
 0x212   : > { %v2892_v25 = vadd.f32 %v2891_v51, %v2861_v21  ;;  %v3886_v12 = vadd.f32 %v2555_v1, %v1730_v35  ;;  %v2824_v40 = vadd.f32 %v3883_v56, %v2823_v31  ;;  %v1733_v59 = vpop.f32.mrb[19].mxu1  ;;  %v3854_v13 = vpop.f32.mrb[18].mxu0 }
 0x213   : > { %v3887_v10 = vadd.f32 %v3854_v13, %v3718_v58  ;;  %v2558_v6 = vpop.f32.mrb[19].mxu0  ;;  %v2865_v46 = vmul.f32 %v3885_v44, %v3885_v44 }
 0x214   : > { %v2825_v33 = vadd.f32 %v3886_v12, %v2824_v40  ;;  %v2863_v55 = vmul.f32 %v3886_v12, %v3886_v12  ;;  %v2893_v3 = vadd.f32 %v2892_v25, %v2862_v24  ;;  %v3888_v16 = vadd.f32 %v2558_v6, %v1733_v59 }
 0x215   : > { %v3346_v26 = vpack.c.bf16 %v3887_v10, %v3885_v44  ;;  %v2866_v30 = vmul.f32 %v3887_v10, %v3887_v10 }
 0x216   : > { %v2894_v63 = vadd.f32 %v2893_v3, %v2863_v55  ;;  %v3341_v39 = vpack.c.bf16 %v3888_v16, %v3886_v12  ;;  %v2826_v7 = vadd.f32 %v3888_v16, %v2825_v33  ;;  %v2864_v34 = vmul.f32 %v3888_v16, %v3888_v16 }
 0x217   : > { %3401 = vst [vmem:[%s4935_s2 + $0x48] sm:$0xff] %v3346_v26   ;;  %v3721_v41 = vpop.f32.mrb[20].mxu1 }
 0x218   : > { %3400 = vst [vmem:[%s4935_s2 + $0x40] sm:$0xff] %v3341_v39   ;;  %v2827_v37 = vadd.f32 %v3885_v44, %v2826_v7  ;;  %v2895_v47 = vadd.f32 %v2894_v63, %v2864_v34  ;;  %v1746_v8 = vpop.f32.mrb[21].mxu1  ;;  %v3857_v18 = vpop.f32.mrb[20].mxu0 }
 0x219   : > { %v3889_v32 = vadd.f32 %v3857_v18, %v3721_v41  ;;  %v3722_v53 = vpop.f32.mrb[22].mxu1  ;;  %v2571_v54 = vpop.f32.mrb[21].mxu0 }
 0x21a   : > { %v2896_v11 = vadd.f32 %v2895_v47, %v2865_v46  ;;  %v3890_v5 = vadd.f32 %v2571_v54, %v1746_v8  ;;  %v2828_v22 = vadd.f32 %v3887_v10, %v2827_v37  ;;  %v1749_v27 = vpop.f32.mrb[23].mxu1  ;;  %v3858_v28 = vpop.f32.mrb[22].mxu0 }
 0x21b   : > { %v3891_v42 = vadd.f32 %v3858_v28, %v3722_v53  ;;  %v2574_v36 = vpop.f32.mrb[23].mxu0  ;;  %v2869_v56 = vmul.f32 %v3889_v32, %v3889_v32 }
 0x21c   : > { %v2829_v15 = vadd.f32 %v3890_v5, %v2828_v22  ;;  %v2867_v52 = vmul.f32 %v3890_v5, %v3890_v5  ;;  %v2897_v38 = vadd.f32 %v2896_v11, %v2866_v30  ;;  %v3892_v45 = vadd.f32 %v2574_v36, %v1749_v27 }
 0x21d   : > { %v3356_v57 = vpack.c.bf16 %v3891_v42, %v3889_v32  ;;  %v2870_v29 = vmul.f32 %v3891_v42, %v3891_v42 }
 0x21e   : > { %v2898_v14 = vadd.f32 %v2897_v38, %v2867_v52  ;;  %v3351_v9 = vpack.c.bf16 %v3892_v45, %v3890_v5  ;;  %v2830_v20 = vadd.f32 %v3892_v45, %v2829_v15  ;;  %v2868_v19 = vmul.f32 %v3892_v45, %v3892_v45 }
 0x21f   : > { %3403 = vst [vmem:[%s4935_s2 + $0x58] sm:$0xff] %v3356_v57   ;;  %v3725_v23 = vpop.f32.mrb[24].mxu1 }
 0x220   : > { %3402 = vst [vmem:[%s4935_s2 + $0x50] sm:$0xff] %v3351_v9   ;;  %v2831_v49 = vadd.f32 %v3889_v32, %v2830_v20  ;;  %v2899_v43 = vadd.f32 %v2898_v14, %v2868_v19  ;;  %v1762_v2 = vpop.f32.mrb[25].mxu1  ;;  %v3861_v61 = vpop.f32.mrb[24].mxu0 }
 0x221   : > { %v3893_v62 = vadd.f32 %v3861_v61, %v3725_v23  ;;  %v3726_v4 = vpop.f32.mrb[26].mxu1  ;;  %v2587_v60 = vpop.f32.mrb[25].mxu0 }
 0x222   : > { %v2900_v50 = vadd.f32 %v2899_v43, %v2869_v56  ;;  %v3894_v0 = vadd.f32 %v2587_v60, %v1762_v2  ;;  %v2832_v48 = vadd.f32 %v3891_v42, %v2831_v49  ;;  %v1765_v21 = vpop.f32.mrb[27].mxu1  ;;  %v3862_v31 = vpop.f32.mrb[26].mxu0 }
 0x223   : > { %v3895_v51 = vadd.f32 %v3862_v31, %v3726_v4  ;;  %v2590_v35 = vpop.f32.mrb[27].mxu0  ;;  %v2873_v10 = vmul.f32 %v3893_v62, %v3893_v62 }
 0x224   : > { %v2833_v17 = vadd.f32 %v3894_v0, %v2832_v48  ;;  %v2871_v44 = vmul.f32 %v3894_v0, %v3894_v0  ;;  %v2901_v58 = vadd.f32 %v2900_v50, %v2870_v29  ;;  %v3896_v1 = vadd.f32 %v2590_v35, %v1765_v21 }
 0x225   : > { %v3366_v24 = vpack.c.bf16 %v3895_v51, %v3893_v62  ;;  %v2874_v39 = vmul.f32 %v3895_v51, %v3895_v51 }
 0x226   : > { %v2902_v25 = vadd.f32 %v2901_v58, %v2871_v44  ;;  %v3361_v12 = vpack.c.bf16 %v3896_v1, %v3894_v0  ;;  %v2834_v40 = vadd.f32 %v3896_v1, %v2833_v17  ;;  %v2872_v59 = vmul.f32 %v3896_v1, %v3896_v1 }
 0x227   : > { %3405 = vst [vmem:[%s4935_s2 + $0x68] sm:$0xff] %v3366_v24   ;;  %v3729_v13 = vpop.f32.mrb[28].mxu1 }
 0x228   : > { %3404 = vst [vmem:[%s4935_s2 + $0x60] sm:$0xff] %v3361_v12   ;;  %v2835_v6 = vadd.f32 %v3893_v62, %v2834_v40  ;;  %v2903_v33 = vadd.f32 %v2902_v25, %v2872_v59  ;;  %v1778_v55 = vpop.f32.mrb[29].mxu1  ;;  %v3865_v3 = vpop.f32.mrb[28].mxu0 }
 0x229   : > { %v3897_v16 = vadd.f32 %v3865_v3, %v3729_v13  ;;  %v3730_v26 = vpop.f32.mrb[30].mxu1  ;;  %v2603_v63 = vpop.f32.mrb[29].mxu0 }
 0x22a   : > { %v2904_v7 = vadd.f32 %v2903_v33, %v2873_v10  ;;  %v3898_v34 = vadd.f32 %v2603_v63, %v1778_v55  ;;  %v2836_v41 = vadd.f32 %v3895_v51, %v2835_v6  ;;  %v1781_v46 = vpop.f32.mrb[31].mxu1  ;;  %v3866_v37 = vpop.f32.mrb[30].mxu0 }
 0x22b   : > { %v3899_v47 = vadd.f32 %v3866_v37, %v3730_v26  ;;  %v2606_v8 = vpop.f32.mrb[31].mxu0  ;;  %v2877_v28 = vmul.f32 %v3897_v16, %v3897_v16 }
 0x22c   : > { %v2837_v18 = vadd.f32 %v3898_v34, %v2836_v41  ;;  %v2875_v32 = vmul.f32 %v3898_v34, %v3898_v34  ;;  %v2905_v53 = vadd.f32 %v2904_v7, %v2874_v39  ;;  %v3900_v54 = vadd.f32 %v2606_v8, %v1781_v46 }
 0x22d   : > { %v3376_v30 = vpack.c.bf16 %v3899_v47, %v3897_v16  ;;  %v2878_v15 = vmul.f32 %v3899_v47, %v3899_v47 }
 0x22e   : > { %v2906_v11 = vadd.f32 %v2905_v53, %v2875_v32  ;;  %v3371_v5 = vpack.c.bf16 %v3900_v54, %v3898_v34  ;;  %v2838_v22 = vadd.f32 %v3900_v54, %v2837_v18  ;;  %v2876_v27 = vmul.f32 %v3900_v54, %v3900_v54 }
 0x22f   : > { %3407 = vst [vmem:[%s4935_s2 + $0x78] sm:$0xff] %v3376_v30  }
 0x230   : > { %3406 = vst [vmem:[%s4935_s2 + $0x70] sm:$0xff] %v3371_v5   ;;  %v2839_v42 = vadd.f32 %v3897_v16, %v2838_v22  ;;  %v2907_v36 = vadd.f32 %v2906_v11, %v2876_v27 }
 0x232   : > { %v2840_v52 = vadd.f32 %v3899_v47, %v2839_v42  ;;  %v2908_v38 = vadd.f32 %v2907_v36, %v2877_v28 }
 0x234   : > { %v2841_v45 = vrot.slane %v2840_v52, 4  ;;  %v2909_v57 = vadd.f32 %v2908_v38, %v2878_v15 }
 0x236   : > { %v2842_v14 = vadd.f32 %v2841_v45, %v2840_v52  ;;  %v2910_v9 = vrot.slane %v2909_v57, 4 }
 0x238   : > { %v2843_v20 = vrot.slane %v2842_v14, 2  ;;  %v2911_v19 = vadd.f32 %v2910_v9, %v2909_v57 }
 0x23a   : > { %v2844_v23 = vadd.f32 %v2843_v20, %v2842_v14  ;;  %v2912_v56 = vrot.slane %v2911_v19, 2 }
 0x23c   : > { %v2845_v49 = vrot.slane %v2844_v23, 1  ;;  %v2913_v43 = vadd.f32 %v2912_v56, %v2911_v19 }
 0x23e   : > { %v2846_v2 = vadd.f32 %v2845_v49, %v2844_v23  ;;  %v2914_v61 = vrot.slane %v2913_v43, 1 }
 0x240   : > { %v2915_v62 = vadd.f32 %v2914_v61, %v2913_v43  ;;  %2916 = vst [vmem:[%s235_s22] sm:$0x1] %v2846_v2 }
 0x242   : > { %2917 = vst [vmem:[%s235_s22 + $0x1] sm:$0x1] %v2915_v62 }
 0x243 PF: > { %s16_s18 = sadd.s32 1, %s4150_s18  }
 0x244   : > { %p13_p4 = scmp.ge.s32.totalorder %s16_s18, 4  }
 0x246   :  { %15 = sbr.rel (!%p13_p4) target bundleno = 1 (0x1), region = 87 }

// kernel: res_block_forward.4
= control target key start
LH: loop header
LB: loop body
LE: loop exit
PB: predicated region body
PF: predicated region fallthrough
CT: control target
= control target key end

     0   :  { %s4135_s18 = smov 0   ;;  %s5224_s0 = inlined_call_operand.vmem [shape: bf16[2,16,16,128], index: 0, kind: input, shape index: {}]   ;;  %s5225_s1 = inlined_call_operand.vmem [shape: f32[1,128], index: 1, kind: input, shape index: {}]   ;;  %s5226_s2 = inlined_call_operand.vmem [shape: f32[1,128], index: 2, kind: input, shape index: {}]   ;;  %s5227_s3 = inlined_call_operand.vmem [shape: bf16[3,384,128], index: 3, kind: input, shape index: {}]   ;;  %s5228_s4 = inlined_call_operand.vmem [shape: bf16[2,256,128], index: 4, kind: output, shape index: {0}]   ;;  %s5229_s5 = inlined_call_operand.vmem [shape: f32[2,2,128], index: 5, kind: output, shape index: {1}]  }
   0x1 LB: > { %s2862_s19 = sadd.s32 4294967295, %s4100_s18   ;;  %p2866_p0 = scmp.ge.s32.totalorder %s4100_s18, 1  ;;  %s4100_s18 = sphi %s4135_s18, %s16_s18  }
   0x2   : > { %p190_p1 = scmp.lt.s32.totalorder %s4100_s18, 3 }
   0x4   : > { %p191_p2 = pnand %p2866_p0, %p190_p1 }
   0x6   : > { %194 = sbr.rel (%p191_p2) target bundleno = 583 (0x247), region = 36 }
   0xd   : > { %v4021_v0 = vld [vmem:[%s5227_s3 + $0x100] sm:$0xff]   ;;  %v4102_v3 = vmov 0.0   ;;  %v4024_v4 = vld [vmem:[%s5227_s3 + $0x108] sm:$0xff]   ;;  %v4027_v7 = vld [vmem:[%s5227_s3 + $0x110] sm:$0xff]   ;;  %p222_p3 = scmp.lt.s32.totalorder %s2862_s19, 1  ;;  %vm859_vm0 = vcmask 1046528  }
   0xe   : > { %v4149_v1 = vld [vmem:[%s5227_s3 + $0x140] sm:$0xff]   ;;  %3284 = vmatprep.subr.bf16.mxu0 %v4021_v0  ;;  %414 = vst [vmem:[#allocation2 + $0x18] sm:$0xff] %v4102_v3  ;;  %415 = vst [vmem:[#allocation2 + $0x20] sm:$0xff] %v4102_v3  ;;  %v4162_v5 = vld [vmem:[%s5227_s3 + $0x148] sm:$0xff]   ;;  %vm588_vm1 = vsmask.f32 7424 }
   0xf   : > { %v4023_v2 = vld [vmem:[%s5227_s3 + $0xc0] sm:$0xff]   ;;  %416 = vst [vmem:[#allocation2 + $0x28] sm:$0x3] %v4102_v3  ;;  %411 = vst [vmem:[#allocation2] sm:$0xff] %v4102_v3  ;;  %3836 = vmatprep.subr.bf16.mxu1 %v4149_v1  ;;  %v4026_v6 = vld [vmem:[%s5227_s3 + $0xc8] sm:$0xff]   ;;  %s5233_s19 = smov (!%p222_p3, %s2862_s19), 1 }
  0x10   : > { %413 = vst [vmem:[#allocation2 + $0x10] sm:$0x3] %v4102_v3  ;;  %417 = vst [vmem:[#allocation2 + $0x30] sm:$0xff] %v4102_v3  ;;  %3285 = vmatpush3.bf16.msra.mxu0 %v4023_v2  ;;  %3844 = vmatpush3.bf16.msra.mxu1 %v4149_v1  ;;  %v4174_v8 = vld [vmem:[%s5227_s3 + $0x150] sm:$0xff]   ;;  %v4030_v10 = vld [vmem:[%s5227_s3 + $0x118] sm:$0xff]   ;;  %s3076_s6 = sshll.u32 %s5233_s19, 7 }
  0x11   : > { %418 = vst [vmem:[#allocation2 + $0x38] sm:$0xff] %v4102_v3  ;;  %419 = vst [vmem:[#allocation2 + $0x40] sm:$0x3] %v4102_v3  ;;  %3286 = vmatprep.subr.bf16.mxu0 %v4024_v4  ;;  %3837 = vmatprep.subr.bf16.mxu1 %v4162_v5  ;;  %v4029_v9 = vld [vmem:[%s5227_s3 + $0xd0] sm:$0xff]   ;;  %v4187_v11 = vld [vmem:[%s5227_s3 + $0x158] sm:$0xff]   ;;  %s4240_s15 = scalar_lea.vmem %s5224_s0, %s3076_s6  ;;  %s5155_s17 = scalar_lea.vmem %s5228_s4, %s3076_s6 }
  0x12   : > { %420 = vst [vmem:[#allocation2 + $0x48] sm:$0xff] %v4102_v3  ;;  %421 = vst [vmem:[#allocation2 + $0x50] sm:$0xff] %v4102_v3  ;;  %v4032_v12 = vld [vmem:[%s5227_s3 + $0xd8] sm:$0xff]   ;;  %v4033_v13 = vld [vmem:[%s5227_s3 + $0x120] sm:$0xff]   ;;  %s2871_s6 = sshll.u32 %s5233_s19, 1 }
  0x13   : > { %422 = vst [vmem:[#allocation2 + $0x58] sm:$0x3] %v4102_v3  ;;  %423 = vst [vmem:[#allocation2 + $0x60] sm:$0xff] %v4102_v3  ;;  %v4202_v14 = vld [vmem:[%s5227_s3 + $0x160] sm:$0xff]   ;;  %v4036_v16 = vld [vmem:[%s5227_s3 + $0x128] sm:$0xff]   ;;  %s235_s22 = scalar_lea.vmem %s5229_s5, %s2871_s6 }
  0x14   : > { %424 = vst [vmem:[#allocation2 + $0x68] sm:$0xff] %v4102_v3  ;;  %425 = vst [vmem:[#allocation2 + $0x70] sm:$0x3] %v4102_v3  ;;  %3287 = vmatpush3.bf16.msra.mxu0 %v4026_v6  ;;  %3845 = vmatpush3.bf16.msra.mxu1 %v4162_v5  ;;  %v4035_v15 = vld [vmem:[%s5227_s3 + $0xe0] sm:$0xff]   ;;  %v4219_v17 = vld [vmem:[%s5227_s3 + $0x168] sm:$0xff]  }
  0x15   : > { %426 = vst [vmem:[#allocation2 + $0x78] sm:$0xff] %v4102_v3  ;;  %427 = vst [vmem:[#allocation2 + $0x80] sm:$0xff] %v4102_v3  ;;  %3288 = vmatprep.subr.bf16.mxu0 %v4027_v7  ;;  %3838 = vmatprep.subr.bf16.mxu1 %v4174_v8  ;;  %v4038_v18 = vld [vmem:[%s5227_s3 + $0xe8] sm:$0xff]   ;;  %v4039_v19 = vld [vmem:[%s5227_s3 + $0x130] sm:$0xff]  }
  0x16   : > { %428 = vst [vmem:[#allocation2 + $0x88] sm:$0x3] %v4102_v3  ;;  %429 = vst [vmem:[#allocation2 + $0x90] sm:$0xff] %v4102_v3  ;;  %v4233_v20 = vld [vmem:[%s5227_s3 + $0x170] sm:$0xff]   ;;  %v4042_v22 = vld [vmem:[%s5227_s3 + $0x138] sm:$0xff]  }
  0x17   : > { %430 = vst [vmem:[#allocation2 + $0x98] sm:$0xff] %v4102_v3  ;;  %431 = vst [vmem:[#allocation2 + $0xa0] sm:$0x3] %v4102_v3  ;;  %v4041_v21 = vld [vmem:[%s5227_s3 + $0xf0] sm:$0xff]   ;;  %v4252_v23 = vld [vmem:[%s5227_s3 + $0x178] sm:$0xff]  }
  0x18   : > { %432 = vst [vmem:[#allocation2 + $0xa8] sm:$0xff] %v4102_v3  ;;  %433 = vst [vmem:[#allocation2 + $0xb0] sm:$0xff] %v4102_v3  ;;  %3289 = vmatpush3.bf16.msra.mxu0 %v4029_v9  ;;  %3846 = vmatpush3.bf16.msra.mxu1 %v4174_v8  ;;  %v3111_v24 = vld [vmem:[%s4240_s15] sm:$0xff]   ;;  %v3262_v29 = vld [vmem:[%s4240_s15 + $0x48] sm:$0xff]  }
  0x19   : > { %434 = vst [vmem:[#allocation2 + $0xb8] sm:$0x3] %v4102_v3  ;;  %435 = vst [vmem:[#allocation2 + $0xc0] sm:$0xff] %v4102_v3  ;;  %3290 = vmatprep.subr.bf16.mxu0 %v4030_v10  ;;  %3839 = vmatprep.subr.bf16.mxu1 %v4187_v11  ;;  %v4258_v25 = vld [vmem:[%s5225_s1] ss:$0 sm:$0xff]  ;;  %v3112_v26 = vunpack.c.l.bf16 %v3111_v24  ;;  %v3113_v27 = vunpack.c.h.bf16 %v3111_v24  ;;  %v3148_v33 = vunpack.c.l.bf16 %v3262_v29  ;;  %v3149_v34 = vunpack.c.h.bf16 %v3262_v29  ;;  %v4044_v37 = vld [vmem:[%s5227_s3 + $0xf8] sm:$0xff]  }
  0x1a   : > { %436 = vst [vmem:[#allocation2 + $0xc8] sm:$0xff] %v4102_v3  ;;  %437 = vst [vmem:[#allocation2 + $0xd0] sm:$0x3] %v4102_v3  ;;  %v3261_v28 = vld [vmem:[%s4240_s15 + $0x40] sm:$0xff]   ;;  %v3254_v45 = vld [vmem:[%s4240_s15 + $0x8] sm:$0xff]  }
  0x1b   : > { %438 = vst [vmem:[#allocation2 + $0xd8] sm:$0xff] %v4102_v3  ;;  %439 = vst [vmem:[#allocation2 + $0xe0] sm:$0xff] %v4102_v3  ;;  %v4266_v30 = vld [vmem:[%s5226_s2] ss:$0 sm:$0xff]  ;;  %v3144_v31 = vunpack.c.l.bf16 %v3261_v28  ;;  %v3145_v32 = vunpack.c.h.bf16 %v3261_v28  ;;  %v308_v35 = vmul.f32 %v3112_v26, %v4258_v25  ;;  %v309_v36 = vmul.f32 %v3113_v27, %v4258_v25  ;;  %v3263_v50 = vld [vmem:[%s4240_s15 + $0x50] sm:$0xff]  }
  0x1c   : > { %440 = vst [vmem:[#allocation2 + $0xe8] sm:$0x3] %v4102_v3  ;;  %441 = vst [vmem:[#allocation2 + $0xf0] sm:$0xff] %v4102_v3  ;;  %3291 = vmatpush3.bf16.msra.mxu0 %v4032_v12  ;;  %3847 = vmatpush3.bf16.msra.mxu1 %v4187_v11  ;;  %v326_v40 = vmul.f32 %v3148_v33, %v4258_v25  ;;  %v327_v43 = vmul.f32 %v3149_v34, %v4258_v25  ;;  %v4045_v44 = vld [vmem:[%s5227_s3 + $0x40] sm:$0xff]   ;;  %v3116_v49 = vunpack.c.l.bf16 %v3254_v45  ;;  %v3264_v55 = vld [vmem:[%s4240_s15 + $0x58] sm:$0xff]  }
  0x1d   : > { %442 = vst [vmem:[#allocation2 + $0xf8] sm:$0xff] %v4102_v3  ;;  %443 = vst [vmem:[#allocation2 + $0x100] sm:$0x3] %v4102_v3  ;;  %3292 = vmatprep.subr.bf16.mxu0 %v4033_v13  ;;  %3840 = vmatprep.subr.bf16.mxu1 %v4202_v14  ;;  %v324_v38 = vmul.f32 %v3144_v31, %v4258_v25  ;;  %v325_v39 = vmul.f32 %v3145_v32, %v4258_v25  ;;  %v3117_v54 = vunpack.c.h.bf16 %v3254_v45  ;;  %v3255_v9 = vld [vmem:[%s4240_s15 + $0x10] sm:$0xff]   ;;  %v3265_v10 = vld [vmem:[%s4240_s15 + $0x60] sm:$0xff]  }
  0x1e   : > { %444 = vst [vmem:[#allocation2 + $0x108] sm:$0xff] %v4102_v3  ;;  %445 = vst [vmem:[#allocation2 + $0x110] sm:$0xff] %v4102_v3  ;;  %v347_v41 = vadd.f32 %v4266_v30, %v308_v35  ;;  %v348_v42 = vadd.f32 %v4266_v30, %v309_v36  ;;  %v365_v48 = vadd.f32 %v4266_v30, %v326_v40  ;;  %v3152_v62 = vunpack.c.l.bf16 %v3263_v50 }
  0x1f   : > { %446 = vst [vmem:[#allocation2 + $0x118] sm:$0x3] %v4102_v3  ;;  %447 = vst [vmem:[#allocation2 + $0x120] sm:$0xff] %v4102_v3  ;;  %v363_v46 = vadd.f32 %v4266_v30, %v324_v38  ;;  %v364_v47 = vadd.f32 %v4266_v30, %v325_v39  ;;  %v366_v53 = vadd.f32 %v4266_v30, %v327_v43  ;;  %v3153_v63 = vunpack.c.h.bf16 %v3263_v50 }
  0x20   : > { %448 = vst [vmem:[#allocation2 + $0x128] sm:$0xff] %v4102_v3  ;;  %449 = vst [vmem:[#allocation2 + $0x130] sm:$0x3] %v4102_v3  ;;  %3293 = vmatpush3.bf16.msra.mxu0 %v4035_v15  ;;  %3848 = vmatpush3.bf16.msra.mxu1 %v4202_v14  ;;  %v379_v51 = vmax.f32 %v347_v41, 0.0  ;;  %v380_v52 = vmax.f32 %v348_v42, 0.0  ;;  %v397_v58 = vmax.f32 %v365_v48, 0.0  ;;  %v310_v59 = vmul.f32 %v3116_v49, %v4258_v25 }
  0x21   : > { %450 = vst [vmem:[#allocation2 + $0x138] sm:$0xff] %v4102_v3  ;;  %451 = vst [vmem:[#allocation2 + $0x140] sm:$0xff] %v4102_v3  ;;  %3294 = vmatprep.subr.bf16.mxu0 %v4036_v16  ;;  %3841 = vmatprep.subr.bf16.mxu1 %v4219_v17  ;;  %v395_v56 = vmax.f32 %v363_v46, 0.0  ;;  %v396_v57 = vmax.f32 %v364_v47, 0.0  ;;  %v398_v60 = vmax.f32 %v366_v53, 0.0  ;;  %v311_v61 = vmul.f32 %v3117_v54, %v4258_v25 }
  0x22   : > { %452 = vst [vmem:[#allocation2 + $0x148] sm:$0x3] %v4102_v3  ;;  %453 = vst [vmem:[#allocation2 + $0x150] sm:$0xff] %v4102_v3  ;;  %v349_v0 = vadd.f32 %v4266_v30, %v310_v59  ;;  %v3156_v2 = vunpack.c.l.bf16 %v3264_v55  ;;  %v328_v6 = vmul.f32 %v3152_v62, %v4258_v25  ;;  %v329_v7 = vmul.f32 %v3153_v63, %v4258_v25  ;;  %v3266_v59 = vld [vmem:[%s4240_s15 + $0x68] sm:$0xff]  }
  0x23   : > { %454 = vst [vmem:[#allocation2 + $0x158] sm:$0xff] %v4102_v3  ;;  %455 = vst [vmem:[#allocation2 + $0x160] sm:$0x3] %v4102_v3  ;;  %v350_v4 = vadd.f32 %v4266_v30, %v311_v61  ;;  %v3120_v16 = vunpack.c.l.bf16 %v3255_v9  ;;  %v3160_v28 = vunpack.c.l.bf16 %v3265_v10  ;;  %v3161_v33 = vunpack.c.h.bf16 %v3265_v10 }
  0x24   : > { %456 = vst [vmem:[#allocation2 + $0x168] sm:$0xff] %v4102_v3  ;;  %457 = vst [vmem:[#allocation2 + $0x170] sm:$0xff] %v4102_v3  ;;  %3295 = vmatpush3.bf16.msra.mxu0 %v4038_v18  ;;  %3849 = vmatpush3.bf16.msra.mxu1 %v4219_v17  ;;  %v381_v12 = vmax.f32 %v349_v0, 0.0  ;;  %v330_v13 = vmul.f32 %v3156_v2, %v4258_v25  ;;  %v4333_v0 = vld [vmem:[%s4240_s15 + $0x18] sm:$0xff]  }
  0x25   : > { %458 = vst [vmem:[#allocation2 + $0x178] sm:$0x3] %v4102_v3  ;;  %459 = vst [vmem:[#allocation2 + $0x180] sm:$0xff] %v4102_v3  ;;  %3296 = vmatprep.subr.bf16.mxu0 %v4039_v19  ;;  %3842 = vmatprep.subr.bf16.mxu1 %v4233_v20  ;;  %v382_v18 = vmax.f32 %v350_v4, 0.0  ;;  %v367_v19 = vadd.f32 %v4266_v30, %v328_v6  ;;  %v312_v27 = vmul.f32 %v3120_v16, %v4258_v25 }
  0x26   : > { %460 = vst [vmem:[#allocation2 + $0x188] sm:$0xff] %v4102_v3  ;;  %461 = vst [vmem:[#allocation2 + $0x190] sm:$0x3] %v4102_v3  ;;  %v369_v24 = vadd.f32 %v4266_v30, %v330_v13  ;;  %v332_v40 = vmul.f32 %v3160_v28, %v4258_v25  ;;  %v333_v47 = vmul.f32 %v3161_v33, %v4258_v25 }
  0x27   : > { %464 = vst [vmem:[#allocation2 + $0x1a8] sm:$0x3] %v4102_v3  ;;  %466 = vst [vmem:[#allocation2 + $0x19] sm:$0xff] %v379_v51  ;;  %v3157_v3 = vunpack.c.h.bf16 %v3264_v55  ;;  %v399_v29 = vmax.f32 %v367_v19, 0.0  ;;  %v351_v39 = vadd.f32 %v4266_v30, %v312_v27 }
  0x28   : > { %3297 = vmatpush3.bf16.msra.mxu0 %v4041_v21  ;;  %3850 = vmatpush3.bf16.msra.mxu1 %v4233_v20  ;;  %467 = vst [vmem:[#allocation2 + $0x21] sm:$0xff] %v380_v52  ;;  %482 = vst [vmem:[#allocation2 + $0xd9] sm:$0xff] %v395_v56  ;;  %v368_v21 = vadd.f32 %v4266_v30, %v329_v7  ;;  %v371_v54 = vadd.f32 %v4266_v30, %v332_v40 }
  0x29   : > { %3298 = vmatprep.subr.bf16.mxu0 %v4042_v22  ;;  %3843 = vmatprep.subr.bf16.mxu1 %v4252_v23  ;;  %483 = vst [vmem:[#allocation2 + $0xe1] sm:$0xff] %v396_v57  ;;  %484 = vst [vmem:[#allocation2 + $0xf1] sm:$0xff] %v397_v58  ;;  %v331_v15 = vmul.f32 %v3157_v3, %v4258_v25  ;;  %v3121_v22 = vunpack.c.h.bf16 %v3255_v9  ;;  %v383_v53 = vmax.f32 %v351_v39, 0.0 }
  0x2a   : > { %485 = vst [vmem:[#allocation2 + $0xf9] sm:$0xff] %v398_v60  ;;  %468 = vst [vmem:[#allocation2 + $0x31] sm:$0xff] %v381_v12  ;;  %v400_v31 = vmax.f32 %v368_v21, 0.0  ;;  %v372_v7 = vadd.f32 %v4266_v30, %v333_v47  ;;  %v4046_v12 = vld [vmem:[%s5227_s3] sm:$0xff]   ;;  %v403_v16 = vmax.f32 %v371_v54, 0.0  ;;  %v4047_v21 = vld [vmem:[%s5227_s3 + $0x48] sm:$0xff]  }
  0x2b   : > { %v370_v26 = vadd.f32 %v4266_v30, %v331_v15  ;;  %469 = vst [vmem:[#allocation2 + $0x39] sm:$0xff] %v382_v18  ;;  %v313_v32 = vmul.f32 %v3121_v22, %v4258_v25  ;;  %486 = vst [vmem:[#allocation2 + $0x109] sm:$0xff] %v399_v29  ;;  %v3164_v18 = vunpack.c.l.bf16 %v3266_v59  ;;  %v4049_v54 = vld [vmem:[%s5227_s3 + $0x50] sm:$0xff]  }
  0x2c   : > { %3299 = vmatpush3.bf16.msra.mxu0 %v4044_v37  ;;  %3851 = vmatpush3.bf16.msra.mxu1 %v4252_v23  ;;  %v401_v37 = vmax.f32 %v369_v24, 0.0  ;;  %487 = vst [vmem:[#allocation2 + $0x111] sm:$0xff] %v400_v31  ;;  %470 = vst [vmem:[#allocation2 + $0x49] sm:$0xff] %v383_v53 }
  0x2d   : > { %3692 = vmatprep.subr.bf16.mxu0 %v4149_v1  ;;  %3420 = vmatprep.subr.bf16.mxu1 %v4045_v44  ;;  %v402_v38 = vmax.f32 %v370_v26, 0.0  ;;  %v352_v46 = vadd.f32 %v4266_v30, %v313_v32  ;;  %v404_v26 = vmax.f32 %v372_v7, 0.0  ;;  %490 = vst [vmem:[#allocation2 + $0x139] sm:$0xff] %v403_v16  ;;  %v3165_v32 = vunpack.c.h.bf16 %v3266_v59 }
  0x2e   : > { %v501_v34 = vld [vmem:[#allocation2 + $0x18] sm:$0xff]  ;;  %488 = vst [vmem:[#allocation2 + $0x121] sm:$0xff] %v401_v37  ;;  %v334_v33 = vmul.f32 %v3164_v18, %v4258_v25 }
  0x2f   : > { %v502_v35 = vld [vmem:[#allocation2 + $0x20] sm:$0xff]  ;;  %v503_v36 = vld [vmem:[#allocation2 + $0x28] sm:$0x3]  ;;  %v525_v43 = vld [vmem:[#allocation2 + $0xd8] sm:$0xff]  ;;  %489 = vst [vmem:[#allocation2 + $0x129] sm:$0xff] %v402_v38  ;;  %v384_v63 = vmax.f32 %v352_v46, 0.0 }
  0x30   : > { %v4311_v41 = vpack.c.bf16 %v502_v35, %v501_v34  ;;  %v4313_v42 = vpack.c.bf16 %v503_v36, %v503_v36  ;;  %v526_v44 = vld [vmem:[#allocation2 + $0xe0] sm:$0xff]  ;;  %v527_v45 = vld [vmem:[#allocation2 + $0xe8] sm:$0x3]  ;;  %v528_v50 = vld [vmem:[#allocation2 + $0xf0] sm:$0xff]  ;;  %v3124_v34 = vunpack.c.l.bf16 %v4333_v0  ;;  %491 = vst [vmem:[#allocation2 + $0x141] sm:$0xff] %v404_v26 }
  0x31   : > { %v4317_v48 = vpack.c.bf16 %v526_v44, %v525_v43  ;;  %v4319_v49 = vpack.c.bf16 %v527_v45, %v527_v45  ;;  %v529_v51 = vld [vmem:[#allocation2 + $0xf8] sm:$0xff]  ;;  %v530_v52 = vld [vmem:[#allocation2 + $0x100] sm:$0x3]  ;;  %v504_v6 = vld [vmem:[#allocation2 + $0x30] sm:$0xff]  ;;  %471 = vst [vmem:[#allocation2 + $0x51] sm:$0xff] %v384_v63 }
  0x32   : > { %v602_v55 = vshrl.u32 %v4311_v41, 16  ;;  %v604_v56 = vshll.u32 %v4311_v41, 16  ;;  %v609_v57 = vshll.u32 %v4313_v42, 16  ;;  %v4325_v58 = vpack.c.bf16 %v529_v51, %v528_v50  ;;  %v505_v13 = vld [vmem:[#allocation2 + $0x38] sm:$0xff]  ;;  %v506_v15 = vld [vmem:[#allocation2 + $0x40] sm:$0x3] }
  0x33   : > { %v887_v60 = vrot.slane %v4317_v48, 1  ;;  %v888_v61 = vrot.slane %v4319_v49, 1  ;;  %v4330_v62 = vpack.c.bf16 %v530_v52, %v530_v52  ;;  %v4348_v22 = vpack.c.bf16 %v505_v13, %v504_v6  ;;  %v531_v28 = vld [vmem:[#allocation2 + $0x108] sm:$0xff]  ;;  %v532_v29 = vld [vmem:[#allocation2 + $0x110] sm:$0xff]  ;;  %v533_v31 = vld [vmem:[#allocation2 + $0x118] sm:$0x3] }
  0x34   : > { %v606_v2 = vrot.slane %v604_v56, 1  ;;  %v611_v3 = vrot.slane %v609_v57, 1  ;;  %v890_v4 = vrot.slane %v4325_v58, 1  ;;  %v4350_v24 = vpack.c.bf16 %v506_v15, %v506_v15  ;;  %v4048_v36 = vld [vmem:[%s5227_s3 + $0x8] sm:$0xff]   ;;  %v3267_v15 = vld [vmem:[%s4240_s15 + $0x70] sm:$0xff]  }
  0x35   : > { %v4338_v9 = vsel %vm859_vm0, %v887_v60, %v888_v61  ;;  %v891_v10 = vrot.slane %v4330_v62, 1  ;;  %v614_v37 = vshrl.u32 %v4348_v22, 16  ;;  %v616_v38 = vshll.u32 %v4348_v22, 16  ;;  %v534_v40 = vld [vmem:[#allocation2 + $0x120] sm:$0xff] }
  0x36   : > { %v607_v19 = vor.u32 %v606_v2, %v602_v55  ;;  %3724 = vmatprep.mubr.bf16.mxu1 %v4338_v9  ;;  %v621_v39 = vshll.u32 %v4350_v24, 16  ;;  %v535_v43 = vld [vmem:[#allocation2 + $0x128] sm:$0xff]  ;;  %v4368_v44 = vpack.c.bf16 %v532_v29, %v531_v28  ;;  %v4370_v45 = vpack.c.bf16 %v533_v31, %v533_v31  ;;  %v536_v46 = vld [vmem:[#allocation2 + $0x130] sm:$0x3]  ;;  %v4052_v29 = vld [vmem:[%s5227_s3 + $0x18] sm:$0xff]  }
  0x37   : > { %v4353_v27 = vsel %vm859_vm0, %v890_v4, %v891_v10  ;;  %v4372_v47 = vpack.c.bf16 %v535_v43, %v534_v40  ;;  %v3125_v50 = vunpack.c.h.bf16 %v4333_v0  ;;  %v618_v51 = vrot.slane %v616_v38, 1  ;;  %v507_v55 = vld [vmem:[#allocation2 + $0x48] sm:$0xff]  ;;  %v4050_v2 = vld [vmem:[%s5227_s3 + $0x10] sm:$0xff]   ;;  %v4053_v40 = vld [vmem:[%s5227_s3 + $0x60] sm:$0xff]  }
  0x38   : > { %v4358_v35 = vsel %vm588_vm1, %v607_v19, %v611_v3  ;;  %3725 = vmatmul.mubr.bf16.vlgmr.msra.gmra.mrb[0].mxu1 %v4353_v27  ;;  %v623_v52 = vrot.slane %v621_v39, 1  ;;  %v4376_v53 = vpack.c.bf16 %v536_v46, %v536_v46  ;;  %v335_v56 = vmul.f32 %v3165_v32, %v4258_v25  ;;  %v508_v3 = vld [vmem:[#allocation2 + $0x50] sm:$0xff]  ;;  %v509_v4 = vld [vmem:[#allocation2 + $0x58] sm:$0x3] }
  0x39   : > { %1205 = vmatprep.mubr.bf16.mxu0 %v4358_v35  ;;  %3421 = vmatpush3.bf16.msra.mxu1 %v4046_v12  ;;  %v893_v57 = vrot.slane %v4368_v44, 1  ;;  %v894_v59 = vrot.slane %v4370_v45, 1  ;;  %v896_v60 = vrot.slane %v4372_v47, 1  ;;  %v373_v61 = vadd.f32 %v4266_v30, %v334_v33  ;;  %v4051_v19 = vld [vmem:[%s5227_s3 + $0x58] sm:$0xff]  }
  0x3a   : > { %1206 = vmatmul.mubr.bf16.vlgmr.msra.gmra.mrb[0].mxu0 %v4311_v41  ;;  %3422 = vmatprep.subr.bf16.mxu1 %v4047_v21  ;;  %v619_v63 = vor.u32 %v618_v51, %v614_v37  ;;  %v897_v0 = vrot.slane %v4376_v53, 1  ;;  %v314_v6 = vmul.f32 %v3124_v34, %v4258_v25  ;;  %v4397_v10 = vpack.c.bf16 %v508_v3, %v507_v55  ;;  %v537_v21 = vld [vmem:[#allocation2 + $0x138] sm:$0xff]  ;;  %v538_v34 = vld [vmem:[#allocation2 + $0x140] sm:$0xff] }
  0x3b   : > { %3693 = vmatpush3.bf16.msra.mxu0 %v4149_v1  ;;  %v374_v1 = vadd.f32 %v4266_v30, %v335_v56  ;;  %v4395_v7 = vsel %vm859_vm0, %v893_v57, %v894_v59  ;;  %v4399_v12 = vpack.c.bf16 %v509_v4, %v509_v4  ;;  %v405_v13 = vmax.f32 %v373_v61, 0.0  ;;  %v3257_v55 = vld [vmem:[%s4240_s15 + $0x20] sm:$0xff]   ;;  %v4439_v61 = vld [vmem:[%s4240_s15 + $0x28] sm:$0xff]  }
  0x3c   : > { %3694 = vmatprep.subr.bf16.mxu0 %v4162_v5  ;;  %v4403_v16 = vsel %vm588_vm1, %v619_v63, %v623_v52  ;;  %3728 = vmatprep.mubr.bf16.mxu1 %v4395_v7  ;;  %v4407_v18 = vsel %vm859_vm0, %v896_v60, %v897_v0  ;;  %v315_v28 = vmul.f32 %v3125_v50, %v4258_v25  ;;  %v626_v31 = vshrl.u32 %v4397_v10, 16  ;;  %v3268_v50 = vld [vmem:[%s4240_s15 + $0x78] sm:$0xff]   ;;  %v4054_v0 = vld [vmem:[%s5227_s3 + $0x20] sm:$0xff]  }
  0x3d   : > { %3423 = vmatpush3.bf16.msra.mxu1 %v4048_v36  ;;  %v406_v26 = vmax.f32 %v374_v1, 0.0  ;;  %1213 = vmatprep.mubr.bf16.mxu0 %v4403_v16  ;;  %v628_v32 = vshll.u32 %v4397_v10, 16  ;;  %v633_v33 = vshll.u32 %v4399_v12, 16  ;;  %v539_v36 = vld [vmem:[#allocation2 + $0x148] sm:$0x3]  ;;  %492 = vst [vmem:[#allocation2 + $0x151] sm:$0xff] %v405_v13  ;;  %v353_v37 = vadd.f32 %v4266_v30, %v314_v6 }
  0x3e   : > { %3424 = vmatprep.subr.bf16.mxu1 %v4049_v54  ;;  %v4423_v38 = vpack.c.bf16 %v538_v34, %v537_v21  ;;  %v4425_v39 = vpack.c.bf16 %v539_v36, %v539_v36  ;;  %v354_v43 = vadd.f32 %v4266_v30, %v315_v28  ;;  %v3168_v46 = vunpack.c.l.bf16 %v3267_v15  ;;  %v4055_v6 = vld [vmem:[%s5227_s3 + $0x68] sm:$0xff]   ;;  %v500_v28 = vld [vmem:[#allocation2 + $0x10] sm:$0x3] }
  0x3f   : > { %3695 = vmatpush3.bf16.msra.mxu0 %v4162_v5  ;;  %493 = vst [vmem:[#allocation2 + $0x159] sm:$0xff] %v406_v26  ;;  %v630_v5 = vrot.slane %v628_v32, 1  ;;  %v635_v51 = vrot.slane %v633_v33, 1  ;;  %v385_v52 = vmax.f32 %v353_v37, 0.0  ;;  %v3169_v54 = vunpack.c.h.bf16 %v3267_v15 }
  0x40   : > { %3729 = vmatmul.mubr.bf16.gmra.mrb[4].mxu1 %v4407_v18  ;;  %3696 = vmatprep.subr.bf16.mxu0 %v4174_v8  ;;  %v899_v56 = vrot.slane %v4423_v38, 1  ;;  %v900_v57 = vrot.slane %v4425_v39, 1  ;;  %v386_v59 = vmax.f32 %v354_v43, 0.0  ;;  %v336_v60 = vmul.f32 %v3168_v46, %v4258_v25 }
  0x41   : > { %3425 = vmatpush3.bf16.msra.mxu1 %v4050_v2  ;;  %v631_v63 = vor.u32 %v630_v5, %v626_v31  ;;  %472 = vst [vmem:[#allocation2 + $0x61] sm:$0xff] %v385_v52  ;;  %v337_v2 = vmul.f32 %v3169_v54, %v4258_v25  ;;  %v3172_v3 = vunpack.c.l.bf16 %v3268_v50  ;;  %v3173_v4 = vunpack.c.h.bf16 %v3268_v50  ;;  %v4056_v52 = vld [vmem:[%s5227_s3 + $0x28] sm:$0xff]  }
  0x42   : > { %1214 = vmatmul.mubr.bf16.gmra.mrb[4].mxu0 %v4348_v22  ;;  %3426 = vmatprep.subr.bf16.mxu1 %v4051_v19  ;;  %v4447_v1 = vsel %vm859_vm0, %v899_v56, %v900_v57  ;;  %473 = vst [vmem:[#allocation2 + $0x69] sm:$0xff] %v386_v59  ;;  %v375_v13 = vadd.f32 %v4266_v30, %v336_v60  ;;  %v3128_v15 = vunpack.c.l.bf16 %v3257_v55  ;;  %v3129_v19 = vunpack.c.h.bf16 %v3257_v55  ;;  %v3259_v60 = vld [vmem:[%s4240_s15 + $0x30] sm:$0xff]  }
  0x43   : > { %3697 = vmatpush3.bf16.msra.mxu0 %v4174_v8  ;;  %v4455_v21 = vsel %vm588_vm1, %v631_v63, %v635_v51  ;;  %3732 = vmatprep.mubr.bf16.mxu1 %v4447_v1  ;;  %v376_v8 = vadd.f32 %v4266_v30, %v337_v2  ;;  %v338_v26 = vmul.f32 %v3172_v3, %v4258_v25  ;;  %v3132_v31 = vunpack.c.l.bf16 %v4439_v61 }
  0x44   : > { %3698 = vmatprep.subr.bf16.mxu0 %v4187_v11  ;;  %1221 = vmatprep.mubr.bf16.mxu0 %v4455_v21  ;;  %v540_v32 = vld [vmem:[#allocation2 + $0x150] sm:$0xff]  ;;  %v407_v33 = vmax.f32 %v375_v13, 0.0  ;;  %v339_v34 = vmul.f32 %v3173_v4, %v4258_v25  ;;  %v317_v36 = vmul.f32 %v3129_v19, %v4258_v25  ;;  %v3133_v5 = vunpack.c.h.bf16 %v4439_v61 }
  0x45   : > { %3427 = vmatpush3.bf16.msra.mxu1 %v4052_v29  ;;  %v316_v29 = vmul.f32 %v3128_v15, %v4258_v25  ;;  %v408_v46 = vmax.f32 %v376_v8, 0.0  ;;  %v377_v50 = vadd.f32 %v4266_v30, %v338_v26  ;;  %v4479_v57 = vpack.c.bf16 %v500_v28, %v500_v28 }
  0x46   : > { %3428 = vmatprep.subr.bf16.mxu1 %v4053_v40  ;;  %v541_v37 = vld [vmem:[#allocation2 + $0x158] sm:$0xff]  ;;  %v542_v43 = vld [vmem:[#allocation2 + $0x160] sm:$0x3]  ;;  %494 = vst [vmem:[#allocation2 + $0x169] sm:$0xff] %v407_v33  ;;  %v378_v54 = vadd.f32 %v4266_v30, %v339_v34  ;;  %v318_v59 = vmul.f32 %v3132_v31, %v4258_v25  ;;  %v4103_v8 = vmov 0   ;;  %v319_v28 = vmul.f32 %v3133_v5, %v4258_v25 }
  0x47   : > { %3699 = vmatpush3.bf16.msra.mxu0 %v4187_v11  ;;  %v4468_v51 = vpack.c.bf16 %v541_v37, %v540_v32  ;;  %v4470_v40 = vpack.c.bf16 %v542_v43, %v542_v43  ;;  %v355_v55 = vadd.f32 %v4266_v30, %v316_v29  ;;  %495 = vst [vmem:[#allocation2 + $0x171] sm:$0xff] %v408_v46  ;;  %v409_v56 = vmax.f32 %v377_v50, 0.0  ;;  %v3260_v32 = vld [vmem:[%s4240_s15 + $0x38] sm:$0xff]   ;;  %v4058_v29 = vld [vmem:[%s5227_s3 + $0x30] sm:$0xff]  }
  0x48   : > { %3700 = vmatprep.subr.bf16.mxu0 %v4202_v14  ;;  %v356_v11 = vadd.f32 %v4266_v30, %v317_v36  ;;  %v510_v2 = vld [vmem:[#allocation2 + $0x60] sm:$0xff]  ;;  %v410_v3 = vmax.f32 %v378_v54, 0.0  ;;  %v4489_v26 = vrot.slane %v4103_v8, 1  ;;  %v357_v31 = vadd.f32 %v4266_v30, %v318_v59 }
  0x49   : > { %3429 = vmatpush3.bf16.msra.mxu1 %v4054_v0  ;;  %v902_v61 = vrot.slane %v4468_v51, 1  ;;  %v903_v63 = vrot.slane %v4470_v40, 1  ;;  %v4057_v0 = vld [vmem:[%s5227_s3 + $0x70] sm:$0xff]   ;;  %v387_v4 = vmax.f32 %v355_v55, 0.0  ;;  %v511_v13 = vld [vmem:[#allocation2 + $0x68] sm:$0xff]  ;;  %496 = vst [vmem:[#allocation2 + $0x181] sm:$0xff] %v409_v56  ;;  %v3136_v36 = vunpack.c.l.bf16 %v3259_v60 }
  0x4a   : > { %1222 = vmatmul.mubr.bf16.gmra.mrb[8].mxu0 %v4397_v10  ;;  %3430 = vmatprep.subr.bf16.mxu1 %v4055_v6  ;;  %v512_v15 = vld [vmem:[#allocation2 + $0x70] sm:$0x3]  ;;  %v388_v19 = vmax.f32 %v356_v11, 0.0  ;;  %v4498_v33 = vpack.c.bf16 %v511_v13, %v510_v2  ;;  %497 = vst [vmem:[#allocation2 + $0x189] sm:$0xff] %v410_v3  ;;  %v358_v37 = vadd.f32 %v4266_v30, %v319_v28  ;;  %v389_v43 = vmax.f32 %v357_v31, 0.0  ;;  %v4059_v55 = vld [vmem:[%s5227_s3 + $0x78] sm:$0xff]  }
  0x4b   : > { %3701 = vmatpush3.bf16.msra.mxu0 %v4202_v14  ;;  %v4496_v6 = vsel %vm859_vm0, %v902_v61, %v903_v63  ;;  %v4500_v34 = vpack.c.bf16 %v512_v15, %v512_v15  ;;  %474 = vst [vmem:[#allocation2 + $0x79] sm:$0xff] %v387_v4  ;;  %v597_v14 = vshll.u32 %v4479_v57, 16  ;;  %v3137_v46 = vunpack.c.h.bf16 %v3259_v60 }
  0x4c   : > { %3702 = vmatprep.subr.bf16.mxu0 %v4219_v17  ;;  %3733 = vmatmul.mubr.bf16.gmra.mrb[8].mxu1 %v4496_v6  ;;  %475 = vst [vmem:[#allocation2 + $0x81] sm:$0xff] %v388_v19  ;;  %v638_v50 = vshrl.u32 %v4498_v33, 16  ;;  %v640_v5 = vshll.u32 %v4498_v33, 16  ;;  %v320_v56 = vmul.f32 %v3136_v36, %v4258_v25  ;;  %v390_v59 = vmax.f32 %v358_v37, 0.0  ;;  %476 = vst [vmem:[#allocation2 + $0x91] sm:$0xff] %v389_v43  ;;  %v4532_v36 = vld [vmem:[%s5227_s3 + $0x80] sm:$0xff]  }
  0x4d   : > { %3431 = vmatpush3.bf16.msra.mxu1 %v4056_v52  ;;  %v645_v54 = vshll.u32 %v4500_v34, 16  ;;  %v543_v11 = vld [vmem:[#allocation2 + $0x168] sm:$0xff]  ;;  %v321_v61 = vmul.f32 %v3137_v46, %v4258_v25  ;;  %v3140_v60 = vunpack.c.l.bf16 %v3260_v32  ;;  %v3141_v52 = vunpack.c.h.bf16 %v3260_v32  ;;  %v4068_v46 = vld [vmem:[%s5227_s3 + $0x1c0] sm:$0xff]  }
  0x4e   : > { %3432 = vmatprep.subr.bf16.mxu1 %v4057_v0  ;;  %v642_v63 = vrot.slane %v640_v5, 1  ;;  %v544_v3 = vld [vmem:[#allocation2 + $0x170] sm:$0xff]  ;;  %v545_v4 = vld [vmem:[#allocation2 + $0x178] sm:$0x3]  ;;  %v359_v13 = vadd.f32 %v4266_v30, %v320_v56  ;;  %477 = vst [vmem:[#allocation2 + $0x99] sm:$0xff] %v390_v59  ;;  %v599_v32 = vrot.slane %v597_v14, 1 }
  0x4f   : > { %3703 = vmatpush3.bf16.msra.mxu0 %v4219_v17  ;;  %v647_v2 = vrot.slane %v645_v54, 1  ;;  %v4520_v15 = vpack.c.bf16 %v544_v3, %v543_v11  ;;  %v4522_v19 = vpack.c.bf16 %v545_v4, %v545_v4  ;;  %v4060_v0 = vld [vmem:[%s5227_s3 + $0x38] sm:$0xff]   ;;  %v360_v8 = vadd.f32 %v4266_v30, %v321_v61 }
  0x50   : > { %3704 = vmatprep.subr.bf16.mxu0 %v4233_v20  ;;  %v322_v17 = vmul.f32 %v3140_v60, %v4258_v25  ;;  %v643_v28 = vor.u32 %v642_v63, %v638_v50  ;;  %v546_v31 = vld [vmem:[#allocation2 + $0x180] sm:$0xff]  ;;  %v391_v37 = vmax.f32 %v359_v13, 0.0  ;;  %v323_v43 = vmul.f32 %v3141_v52, %v4258_v25 }
  0x51   : > { %3433 = vmatpush3.bf16.msra.mxu1 %v4058_v29  ;;  %v905_v5 = vrot.slane %v4520_v15, 1  ;;  %v906_v54 = vrot.slane %v4522_v19, 1  ;;  %v547_v50 = vld [vmem:[#allocation2 + $0x188] sm:$0xff]  ;;  %v548_v56 = vld [vmem:[#allocation2 + $0x190] sm:$0x3]  ;;  %v392_v52 = vmax.f32 %v360_v8, 0.0  ;;  %v600_v13 = vsel %vm588_vm1, %v4489_v26, %v599_v32 }
  0x52   : > { %3434 = vmatprep.subr.bf16.mxu1 %v4059_v55  ;;  %v513_v29 = vld [vmem:[#allocation2 + $0x78] sm:$0xff]  ;;  %v361_v14 = vadd.f32 %v4266_v30, %v322_v17  ;;  %v4543_v11 = vsel %vm588_vm1, %v643_v28, %v647_v2  ;;  %v4545_v25 = vpack.c.bf16 %v547_v50, %v546_v31  ;;  %v4547_v59 = vpack.c.bf16 %v548_v56, %v548_v56 }
  0x53   : > { %3705 = vmatpush3.bf16.msra.mxu0 %v4233_v20  ;;  %v514_v61 = vld [vmem:[#allocation2 + $0x80] sm:$0xff]  ;;  %v515_v60 = vld [vmem:[#allocation2 + $0x88] sm:$0x3]  ;;  %478 = vst [vmem:[#allocation2 + $0xa9] sm:$0xff] %v391_v37  ;;  %1229 = vmatprep.mubr.bf16.mxu0 %v4543_v11  ;;  %v4552_v55 = vsel %vm859_vm0, %v905_v5, %v906_v54  ;;  %v362_v2 = vadd.f32 %v4266_v30, %v323_v43  ;;  %v516_v8 = vld [vmem:[#allocation2 + $0x90] sm:$0xff] }
  0x54   : > { %3706 = vmatprep.subr.bf16.mxu0 %v4252_v23  ;;  %v4554_v63 = vpack.c.bf16 %v514_v61, %v513_v29  ;;  %v4556_v20 = vpack.c.bf16 %v515_v60, %v515_v60  ;;  %3736 = vmatprep.mubr.bf16.mxu1 %v4552_v55  ;;  %v908_v3 = vrot.slane %v4545_v25, 1  ;;  %v909_v4 = vrot.slane %v4547_v59, 1  ;;  %479 = vst [vmem:[#allocation2 + $0xb1] sm:$0xff] %v392_v52 }
  0x55   : > { %1230 = vmatmul.mubr.bf16.gmra.mrb[12].mxu0 %v4498_v33  ;;  %v393_v17 = vmax.f32 %v361_v14, 0.0  ;;  %3435 = vmatpush3.bf16.msra.mxu1 %v4060_v0  ;;  %v394_v37 = vmax.f32 %v362_v2, 0.0  ;;  %v517_v5 = vld [vmem:[#allocation2 + $0x98] sm:$0xff]  ;;  %v518_v26 = vld [vmem:[#allocation2 + $0xa0] sm:$0x3] }
  0x56   : > { %v650_v28 = vshrl.u32 %v4554_v63, 16  ;;  %v652_v31 = vshll.u32 %v4554_v63, 16  ;;  %v657_v30 = vshll.u32 %v4556_v20, 16  ;;  %v4570_v43 = vsel %vm859_vm0, %v908_v3, %v909_v4  ;;  %3740 = vmatprep.subr.bf16.mxu1 %v4532_v36 }
  0x57   : > { %3707 = vmatpush3.bf16.msra.mxu0 %v4252_v23  ;;  %480 = vst [vmem:[#allocation2 + $0xc1] sm:$0xff] %v393_v17  ;;  %3737 = vmatmul.mubr.bf16.gmra.mrb[12].mxu1 %v4570_v43  ;;  %v4574_v54 = vpack.c.bf16 %v517_v5, %v516_v8  ;;  %v4576_v50 = vpack.c.bf16 %v518_v26, %v518_v26  ;;  %481 = vst [vmem:[#allocation2 + $0xc9] sm:$0xff] %v394_v37  ;;  %v4062_v17 = vld [vmem:[%s5227_s3 + $0x88] sm:$0xff]  }
  0x58   : > { %3556 = vmatprep.subr.bf16.mxu0 %v4068_v46  ;;  %v654_v0 = vrot.slane %v652_v31, 1  ;;  %v659_v32 = vrot.slane %v657_v30, 1  ;;  %1671 = vmatprep.mubr.bf16.mxu1 %v600_v13 }
  0x59   : > { %v662_v56 = vshrl.u32 %v4574_v54, 16  ;;  %v664_v29 = vshll.u32 %v4574_v54, 16  ;;  %v669_v14 = vshll.u32 %v4576_v50, 16 }
  0x5a   : > { %v655_v23 = vor.u32 %v654_v0, %v650_v28  ;;  %v519_v61 = vld [vmem:[#allocation2 + $0xa8] sm:$0xff]  ;;  %v4104_v0 = vmov 0.0|0.0  }
  0x5b   : > { %v666_v60 = vrot.slane %v664_v29, 1  ;;  %v671_v52 = vrot.slane %v669_v14, 1  ;;  %v520_v2 = vld [vmem:[#allocation2 + $0xb0] sm:$0xff]  ;;  %v521_v3 = vld [vmem:[#allocation2 + $0xb8] sm:$0x3] }
  0x5c   : > { %v4582_v46 = vsel %vm588_vm1, %v655_v23, %v659_v32  ;;  %v4585_v4 = vpack.c.bf16 %v520_v2, %v519_v61  ;;  %v4587_v13 = vpack.c.bf16 %v521_v3, %v521_v3 }
  0x5d   : > { %1237 = vmatprep.mubr.bf16.mxu0 %v4582_v46  ;;  %v667_v8 = vor.u32 %v666_v60, %v662_v56  ;;  %v4063_v60 = vld [vmem:[%s5227_s3 + $0x90] sm:$0xff]  }
  0x5e   : > { %1238 = vmatmul.mubr.bf16.gmra.mrb[16].mxu0 %v4554_v63  ;;  %v522_v28 = vld [vmem:[#allocation2 + $0xc0] sm:$0xff]  ;;  %v674_v31 = vshrl.u32 %v4585_v4, 16  ;;  %v676_v30 = vshll.u32 %v4585_v4, 16  ;;  %v681_v37 = vshll.u32 %v4587_v13, 16  ;;  %v523_v5 = vld [vmem:[#allocation2 + $0xc8] sm:$0xff] }
  0x5f   : > { %v524_v26 = vld [vmem:[#allocation2 + $0xd0] sm:$0x3]  ;;  %1672 = vmatmul.mubr.bf16.vlgmr.msra.gmra.mrb[16].mxu1 %v4104_v0  ;;  %v4598_v32 = vsel %vm588_vm1, %v667_v8, %v671_v52  ;;  %v4600_v23 = vpack.c.bf16 %v523_v5, %v522_v28  ;;  %v864_v5 = vrot.slane %v4313_v42, 1 }
  0x60   : > { %v4602_v56 = vpack.c.bf16 %v524_v26, %v524_v26  ;;  %3741 = vmatpush3.bf16.msra.mxu1 %v4532_v36  ;;  %1245 = vmatprep.mubr.bf16.mxu0 %v4598_v32  ;;  %v678_v29 = vrot.slane %v676_v30, 1  ;;  %v683_v14 = vrot.slane %v681_v37, 1  ;;  %v700_v30 = vshll.u32 %v4317_v48, 16 }
  0x61   : > { %1679 = vmatprep.mubr.bf16.mxu1 %v4358_v35  ;;  %3742 = vmatprep.subr.bf16.mxu1 %v4062_v17  ;;  %v688_v61 = vshll.u32 %v4600_v23, 16  ;;  %v686_v2 = vshrl.u32 %v4600_v23, 16  ;;  %v4064_v35 = vld [vmem:[%s5227_s3 + $0x98] sm:$0xff]   ;;  %v863_v37 = vrot.slane %v4311_v41, 1  ;;  %v698_v26 = vshrl.u32 %v4317_v48, 16 }
  0x62   : > { %v679_v52 = vor.u32 %v678_v29, %v674_v31  ;;  %v693_v8 = vshll.u32 %v4602_v56, 16 }
  0x63   : > { %v690_v3 = vrot.slane %v688_v61, 1  ;;  %v705_v61 = vshll.u32 %v4319_v49, 16  ;;  %v4067_v49 = vld [vmem:[%s5227_s3 + $0xb0] sm:$0xff]  }
  0x64   : > { %v4614_v36 = vsel %vm588_vm1, %v679_v52, %v683_v14  ;;  %3743 = vmatpush3.bf16.msra.mxu1 %v4062_v17  ;;  %v695_v31 = vrot.slane %v693_v8, 1  ;;  %v4065_v17 = vld [vmem:[%s5227_s3 + $0xa0] sm:$0xff]   ;;  %v702_v14 = vrot.slane %v700_v30, 1  ;;  %v4635_v52 = vsel %vm859_vm0, %v863_v37, %v864_v5 }
  0x65   : > { %3744 = vmatprep.subr.bf16.mxu1 %v4063_v60  ;;  %v691_v28 = vor.u32 %v690_v3, %v686_v2  ;;  %v712_v2 = vshll.u32 %v4325_v58, 16  ;;  %v710_v8 = vshrl.u32 %v4325_v58, 16  ;;  %v724_v37 = vshll.u32 %v4368_v44, 16 }
  0x66   : > { %1246 = vmatmul.mubr.bf16.gmra.mrb[20].mxu0 %v4574_v54  ;;  %v703_v42 = vor.u32 %v702_v14, %v698_v26  ;;  %v722_v26 = vshrl.u32 %v4368_v44, 16 }
  0x67   : > { %1253 = vmatprep.mubr.bf16.mxu0 %v4614_v36  ;;  %1680 = vmatmul.mubr.bf16.gmra.mrb[20].mxu1 %v4311_v41  ;;  %v4631_v29 = vsel %vm588_vm1, %v691_v28, %v695_v31  ;;  %v4066_v41 = vld [vmem:[%s5227_s3 + $0xa8] sm:$0xff]   ;;  %v717_v28 = vshll.u32 %v4330_v62, 16  ;;  %v4076_v31 = vld [vmem:[%s5227_s3 + $0xb8] sm:$0xff]   ;;  %v4664_v62 = vld [vmem:[%s5227_s3 + $0x200] sm:$0xff]   ;;  %v726_v14 = vrot.slane %v724_v37, 1 }
  0x68   : > { %1687 = vmatprep.mubr.bf16.mxu1 %v4403_v16  ;;  %3745 = vmatpush3.bf16.msra.mxu1 %v4063_v60  ;;  %v707_v60 = vrot.slane %v705_v61, 1  ;;  %v729_v61 = vshll.u32 %v4370_v45, 16  ;;  %v734_v45 = vshrl.u32 %v4372_v47, 16 }
  0x69   : > { %3746 = vmatprep.subr.bf16.mxu1 %v4064_v35 }
  0x6a   : > { %v4649_v3 = vsel %vm588_vm1, %v703_v42, %v707_v60  ;;  %v731_v42 = vrot.slane %v729_v61, 1  ;;  %v736_v60 = vshll.u32 %v4372_v47, 16  ;;  %v760_v61 = vshll.u32 %v4468_v51, 16 }
  0x6c   : > { %3747 = vmatpush3.bf16.msra.mxu1 %v4064_v35  ;;  %v714_v35 = vrot.slane %v712_v2, 1 }
  0x6d   : > { %3748 = vmatprep.subr.bf16.mxu1 %v4065_v17 }
  0x6e   : > { %1254 = vmatmul.mubr.bf16.gmra.mrb[24].mxu0 %v4585_v4  ;;  %v715_v30 = vor.u32 %v714_v35, %v710_v8  ;;  %v741_v8 = vshll.u32 %v4376_v53, 16  ;;  %v753_v53 = vshll.u32 %v4425_v39, 16  ;;  %v765_v39 = vshll.u32 %v4470_v40, 16 }
  0x6f   : > { %1261 = vmatprep.mubr.bf16.mxu0 %v4631_v29  ;;  %1688 = vmatmul.mubr.bf16.gmra.mrb[24].mxu1 %v4348_v22  ;;  %v777_v40 = vshll.u32 %v4522_v19, 16  ;;  %v789_v19 = vshll.u32 %v4547_v59, 16  ;;  %v866_v59 = vrot.slane %v4348_v22, 1 }
  0x70   : > { %1695 = vmatprep.mubr.bf16.mxu1 %v4455_v21  ;;  %3749 = vmatpush3.bf16.msra.mxu1 %v4065_v17  ;;  %v719_v17 = vrot.slane %v717_v28, 1  ;;  %v743_v28 = vrot.slane %v741_v8, 1  ;;  %v772_v8 = vshll.u32 %v4520_v15, 16 }
  0x71   : > { %3750 = vmatprep.subr.bf16.mxu1 %v4066_v41 }
  0x72   : > { %v4667_v5 = vsel %vm588_vm1, %v715_v30, %v719_v17  ;;  %v746_v17 = vshrl.u32 %v4423_v38, 16 }
  0x74   : > { %3751 = vmatpush3.bf16.msra.mxu1 %v4066_v41  ;;  %v727_v41 = vor.u32 %v726_v14, %v722_v26  ;;  %v755_v14 = vrot.slane %v753_v53, 1  ;;  %v784_v53 = vshll.u32 %v4545_v25, 16 }
  0x75   : > { %3752 = vmatprep.subr.bf16.mxu1 %v4067_v49 }
  0x76   : > { %1262 = vmatmul.mubr.bf16.gmra.mrb[28].mxu0 %v4600_v23  ;;  %v4678_v2 = vsel %vm588_vm1, %v727_v41, %v731_v42  ;;  %v758_v42 = vshrl.u32 %v4468_v51, 16 }
  0x77   : > { %1269 = vmatprep.mubr.bf16.mxu0 %v4649_v3  ;;  %1696 = vmatmul.mubr.bf16.gmra.mrb[28].mxu1 %v4397_v10 }
  0x78   : > { %1703 = vmatprep.mubr.bf16.mxu1 %v4543_v11  ;;  %3753 = vmatpush3.bf16.msra.mxu1 %v4067_v49  ;;  %v738_v49 = vrot.slane %v736_v60, 1  ;;  %v762_v60 = vrot.slane %v760_v61, 1  ;;  %v786_v61 = vrot.slane %v784_v53, 1  ;;  %v4072_v53 = vld [vmem:[%s5227_s3 + $0x1d0] sm:$0xff]  }
  0x79   : > { %3754 = vmatprep.subr.bf16.mxu1 %v4076_v31 }
  0x7a   : > { %v739_v35 = vor.u32 %v738_v49, %v734_v45  ;;  %v763_v45 = vor.u32 %v762_v60, %v758_v42  ;;  %v767_v49 = vrot.slane %v765_v39, 1  ;;  %v791_v60 = vrot.slane %v789_v19, 1 }
  0x7c   : > { %3755 = vmatpush3.bf16.msra.mxu1 %v4076_v31  ;;  %v748_v31 = vshll.u32 %v4423_v38, 16  ;;  %v4688_v30 = vsel %vm588_vm1, %v739_v35, %v743_v28  ;;  %v4708_v35 = vsel %vm588_vm1, %v763_v45, %v767_v49  ;;  %v770_v28 = vshrl.u32 %v4520_v15, 16 }
  0x7d   : > { %3788 = vmatprep.subr.bf16.mxu1 %v4664_v62  ;;  %v867_v45 = vrot.slane %v4350_v24, 1  ;;  %v869_v49 = vrot.slane %v4397_v10, 1 }
  0x7e   : > { %1270 = vmatmul.mubr.bf16.gmra.mrb[32].mxu0 %v4317_v48  ;;  %v750_v37 = vrot.slane %v748_v31, 1  ;;  %v774_v31 = vrot.slane %v772_v8, 1  ;;  %v870_v8 = vrot.slane %v4399_v12, 1  ;;  %v4071_v12 = vld [vmem:[%s5227_s3 + $0x188] sm:$0xff]  }
  0x7f   : > { %1277 = vmatprep.mubr.bf16.mxu0 %v4667_v5  ;;  %1704 = vmatmul.mubr.bf16.gmra.mrb[32].mxu1 %v4498_v33 }
  0x80   : > { %1711 = vmatprep.mubr.bf16.mxu1 %v4582_v46  ;;  %v751_v26 = vor.u32 %v750_v37, %v746_v17  ;;  %v775_v17 = vor.u32 %v774_v31, %v770_v28  ;;  %v779_v37 = vrot.slane %v777_v40, 1  ;;  %v4742_v28 = vsel %vm859_vm0, %v866_v59, %v867_v45  ;;  %v4069_v31 = vld [vmem:[%s5227_s3 + $0x180] sm:$0xff]   ;;  %v4070_v40 = vld [vmem:[%s5227_s3 + $0x1c8] sm:$0xff]  }
  0x81   : > { %v4751_v24 = vsel %vm859_vm0, %v869_v49, %v870_v8  ;;  %v878_v59 = vrot.slane %v4574_v54, 1  ;;  %v879_v45 = vrot.slane %v4576_v50, 1  ;;  %v4077_v49 = vld [vmem:[%s5227_s3 + $0x1e0] sm:$0xff]   ;;  %v881_v8 = vrot.slane %v4585_v4, 1 }
  0x82   : > { %v4698_v41 = vsel %vm588_vm1, %v751_v26, %v755_v14  ;;  %v4718_v26 = vsel %vm588_vm1, %v775_v17, %v779_v37  ;;  %v782_v14 = vshrl.u32 %v4545_v25, 16  ;;  %v872_v17 = vrot.slane %v4498_v33, 1  ;;  %v4078_v50 = vld [vmem:[%s5227_s3 + $0x1a0] sm:$0xff]  }
  0x83   : > { %v873_v37 = vrot.slane %v4500_v34, 1  ;;  %v4073_v34 = vld [vmem:[%s5227_s3 + $0x190] sm:$0xff]  }
  0x84   : > { %v787_v42 = vor.u32 %v786_v61, %v782_v14  ;;  %v875_v14 = vrot.slane %v4554_v63, 1  ;;  %v876_v61 = vrot.slane %v4556_v20, 1  ;;  %v4075_v20 = vld [vmem:[%s5227_s3 + $0x198] sm:$0xff]  }
  0x85   : > { %v4768_v19 = vsel %vm859_vm0, %v872_v17, %v873_v37  ;;  %v884_v37 = vrot.slane %v4600_v23, 1 }
  0x86   : > { %1278 = vmatmul.mubr.bf16.gmra.mrb[36].mxu0 %v4325_v58  ;;  %v4727_v39 = vsel %vm588_vm1, %v787_v42, %v791_v60  ;;  %v4074_v42 = vld [vmem:[%s5227_s3 + $0x1d8] sm:$0xff]   ;;  %v4777_v60 = vsel %vm859_vm0, %v875_v14, %v876_v61  ;;  %v4081_v14 = vld [vmem:[%s5227_s3 + $0x1f0] sm:$0xff]   ;;  %v860_v61 = vrot.slane %v4104_v0, 1  ;;  %v4086_v0 = vld [vmem:[%s5227_s3 + $0x208] sm:$0xff]  }
  0x87   : > { %1285 = vmatprep.mubr.bf16.mxu0 %v4678_v2  ;;  %1712 = vmatmul.mubr.bf16.gmra.mrb[36].mxu1 %v4554_v63 }
  0x88   : > { %1719 = vmatprep.mubr.bf16.mxu1 %v4598_v32 }
  0x8e   : > { %1286 = vmatmul.mubr.bf16.gmra.mrb[40].mxu0 %v4368_v44 }
  0x8f   : > { %1293 = vmatprep.mubr.bf16.mxu0 %v4688_v30  ;;  %1720 = vmatmul.mubr.bf16.gmra.mrb[40].mxu1 %v4574_v54 }
  0x90   : > { %1727 = vmatprep.mubr.bf16.mxu1 %v4614_v36 }
  0x96   : > { %1294 = vmatmul.mubr.bf16.gmra.mrb[44].mxu0 %v4372_v47 }
  0x97   : > { %1301 = vmatprep.mubr.bf16.mxu0 %v4698_v41  ;;  %1728 = vmatmul.mubr.bf16.gmra.mrb[44].mxu1 %v4585_v4 }
  0x98   : > { %1735 = vmatprep.mubr.bf16.mxu1 %v4631_v29 }
  0x9e   : > { %1302 = vmatmul.mubr.bf16.gmra.mrb[48].mxu0 %v4423_v38 }
  0x9f   : > { %1309 = vmatprep.mubr.bf16.mxu0 %v4708_v35  ;;  %1736 = vmatmul.mubr.bf16.gmra.mrb[48].mxu1 %v4600_v23 }
  0xa0   : > { %1743 = vmatprep.mubr.bf16.mxu1 %v4649_v3 }
  0xa6   : > { %1310 = vmatmul.mubr.bf16.gmra.mrb[52].mxu0 %v4468_v51 }
  0xa7   : > { %1317 = vmatprep.mubr.bf16.mxu0 %v4718_v26  ;;  %1744 = vmatmul.mubr.bf16.gmra.mrb[52].mxu1 %v4317_v48 }
  0xa8   : > { %1751 = vmatprep.mubr.bf16.mxu1 %v4667_v5 }
  0xae   : > { %1318 = vmatmul.mubr.bf16.gmra.mrb[56].mxu0 %v4520_v15 }
  0xaf   : > { %1325 = vmatprep.mubr.bf16.mxu0 %v4727_v39  ;;  %1752 = vmatmul.mubr.bf16.gmra.mrb[56].mxu1 %v4325_v58 }
  0xb0   : > { %1759 = vmatprep.mubr.bf16.mxu1 %v4678_v2 }
  0xb6   : > { %1326 = vmatmul.mubr.bf16.gmra.mrb[60].mxu0 %v4545_v25 }
  0xb7   : > { %3708 = vmatprep.mubr.bf16.mxu0 %v4635_v52  ;;  %1760 = vmatmul.mubr.bf16.gmra.mrb[60].mxu1 %v4368_v44 }
  0xb8   : > { %1767 = vmatprep.mubr.bf16.mxu1 %v4688_v30 }
  0xbe   : > { %3709 = vmatmul.mubr.bf16.vlgmr.msra.gmra.mrb[64].mxu0 %v4742_v28 }
  0xbf   : > { %3557 = vmatpush3.bf16.msra.mxu0 %v4069_v31  ;;  %3712 = vmatprep.mubr.bf16.mxu0 %v4751_v24  ;;  %v882_v31 = vrot.slane %v4587_v13, 1  ;;  %v4080_v13 = vld [vmem:[%s5227_s3 + $0x1a8] sm:$0xff]  }
  0xc0   : > { %1768 = vmatmul.mubr.bf16.gmra.mrb[64].mxu1 %v4372_v47  ;;  %3558 = vmatprep.subr.bf16.mxu0 %v4070_v40  ;;  %v4794_v40 = vsel %vm859_vm0, %v878_v59, %v879_v45 }
  0xc1   : > { %1775 = vmatprep.mubr.bf16.mxu1 %v4698_v41  ;;  %v4803_v17 = vsel %vm859_vm0, %v881_v8, %v882_v31 }
  0xc3   : > { %3559 = vmatpush3.bf16.msra.mxu0 %v4071_v12  ;;  %v4079_v12 = vld [vmem:[%s5227_s3 + $0x1e8] sm:$0xff]  }
  0xc4   : > { %3560 = vmatprep.subr.bf16.mxu0 %v4072_v53  ;;  %v885_v53 = vrot.slane %v4602_v56, 1  ;;  %v4082_v56 = vld [vmem:[%s5227_s3 + $0x1b0] sm:$0xff]  }
  0xc6   : > { %3713 = vmatmul.mubr.bf16.gmra.mrb[68].mxu0 %v4768_v19 }
  0xc7   : > { %3561 = vmatpush3.bf16.msra.mxu0 %v4073_v34  ;;  %3716 = vmatprep.mubr.bf16.mxu0 %v4777_v60  ;;  %v861_v34 = vrot.slane %v4479_v57, 1  ;;  %v4084_v57 = vld [vmem:[%s5227_s3 + $0x1b8] sm:$0xff]  }
  0xc8   : > { %1776 = vmatmul.mubr.bf16.gmra.mrb[68].mxu1 %v4423_v38  ;;  %3562 = vmatprep.subr.bf16.mxu0 %v4074_v42  ;;  %v4820_v42 = vsel %vm859_vm0, %v884_v37, %v885_v53 }
  0xc9   : > { %1783 = vmatprep.mubr.bf16.mxu1 %v4708_v35  ;;  %v862_v59 = vsel %vm859_vm0, %v860_v61, %v861_v34 }
  0xcb   : > { %3563 = vmatpush3.bf16.msra.mxu0 %v4075_v20  ;;  %v4083_v20 = vld [vmem:[%s5227_s3 + $0x1f8] sm:$0xff]  }
  0xcc   : > { %3564 = vmatprep.subr.bf16.mxu0 %v4077_v49 }
  0xce   : > { %3717 = vmatmul.mubr.bf16.gmra.mrb[72].mxu0 %v4794_v40 }
  0xcf   : > { %3565 = vmatpush3.bf16.msra.mxu0 %v4078_v50  ;;  %3720 = vmatprep.mubr.bf16.mxu0 %v4803_v17 }
  0xd0   : > { %1784 = vmatmul.mubr.bf16.gmra.mrb[72].mxu1 %v4468_v51  ;;  %3566 = vmatprep.subr.bf16.mxu0 %v4079_v12 }
  0xd1   : > { %1791 = vmatprep.mubr.bf16.mxu1 %v4718_v26 }
  0xd3   : > { %3567 = vmatpush3.bf16.msra.mxu0 %v4080_v13 }
  0xd4   : > { %3568 = vmatprep.subr.bf16.mxu0 %v4081_v14 }
  0xd6   : > { %3721 = vmatmul.mubr.bf16.gmra.mrb[76].mxu0 %v4820_v42 }
  0xd7   : > { %3569 = vmatpush3.bf16.msra.mxu0 %v4082_v56  ;;  %2186 = vmatprep.mubr.bf16.mxu0 %v4403_v16  ;;  %v4087_v16 = vld [vmem:[%s5227_s3 + $0x210] sm:$0xff]  }
  0xd8   : > { %1792 = vmatmul.mubr.bf16.gmra.mrb[76].mxu1 %v4520_v15  ;;  %3570 = vmatprep.subr.bf16.mxu0 %v4083_v20 }
  0xd9   : > { %3756 = vmatprep.mubr.bf16.mxu1 %v862_v59 }
  0xdb   : > { %3571 = vmatpush3.bf16.msra.mxu0 %v4084_v57 }
  0xde   : > { %2187 = vmatmul.mubr.bf16.vlgmr.msra.gmra.mrb[80].mxu0 %v4348_v22  ;;  %v4088_v22 = vld [vmem:[%s5227_s3 + $0x218] sm:$0xff]  }
  0xdf   : > { %2194 = vmatprep.mubr.bf16.mxu0 %v4455_v21  ;;  %v4089_v21 = vld [vmem:[%s5227_s3 + $0x220] sm:$0xff]  }
  0xe0   : > { %3757 = vmatmul.mubr.bf16.vlgmr.msra.gmra.mrb[80].mxu1 %v4635_v52 }
  0xe1   : > { %3789 = vmatpush3.bf16.msra.mxu1 %v4664_v62  ;;  %3760 = vmatprep.mubr.bf16.mxu1 %v4742_v28 }
  0xe2   : > { %3790 = vmatprep.subr.bf16.mxu1 %v4086_v0 }
  0xe5   : > { %3791 = vmatpush3.bf16.msra.mxu1 %v4086_v0 }
  0xe6   : > { %2195 = vmatmul.mubr.bf16.gmra.mrb[84].mxu0 %v4397_v10  ;;  %3792 = vmatprep.subr.bf16.mxu1 %v4087_v16  ;;  %v4090_v10 = vld [vmem:[%s5227_s3 + $0x228] sm:$0xff]  }
  0xe7   : > { %2202 = vmatprep.mubr.bf16.mxu0 %v4543_v11  ;;  %v4091_v11 = vld [vmem:[%s5227_s3 + $0x230] sm:$0xff]  }
  0xe8   : > { %3761 = vmatmul.mubr.bf16.gmra.mrb[84].mxu1 %v4751_v24 }
  0xe9   : > { %3764 = vmatprep.mubr.bf16.mxu1 %v4768_v19  ;;  %3793 = vmatpush3.bf16.msra.mxu1 %v4087_v16  ;;  %v4093_v16 = vld [vmem:[#allocation2] sm:$0xff] }
  0xea   : > { %3794 = vmatprep.subr.bf16.mxu1 %v4088_v22 }
  0xed   : > { %3795 = vmatpush3.bf16.msra.mxu1 %v4088_v22  ;;  %v4931_v22 = vpack.c.bf16 %v4093_v16, %v4093_v16 }
  0xee   : > { %2203 = vmatmul.mubr.bf16.gmra.mrb[88].mxu0 %v4498_v33  ;;  %3796 = vmatprep.subr.bf16.mxu1 %v4089_v21  ;;  %v4092_v33 = vld [vmem:[%s5227_s3 + $0x238] sm:$0xff]  }
  0xef   : > { %2210 = vmatprep.mubr.bf16.mxu0 %v4582_v46 }
  0xf0   : > { %3765 = vmatmul.mubr.bf16.gmra.mrb[88].mxu1 %v4777_v60 }
  0xf1   : > { %3768 = vmatprep.mubr.bf16.mxu1 %v4794_v40  ;;  %3797 = vmatpush3.bf16.msra.mxu1 %v4089_v21 }
  0xf2   : > { %3798 = vmatprep.subr.bf16.mxu1 %v4090_v10 }
  0xf5   : > { %3799 = vmatpush3.bf16.msra.mxu1 %v4090_v10 }
  0xf6   : > { %2211 = vmatmul.mubr.bf16.gmra.mrb[92].mxu0 %v4554_v63  ;;  %3800 = vmatprep.subr.bf16.mxu1 %v4091_v11 }
  0xf7   : > { %2218 = vmatprep.mubr.bf16.mxu0 %v4598_v32 }
  0xf8   : > { %3769 = vmatmul.mubr.bf16.gmra.mrb[92].mxu1 %v4803_v17 }
  0xf9   : > { %3772 = vmatprep.mubr.bf16.mxu1 %v4820_v42  ;;  %3801 = vmatpush3.bf16.msra.mxu1 %v4091_v11 }
  0xfa   : > { %3802 = vmatprep.subr.bf16.mxu1 %v4092_v33 }
  0xfd   : > { %3803 = vmatpush3.bf16.msra.mxu1 %v4092_v33  ;;  %v796_v33 = vshll.u32 %v4931_v22, 16 }
  0xfe   : > { %2219 = vmatmul.mubr.bf16.gmra.mrb[96].mxu0 %v4574_v54 }
  0xff   : > { %2226 = vmatprep.mubr.bf16.mxu0 %v4614_v36 }
 0x100   : > { %3773 = vmatmul.mubr.bf16.gmra.mrb[0].mxu1 %v4338_v9 }
 0x101   : > { %3776 = vmatprep.mubr.bf16.mxu1 %v4353_v27 }
 0x106   : > { %2227 = vmatmul.mubr.bf16.gmra.mrb[100].mxu0 %v4585_v4 }
 0x107   : > { %2234 = vmatprep.mubr.bf16.mxu0 %v4631_v29 }
 0x108   : > { %3777 = vmatmul.mubr.bf16.gmra.mrb[4].mxu1 %v4395_v7 }
 0x109   : > { %3780 = vmatprep.mubr.bf16.mxu1 %v4407_v18 }
 0x10d   : > { %v3300_v63 = vpop.f32.mrb[0].mxu0 }
 0x10e   : > { %v3301_v46 = vpop.f32.mrb[1].mxu0  ;;  %2235 = vmatmul.mubr.bf16.gmra.mrb[104].mxu0 %v4600_v23 }
 0x10f   : > { %v4882_v32 = vadd.f32 %v3301_v46, %v3300_v63  ;;  %v3303_v54 = vpop.f32.mrb[2].mxu0  ;;  %2242 = vmatprep.mubr.bf16.mxu0 %v4649_v3 }
 0x110   : > { %v3304_v36 = vpop.f32.mrb[3].mxu0  ;;  %3781 = vmatmul.mubr.bf16.gmra.mrb[8].mxu1 %v4447_v1 }
 0x111   : > { %v4886_v52 = vadd.f32 %v3304_v36, %v3303_v54  ;;  %3784 = vmatprep.mubr.bf16.mxu1 %v4496_v6 }
 0x115   : > { %v3306_v4 = vpop.f32.mrb[4].mxu0 }
 0x116   : > { %v3307_v29 = vpop.f32.mrb[5].mxu0  ;;  %2243 = vmatmul.mubr.bf16.gmra.mrb[108].mxu0 %v4317_v48 }
 0x117   : > { %v4890_v62 = vadd.f32 %v3307_v29, %v3306_v4  ;;  %v3309_v45 = vpop.f32.mrb[6].mxu0  ;;  %2250 = vmatprep.mubr.bf16.mxu0 %v4667_v5 }
 0x118   : > { %v3310_v23 = vpop.f32.mrb[7].mxu0  ;;  %3785 = vmatmul.mubr.bf16.gmra.mrb[12].mxu1 %v4552_v55 }
 0x119   : > { %v4894_v49 = vadd.f32 %v3310_v23, %v3309_v45  ;;  %3804 = vmatprep.mubr.bf16.mxu1 %v4742_v28  ;;  %v798_v23 = vrot.slane %v796_v33, 1 }
 0x11d   : > { %v3312_v3 = vpop.f32.mrb[8].mxu0 }
 0x11e   : > { %v3313_v8 = vpop.f32.mrb[9].mxu0  ;;  %2251 = vmatmul.mubr.bf16.gmra.mrb[112].mxu0 %v4325_v58 }
 0x11f   : > { %v4898_v31 = vadd.f32 %v3313_v8, %v3312_v3  ;;  %v3315_v50 = vpop.f32.mrb[10].mxu0  ;;  %2258 = vmatprep.mubr.bf16.mxu0 %v4678_v2 }
 0x120   : > { %v3316_v48 = vpop.f32.mrb[11].mxu0  ;;  %3805 = vmatmul.mubr.bf16.vlgmr.msra.gmra.mrb[80].mxu1 %v4751_v24 }
 0x121   : > { %v4902_v12 = vadd.f32 %v3316_v48, %v3315_v50  ;;  %3808 = vmatprep.mubr.bf16.mxu1 %v4768_v19 }
 0x126   : > { %2259 = vmatmul.mubr.bf16.gmra.mrb[116].mxu0 %v4368_v44 }
 0x127   : > { %2266 = vmatprep.mubr.bf16.mxu0 %v4688_v30 }
 0x128   : > { %3809 = vmatmul.mubr.bf16.gmra.mrb[84].mxu1 %v4777_v60  ;;  %v3318_v5 = vpop.f32.mrb[12].mxu0 }
 0x129   : > { %v3319_v58 = vpop.f32.mrb[13].mxu0  ;;  %3812 = vmatprep.mubr.bf16.mxu1 %v4794_v40 }
 0x12a   : > { %v4909_v28 = vadd.f32 %v3319_v58, %v3318_v5  ;;  %v3321_v13 = vpop.f32.mrb[14].mxu0 }
 0x12b   : > { %v3322_v2 = vpop.f32.mrb[15].mxu0 }
 0x12c   : > { %v4911_v37 = vadd.f32 %v3322_v2, %v3321_v13 }
 0x12e   : > { %2267 = vmatmul.mubr.bf16.gmra.mrb[120].mxu0 %v4372_v47 }
 0x12f   : > { %2274 = vmatprep.mubr.bf16.mxu0 %v4698_v41 }
 0x130   : > { %3813 = vmatmul.mubr.bf16.gmra.mrb[88].mxu1 %v4803_v17 }
 0x131   : > { %v3324_v44 = vpop.f32.mrb[16].mxu0  ;;  %3816 = vmatprep.mubr.bf16.mxu1 %v4820_v42 }
 0x132   : > { %v3325_v30 = vpop.f32.mrb[17].mxu0  ;;  %v3436_v24 = vpop.f32.mrb[16].mxu1 }
 0x133   : > { %v4917_v19 = vadd.f32 %v3325_v30, %v3324_v44  ;;  %v3327_v60 = vpop.f32.mrb[18].mxu0  ;;  %v3437_v40 = vpop.f32.mrb[17].mxu1 }
 0x134   : > { %v3328_v53 = vpop.f32.mrb[19].mxu0  ;;  %v4919_v14 = vadd.f32 %v3437_v40, %v3436_v24  ;;  %v3439_v61 = vpop.f32.mrb[18].mxu1 }
 0x135   : > { %v4921_v34 = vadd.f32 %v3328_v53, %v3327_v60  ;;  %v3440_v47 = vpop.f32.mrb[19].mxu1 }
 0x136   : > { %2275 = vmatmul.mubr.bf16.gmra.mrb[124].mxu0 %v4423_v38  ;;  %v4924_v41 = vadd.f32 %v3440_v47, %v3439_v61  ;;  %v911_v47 = vrot.slane %v4931_v22, 1 }
 0x137   : > { %2282 = vmatprep.mubr.bf16.mxu0 %v4708_v35  ;;  %v551_v35 = vld [vmem:[#allocation2 + $0x1a8] sm:$0x3] }
 0x138   : > { %3817 = vmatmul.mubr.bf16.gmra.mrb[92].mxu1 %v4338_v9  ;;  %v587_v11 = vpack.c.bf16 %v551_v35, %v551_v35 }
 0x139   : > { %v3330_v17 = vpop.f32.mrb[20].mxu0  ;;  %3820 = vmatprep.mubr.bf16.mxu1 %v4353_v27 }
 0x13a   : > { %v3331_v42 = vpop.f32.mrb[21].mxu0  ;;  %v3442_v56 = vpop.f32.mrb[20].mxu1  ;;  %v801_v3 = vshll.u32 %v587_v11, 16 }
 0x13b   : > { %v4929_v20 = vadd.f32 %v3331_v42, %v3330_v17  ;;  %v3333_v59 = vpop.f32.mrb[22].mxu0  ;;  %v3443_v57 = vpop.f32.mrb[21].mxu1  ;;  %v912_v17 = vrot.slane %v587_v11, 1 }
 0x13c   : > { %v3334_v0 = vpop.f32.mrb[23].mxu0  ;;  %v4933_v38 = vadd.f32 %v3443_v57, %v3442_v56  ;;  %v3445_v21 = vpop.f32.mrb[22].mxu1  ;;  %v803_v5 = vrot.slane %v801_v3, 1 }
 0x13d   : > { %v4935_v10 = vadd.f32 %v3334_v0, %v3333_v59  ;;  %v3446_v9 = vpop.f32.mrb[23].mxu1 }
 0x13e   : > { %2283 = vmatmul.mubr.bf16.gmra.mrb[128].mxu0 %v4468_v51  ;;  %v4938_v27 = vadd.f32 %v3446_v9, %v3445_v21  ;;  %v794_v51 = vshrl.u32 %v4931_v22, 16  ;;  %v913_v9 = vsel %vm859_vm0, %v911_v47, %v912_v17 }
 0x13f   : > { %2290 = vmatprep.mubr.bf16.mxu0 %v4718_v26 }
 0x140   : > { %3821 = vmatmul.mubr.bf16.gmra.mrb[0].mxu1 %v4395_v7  ;;  %v799_v48 = vor.u32 %v798_v23, %v794_v51 }
 0x141   : > { %v3336_v63 = vpop.f32.mrb[24].mxu0  ;;  %3824 = vmatprep.mubr.bf16.mxu1 %v4407_v18 }
 0x142   : > { %v3337_v46 = vpop.f32.mrb[25].mxu0  ;;  %v3448_v54 = vpop.f32.mrb[24].mxu1 }
 0x143   : > { %v4944_v36 = vadd.f32 %v3337_v46, %v3336_v63  ;;  %v3339_v4 = vpop.f32.mrb[26].mxu0  ;;  %v3449_v29 = vpop.f32.mrb[25].mxu1 }
 0x144   : > { %v3340_v45 = vpop.f32.mrb[27].mxu0  ;;  %v4947_v26 = vadd.f32 %v3449_v29, %v3448_v54  ;;  %v3451_v7 = vpop.f32.mrb[26].mxu1 }
 0x145   : > { %v4949_v8 = vadd.f32 %v3340_v45, %v3339_v4  ;;  %v3452_v50 = vpop.f32.mrb[27].mxu1 }
 0x146   : > { %2291 = vmatmul.mubr.bf16.gmra.mrb[132].mxu0 %v4520_v15  ;;  %v4952_v18 = vadd.f32 %v3452_v50, %v3451_v7  ;;  %v804_v15 = vsel %vm588_vm1, %v799_v48, %v803_v5 }
 0x147   : > { %2298 = vmatprep.mubr.bf16.mxu0 %v4727_v39 }
 0x148   : > { %3825 = vmatmul.mubr.bf16.gmra.mrb[4].mxu1 %v4447_v1 }
 0x149   : > { %v3342_v58 = vpop.f32.mrb[28].mxu0  ;;  %3828 = vmatprep.mubr.bf16.mxu1 %v4496_v6 }
 0x14a   : > { %v3343_v13 = vpop.f32.mrb[29].mxu0  ;;  %v3454_v2 = vpop.f32.mrb[28].mxu1 }
 0x14b   : > { %v4957_v44 = vadd.f32 %v3343_v13, %v3342_v58  ;;  %v3345_v30 = vpop.f32.mrb[30].mxu0  ;;  %v3455_v24 = vpop.f32.mrb[29].mxu1 }
 0x14c   : > { %v3346_v60 = vpop.f32.mrb[31].mxu0  ;;  %v4960_v40 = vadd.f32 %v3455_v24, %v3454_v2  ;;  %v3457_v53 = vpop.f32.mrb[30].mxu1 }
 0x14d   : > { %v4962_v39 = vadd.f32 %v3346_v60, %v3345_v30  ;;  %v3458_v1 = vpop.f32.mrb[31].mxu1 }
 0x14e   : > { %2299 = vmatmul.mubr.bf16.gmra.mrb[136].mxu0 %v4545_v25  ;;  %v4965_v61 = vadd.f32 %v3458_v1, %v3457_v53 }
 0x14f   : > { %2306 = vmatprep.mubr.bf16.mxu0 %v804_v15 }
 0x150   : > { %3829 = vmatmul.mubr.bf16.gmra.mrb[8].mxu1 %v4552_v55 }
 0x151   : > { %v3348_v6 = vpop.f32.mrb[32].mxu0  ;;  %3832 = vmatprep.mubr.bf16.mxu1 %v4570_v43 }
 0x152   : > { %v3349_v42 = vpop.f32.mrb[33].mxu0  ;;  %v3460_v56 = vpop.f32.mrb[32].mxu1 }
 0x153   : > { %v3350_v59 = vadd.f32 %v3349_v42, %v3348_v6  ;;  %v3351_v57 = vpop.f32.mrb[34].mxu0  ;;  %v3461_v0 = vpop.f32.mrb[33].mxu1 }
 0x154   : > { %v3352_v16 = vpop.f32.mrb[35].mxu0  ;;  %v4970_v21 = vadd.f32 %v3461_v0, %v3460_v56  ;;  %v3463_v25 = vpop.f32.mrb[34].mxu1 }
 0x155   : > { %v3353_v35 = vadd.f32 %v3352_v16, %v3351_v57  ;;  %v3464_v33 = vpop.f32.mrb[35].mxu1 }
 0x156   : > { %2307 = vmatmul.mubr.bf16.gmra.mrb[140].mxu0 %v4931_v22  ;;  %v4974_v55 = vadd.f32 %v3464_v33, %v3463_v25 }
 0x158   : > { %3833 = vmatmul.mubr.bf16.gmra.mrb[12].mxu1 %v913_v9 }
 0x159   : > { %v3354_v43 = vpop.f32.mrb[36].mxu0 }
 0x15a   : > { %v3355_v11 = vpop.f32.mrb[37].mxu0  ;;  %v3466_v63 = vpop.f32.mrb[36].mxu1 }
 0x15b   : > { %v3356_v46 = vadd.f32 %v3355_v11, %v3354_v43  ;;  %v3357_v54 = vpop.f32.mrb[38].mxu0  ;;  %v3467_v4 = vpop.f32.mrb[37].mxu1 }
 0x15c   : > { %v3358_v29 = vpop.f32.mrb[39].mxu0  ;;  %v4976_v45 = vadd.f32 %v3467_v4, %v3466_v63  ;;  %v3469_v51 = vpop.f32.mrb[38].mxu1 }
 0x15d   : > { %v3359_v23 = vadd.f32 %v3358_v29, %v3357_v54  ;;  %v3470_v3 = vpop.f32.mrb[39].mxu1 }
 0x15e   : > { %v4978_v7 = vadd.f32 %v3470_v3, %v3469_v51 }
 0x161   : > { %v3360_v50 = vpop.f32.mrb[40].mxu0 }
 0x162   : > { %v3361_v48 = vpop.f32.mrb[41].mxu0  ;;  %v3472_v22 = vpop.f32.mrb[40].mxu1 }
 0x163   : > { %v3362_v5 = vadd.f32 %v3361_v48, %v3360_v50  ;;  %v3363_v58 = vpop.f32.mrb[42].mxu0  ;;  %v3473_v13 = vpop.f32.mrb[41].mxu1 }
 0x164   : > { %v3364_v2 = vpop.f32.mrb[43].mxu0  ;;  %v4980_v30 = vadd.f32 %v3473_v13, %v3472_v22  ;;  %v3475_v24 = vpop.f32.mrb[42].mxu1 }
 0x165   : > { %v3365_v60 = vadd.f32 %v3364_v2, %v3363_v58  ;;  %v3476_v15 = vpop.f32.mrb[43].mxu1 }
 0x166   : > { %v4982_v53 = vadd.f32 %v3476_v15, %v3475_v24 }
 0x169   : > { %v3366_v1 = vpop.f32.mrb[44].mxu0 }
 0x16a   : > { %v3367_v6 = vpop.f32.mrb[45].mxu0  ;;  %v3478_v47 = vpop.f32.mrb[44].mxu1 }
 0x16b   : > { %v3368_v17 = vadd.f32 %v3367_v6, %v3366_v1  ;;  %v3369_v42 = vpop.f32.mrb[46].mxu0  ;;  %v3479_v56 = vpop.f32.mrb[45].mxu1 }
 0x16c   : > { %v3370_v57 = vpop.f32.mrb[47].mxu0  ;;  %v4984_v0 = vadd.f32 %v3479_v56, %v3478_v47  ;;  %v3481_v16 = vpop.f32.mrb[46].mxu1 }
 0x16d   : > { %v3371_v25 = vadd.f32 %v3370_v57, %v3369_v42  ;;  %v3482_v9 = vpop.f32.mrb[47].mxu1 }
 0x16e   : > { %v4986_v33 = vadd.f32 %v3482_v9, %v3481_v16 }
 0x171   : > { %v3372_v43 = vpop.f32.mrb[48].mxu0 }
 0x172   : > { %v3373_v11 = vpop.f32.mrb[49].mxu0  ;;  %v3484_v63 = vpop.f32.mrb[48].mxu1 }
 0x173   : > { %v4988_v54 = vadd.f32 %v3373_v11, %v3372_v43  ;;  %v3375_v4 = vpop.f32.mrb[50].mxu0  ;;  %v3485_v29 = vpop.f32.mrb[49].mxu1 }
 0x174   : > { %v3376_v51 = vpop.f32.mrb[51].mxu0  ;;  %v3486_v3 = vadd.f32 %v3485_v29, %v3484_v63  ;;  %v3487_v50 = vpop.f32.mrb[50].mxu1 }
 0x175   : > { %v4990_v48 = vadd.f32 %v3376_v51, %v3375_v4  ;;  %v3488_v22 = vpop.f32.mrb[51].mxu1 }
 0x176   : > { %v4992_v58 = vadd.f32 %v3486_v3, %v3350_v59  ;;  %v3489_v13 = vadd.f32 %v3488_v22, %v3487_v50 }
 0x178   : > { %v4994_v2 = vadd.f32 %v3489_v13, %v3353_v35 }
 0x179   : > { %v3378_v24 = vpop.f32.mrb[52].mxu0 }
 0x17a   : > { %v3379_v15 = vpop.f32.mrb[53].mxu0  ;;  %v3490_v1 = vpop.f32.mrb[52].mxu1 }
 0x17b   : > { %v4996_v6 = vadd.f32 %v3379_v15, %v3378_v24  ;;  %v3381_v47 = vpop.f32.mrb[54].mxu0  ;;  %v3491_v42 = vpop.f32.mrb[53].mxu1 }
 0x17c   : > { %v3382_v56 = vpop.f32.mrb[55].mxu0  ;;  %v3492_v57 = vadd.f32 %v3491_v42, %v3490_v1  ;;  %v3493_v16 = vpop.f32.mrb[54].mxu1 }
 0x17d   : > { %v4998_v9 = vadd.f32 %v3382_v56, %v3381_v47  ;;  %v3494_v43 = vpop.f32.mrb[55].mxu1 }
 0x17e   : > { %v5000_v11 = vadd.f32 %v3492_v57, %v3356_v46  ;;  %v3495_v59 = vadd.f32 %v3494_v43, %v3493_v16 }
 0x180   : > { %v5002_v63 = vadd.f32 %v3495_v59, %v3359_v23 }
 0x181   : > { %v3384_v35 = vpop.f32.mrb[56].mxu0 }
 0x182   : > { %5230 = vst [vmem:[#allocation3_spill] sm:$0xff] %v5002_v63  ;;  %v3385_v4 = vpop.f32.mrb[57].mxu0  ;;  %v3496_v29 = vpop.f32.mrb[56].mxu1 }
 0x183   : > { %v5004_v51 = vadd.f32 %v3385_v4, %v3384_v35  ;;  %v3387_v3 = vpop.f32.mrb[58].mxu0  ;;  %v3497_v50 = vpop.f32.mrb[57].mxu1 }
 0x184   : > { %v3388_v22 = vpop.f32.mrb[59].mxu0  ;;  %v3498_v13 = vadd.f32 %v3497_v50, %v3496_v29  ;;  %v3499_v24 = vpop.f32.mrb[58].mxu1 }
 0x185   : > { %v5006_v15 = vadd.f32 %v3388_v22, %v3387_v3  ;;  %v3500_v1 = vpop.f32.mrb[59].mxu1 }
 0x186   : > { %v5008_v47 = vadd.f32 %v3498_v13, %v3362_v5  ;;  %v3501_v46 = vadd.f32 %v3500_v1, %v3499_v24 }
 0x188   : > { %v5010_v42 = vadd.f32 %v3501_v46, %v3365_v60 }
 0x189   : > { %v3390_v23 = vpop.f32.mrb[60].mxu0 }
 0x18a   : > { %v3391_v56 = vpop.f32.mrb[61].mxu0  ;;  %v3502_v57 = vpop.f32.mrb[60].mxu1 }
 0x18b   : > { %v5012_v16 = vadd.f32 %v3391_v56, %v3390_v23  ;;  %v3393_v43 = vpop.f32.mrb[62].mxu0  ;;  %v3503_v59 = vpop.f32.mrb[61].mxu1 }
 0x18c   : > { %v3394_v35 = vpop.f32.mrb[63].mxu0  ;;  %v3504_v4 = vadd.f32 %v3503_v59, %v3502_v57  ;;  %v3505_v63 = vpop.f32.mrb[62].mxu1 }
 0x18d   : > { %v5014_v29 = vadd.f32 %v3394_v35, %v3393_v43  ;;  %v3506_v3 = vpop.f32.mrb[63].mxu1 }
 0x18e   : > { %v5016_v50 = vadd.f32 %v3504_v4, %v3368_v17  ;;  %v3507_v5 = vadd.f32 %v3506_v3, %v3505_v63 }
 0x190   : > { %v5018_v22 = vadd.f32 %v3507_v5, %v3371_v25 }
 0x191   : > { %v3710_v60 = vpop.f32.mrb[64].mxu0 }
 0x192   : > { %v1377_v13 = vadd.f32 %v3710_v60, %v4890_v62  ;;  %v1368_v24 = vpop.f32.mrb[65].mxu0 }
 0x193   : > { %v3508_v1 = vpop.f32.mrb[64].mxu1  ;;  %v1369_v46 = vadd.f32 %v4882_v32, %v1368_v24  ;;  %v3711_v23 = vpop.f32.mrb[66].mxu0 }
 0x194   : > { %v5023_v56 = vadd.f32 %v4933_v38, %v1377_v13  ;;  %v3509_v57 = vpop.f32.mrb[65].mxu1  ;;  %v1380_v43 = vadd.f32 %v3711_v23, %v4894_v49  ;;  %v1371_v59 = vpop.f32.mrb[67].mxu0 }
 0x195   : > { %v5027_v17 = vadd.f32 %v4919_v14, %v1369_v46  ;;  %v3510_v25 = vadd.f32 %v3509_v57, %v3508_v1  ;;  %v3511_v63 = vpop.f32.mrb[66].mxu1  ;;  %v1372_v35 = vadd.f32 %v4886_v52, %v1371_v59 }
 0x196   : > { %v5031_v62 = vadd.f32 %v4938_v27, %v1380_v43  ;;  %v3512_v4 = vpop.f32.mrb[67].mxu1 }
 0x197   : > { %v5034_v32 = vadd.f32 %v3510_v25, %v4988_v54  ;;  %v5037_v38 = vadd.f32 %v4924_v41, %v1372_v35  ;;  %v3513_v3 = vadd.f32 %v3512_v4, %v3511_v63 }
 0x199   : > { %v5040_v49 = vadd.f32 %v3513_v3, %v4990_v48  ;;  %v3714_v14 = vpop.f32.mrb[68].mxu0 }
 0x19a   : > { %v1393_v5 = vadd.f32 %v3714_v14, %v4909_v28  ;;  %v1384_v60 = vpop.f32.mrb[69].mxu0 }
 0x19b   : > { %v3514_v13 = vpop.f32.mrb[68].mxu1  ;;  %v1385_v52 = vadd.f32 %v4898_v31, %v1384_v60  ;;  %v3715_v27 = vpop.f32.mrb[70].mxu0 }
 0x19c   : > { %v5045_v24 = vadd.f32 %v4960_v40, %v1393_v5  ;;  %v3515_v54 = vpop.f32.mrb[69].mxu1  ;;  %v1396_v1 = vadd.f32 %v3715_v27, %v4911_v37  ;;  %v1387_v41 = vpop.f32.mrb[71].mxu0 }
 0x19d   : > { %v5049_v46 = vadd.f32 %v4947_v26, %v1385_v52  ;;  %v3516_v48 = vadd.f32 %v3515_v54, %v3514_v13  ;;  %v3517_v23 = vpop.f32.mrb[70].mxu1  ;;  %v1388_v57 = vadd.f32 %v4902_v12, %v1387_v41 }
 0x19e   : > { %v5053_v28 = vadd.f32 %v4965_v61, %v1396_v1  ;;  %v3518_v43 = vpop.f32.mrb[71].mxu1 }
 0x19f   : > { %v5056_v31 = vadd.f32 %v3516_v48, %v4996_v6  ;;  %v5059_v40 = vadd.f32 %v4952_v18, %v1388_v57  ;;  %v3519_v59 = vadd.f32 %v3518_v43, %v3517_v23 }
 0x1a1   : > { %v5062_v37 = vadd.f32 %v3519_v59, %v4998_v9  ;;  %v3718_v26 = vpop.f32.mrb[72].mxu0 }
 0x1a2   : > { %v1409_v25 = vadd.f32 %v3718_v26, %v4929_v20  ;;  %v1400_v63 = vpop.f32.mrb[73].mxu0 }
 0x1a3   : > { %v3520_v35 = vpop.f32.mrb[72].mxu1  ;;  %v1401_v12 = vadd.f32 %v4917_v19, %v1400_v63  ;;  %v3719_v61 = vpop.f32.mrb[74].mxu0 }
 0x1a4   : > { %v5067_v4 = vadd.f32 %v4976_v45, %v1409_v25  ;;  %v3521_v6 = vpop.f32.mrb[73].mxu1  ;;  %v1412_v3 = vadd.f32 %v3719_v61, %v4935_v10  ;;  %v1403_v18 = vpop.f32.mrb[75].mxu0 }
 0x1a5   : > { %v5071_v14 = vadd.f32 %v4970_v21, %v1401_v12  ;;  %v3522_v9 = vadd.f32 %v3521_v6, %v3520_v35  ;;  %v3523_v5 = vpop.f32.mrb[74].mxu1  ;;  %v1404_v60 = vadd.f32 %v4921_v34, %v1403_v18 }
 0x1a6   : > { %v5075_v20 = vadd.f32 %v4978_v7, %v1412_v3  ;;  %v3524_v13 = vpop.f32.mrb[75].mxu1 }
 0x1a7   : > { %v5078_v19 = vadd.f32 %v3522_v9, %v5004_v51  ;;  %v1709_v45 = vadd.f32 %v4974_v55, %v1404_v60  ;;  %v3525_v52 = vadd.f32 %v3524_v13, %v3523_v5 }
 0x1a9   : > { %v5082_v10 = vadd.f32 %v3525_v52, %v5006_v15  ;;  %v3722_v27 = vpop.f32.mrb[76].mxu0 }
 0x1aa   : > { %v1425_v21 = vadd.f32 %v3722_v27, %v4957_v44  ;;  %v1416_v54 = vpop.f32.mrb[77].mxu0 }
 0x1ab   : > { %v3526_v1 = vpop.f32.mrb[76].mxu1  ;;  %v1417_v34 = vadd.f32 %v4944_v36, %v1416_v54  ;;  %v3723_v41 = vpop.f32.mrb[78].mxu0 }
 0x1ac   : > { %v5087_v7 = vadd.f32 %v4984_v0, %v1425_v21  ;;  %v3527_v48 = vpop.f32.mrb[77].mxu1  ;;  %v1428_v51 = vadd.f32 %v3723_v41, %v4962_v39  ;;  %v1419_v23 = vpop.f32.mrb[79].mxu0 }
 0x1ad   : > { %v5091_v55 = vadd.f32 %v4980_v30, %v1417_v34  ;;  %v3528_v15 = vadd.f32 %v3527_v48, %v3526_v1  ;;  %v3529_v57 = vpop.f32.mrb[78].mxu1  ;;  %v1420_v43 = vadd.f32 %v4949_v8, %v1419_v23 }
 0x1ae   : > { %v5095_v44 = vadd.f32 %v4986_v33, %v1428_v51  ;;  %v3530_v59 = vpop.f32.mrb[79].mxu1 }
 0x1af   : > { %v5098_v36 = vadd.f32 %v3528_v15, %v5012_v16  ;;  %v1725_v0 = vadd.f32 %v4982_v53, %v1420_v43  ;;  %v3531_v26 = vadd.f32 %v3530_v59, %v3529_v57 }
 0x1b1   : > { %v5102_v39 = vadd.f32 %v3531_v26, %v5014_v29  ;;  %v3572_v25 = vpop.f32.mrb[80].mxu0 }
 0x1b2   : > { %v3573_v30 = vpop.f32.mrb[81].mxu0 }
 0x1b3   : > { %v3574_v63 = vadd.f32 %v3573_v30, %v3572_v25  ;;  %v3575_v35 = vpop.f32.mrb[82].mxu0 }
 0x1b4   : > { %v3576_v12 = vpop.f32.mrb[83].mxu0 }
 0x1b5   : > { %v3577_v61 = vadd.f32 %v3576_v12, %v3575_v35  ;;  %v5105_v8 = vadd.f32 %v3574_v63, %v5027_v17 }
 0x1b7   : > { %v5108_v33 = vadd.f32 %v3577_v61, %v5037_v38 }
 0x1b9   : > { %v3578_v16 = vpop.f32.mrb[84].mxu0 }
 0x1ba   : > { %v3579_v6 = vpop.f32.mrb[85].mxu0 }
 0x1bb   : > { %v3580_v3 = vadd.f32 %v3579_v6, %v3578_v16  ;;  %v3581_v53 = vpop.f32.mrb[86].mxu0 }
 0x1bc   : > { %v3582_v18 = vpop.f32.mrb[87].mxu0 }
 0x1bd   : > { %v3583_v9 = vadd.f32 %v3582_v18, %v3581_v53  ;;  %v3854_v29 = vadd.f32 %v3580_v3, %v5023_v56 }
 0x1bf   : > { %v3862_v5 = vadd.f32 %v3583_v9, %v5031_v62 }
 0x1c1   : > { %v3584_v60 = vpop.f32.mrb[88].mxu0 }
 0x1c2   : > { %v3585_v13 = vpop.f32.mrb[89].mxu0 }
 0x1c3   : > { %v3586_v52 = vadd.f32 %v3585_v13, %v3584_v60  ;;  %v3587_v27 = vpop.f32.mrb[90].mxu0 }
 0x1c4   : > { %v3588_v21 = vpop.f32.mrb[91].mxu0 }
 0x1c5   : > { %v3589_v17 = vadd.f32 %v3588_v21, %v3587_v27  ;;  %v5113_v54 = vadd.f32 %v3586_v52, %v5049_v46 }
 0x1c7   : > { %v5116_v38 = vadd.f32 %v3589_v17, %v5059_v40 }
 0x1c9   : > { %v3590_v1 = vpop.f32.mrb[92].mxu0 }
 0x1ca   : > { %v3591_v34 = vpop.f32.mrb[93].mxu0 }
 0x1cb   : > { %v3592_v41 = vadd.f32 %v3591_v34, %v3590_v1  ;;  %v3593_v48 = vpop.f32.mrb[94].mxu0 }
 0x1cc   : > { %v3594_v51 = vpop.f32.mrb[95].mxu0 }
 0x1cd   : > { %v3595_v56 = vadd.f32 %v3594_v51, %v3593_v48  ;;  %v5119_v62 = vadd.f32 %v3592_v41, %v5045_v24 }
 0x1cf   : > { %v5122_v23 = vadd.f32 %v3595_v56, %v5053_v28 }
 0x1d1   : > { %v3596_v15 = vpop.f32.mrb[96].mxu0 }
 0x1d2   : > { %v3597_v57 = vpop.f32.mrb[97].mxu0 }
 0x1d3   : > { %v3598_v43 = vadd.f32 %v3597_v57, %v3596_v15  ;;  %v3599_v46 = vpop.f32.mrb[98].mxu0 }
 0x1d4   : > { %v3600_v59 = vpop.f32.mrb[99].mxu0 }
 0x1d5   : > { %v3601_v26 = vadd.f32 %v3600_v59, %v3599_v46  ;;  %v5125_v40 = vadd.f32 %v3598_v43, %v5071_v14 }
 0x1d7   : > { %v5127_v25 = vadd.f32 %v3601_v26, %v1709_v45 }
 0x1d9   : > { %v3602_v30 = vpop.f32.mrb[100].mxu0 }
 0x1da   : > { %v3603_v63 = vpop.f32.mrb[101].mxu0 }
 0x1db   : > { %v3604_v35 = vadd.f32 %v3603_v63, %v3602_v30  ;;  %v3605_v12 = vpop.f32.mrb[102].mxu0 }
 0x1dc   : > { %v3606_v24 = vpop.f32.mrb[103].mxu0 }
 0x1dd   : > { %v3607_v61 = vadd.f32 %v3606_v24, %v3605_v12  ;;  %v5130_v28 = vadd.f32 %v3604_v35, %v5067_v4 }
 0x1df   : > { %v5133_v16 = vadd.f32 %v3607_v61, %v5075_v20 }
 0x1e1   : > { %v3608_v6 = vpop.f32.mrb[104].mxu0 }
 0x1e2   : > { %v3609_v3 = vpop.f32.mrb[105].mxu0 }
 0x1e3   : > { %v3610_v53 = vadd.f32 %v3609_v3, %v3608_v6  ;;  %v3611_v18 = vpop.f32.mrb[106].mxu0 }
 0x1e4   : > { %v3612_v14 = vpop.f32.mrb[107].mxu0 }
 0x1e5   : > { %v3613_v9 = vadd.f32 %v3612_v14, %v3611_v18  ;;  %v5136_v45 = vadd.f32 %v3610_v53, %v5091_v55 }
 0x1e7   : > { %v5138_v60 = vadd.f32 %v3613_v9, %v1725_v0 }
 0x1e9   : > { %v3614_v13 = vpop.f32.mrb[108].mxu0 }
 0x1ea   : > { %v3615_v52 = vpop.f32.mrb[109].mxu0 }
 0x1eb   : > { %v3616_v27 = vadd.f32 %v3615_v52, %v3614_v13  ;;  %v3617_v21 = vpop.f32.mrb[110].mxu0 }
 0x1ec   : > { %v3618_v4 = vpop.f32.mrb[111].mxu0 }
 0x1ed   : > { %v3619_v17 = vadd.f32 %v3618_v4, %v3617_v21  ;;  %v5141_v20 = vadd.f32 %v3616_v27, %v5087_v7 }
 0x1ef   : > { %v5144_v1 = vadd.f32 %v3619_v17, %v5095_v44 }
 0x1f1   : > { %v3620_v34 = vpop.f32.mrb[112].mxu0 }
 0x1f2   : > { %v3621_v41 = vpop.f32.mrb[113].mxu0 }
 0x1f3   : > { %v3806_v48 = vpop.f32.mrb[80].mxu1  ;;  %v3622_v55 = vadd.f32 %v3621_v41, %v3620_v34  ;;  %v3623_v51 = vpop.f32.mrb[114].mxu0 }
 0x1f4   : > { %v3855_v0 = vadd.f32 %v3854_v29, %v3806_v48  ;;  %v2349_v56 = vpop.f32.mrb[81].mxu1  ;;  %v3624_v15 = vpop.f32.mrb[115].mxu0 }
 0x1f5   : > { %v3859_v57 = vadd.f32 %v5105_v8, %v2349_v56  ;;  %v3807_v43 = vpop.f32.mrb[82].mxu1  ;;  %v3625_v46 = vadd.f32 %v3624_v15, %v3623_v51  ;;  %v5148_v59 = vadd.f32 %v4992_v58, %v3622_v55  ;;  %v5231_v56 = vld [vmem:[#allocation3_spill] sm:$0xff] }
 0x1f6   : > { %v3863_v7 = vadd.f32 %v3862_v5, %v3807_v43  ;;  %v2352_v26 = vpop.f32.mrb[83].mxu1  ;;  %v2707_v24 = vmul.f32 %v3855_v0, %v3855_v0 }
 0x1f7   : > { %v3867_v44 = vadd.f32 %v5108_v33, %v2352_v26  ;;  %v5159_v29 = vadd.f32 %v4994_v2, %v3625_v46  ;;  %v2705_v30 = vmul.f32 %v3859_v57, %v3859_v57 }
 0x1f8   : > { %v3182_v8 = vpack.c.bf16 %v3863_v7, %v3855_v0  ;;  %v2708_v14 = vmul.f32 %v3863_v7, %v3863_v7 }
 0x1f9   : > { %v3177_v63 = vpack.c.bf16 %v3867_v44, %v3859_v57  ;;  %v2668_v58 = vadd.f32 %v3867_v44, %v3859_v57  ;;  %v2706_v35 = vmul.f32 %v3867_v44, %v3867_v44  ;;  %v3626_v5 = vpop.f32.mrb[116].mxu0 }
 0x1fa   : > { %3269 = vst [vmem:[%s5155_s17 + $0x8] sm:$0xff] %v3182_v8   ;;  %v3627_v12 = vpop.f32.mrb[117].mxu0 }
 0x1fb   : > { %3178 = vst [vmem:[%s5155_s17] sm:$0xff] %v3177_v63   ;;  %v2669_v61 = vadd.f32 %v3855_v0, %v2668_v58  ;;  %v2737_v6 = vadd.f32 %v2706_v35, %v2705_v30  ;;  %v3810_v3 = vpop.f32.mrb[84].mxu1  ;;  %v3628_v53 = vadd.f32 %v3627_v12, %v3626_v5  ;;  %v3629_v18 = vpop.f32.mrb[118].mxu0 }
 0x1fc   : > { %v3871_v33 = vadd.f32 %v5119_v62, %v3810_v3  ;;  %v2365_v2 = vpop.f32.mrb[85].mxu1  ;;  %v3630_v9 = vpop.f32.mrb[119].mxu0 }
 0x1fd   : > { %v2738_v13 = vadd.f32 %v2737_v6, %v2707_v24  ;;  %v3875_v52 = vadd.f32 %v5113_v54, %v2365_v2  ;;  %v2670_v27 = vadd.f32 %v3863_v7, %v2669_v61  ;;  %v3811_v21 = vpop.f32.mrb[86].mxu1  ;;  %v3631_v4 = vadd.f32 %v3630_v9, %v3629_v18 }
 0x1fe   : > { %v3879_v17 = vadd.f32 %v5122_v23, %v3811_v21  ;;  %v2368_v34 = vpop.f32.mrb[87].mxu1  ;;  %v5167_v41 = vadd.f32 %v5000_v11, %v3628_v53  ;;  %v2711_v26 = vmul.f32 %v3871_v33, %v3871_v33 }
 0x1ff   : > { %v2671_v48 = vadd.f32 %v3875_v52, %v2670_v27  ;;  %v2709_v55 = vmul.f32 %v3875_v52, %v3875_v52  ;;  %v2739_v51 = vadd.f32 %v2738_v13, %v2708_v14  ;;  %v3883_v62 = vadd.f32 %v5116_v38, %v2368_v34 }
 0x200   : > { %v3192_v0 = vpack.c.bf16 %v3879_v17, %v3871_v33  ;;  %v5171_v15 = vadd.f32 %v5231_v56, %v3631_v4  ;;  %v2712_v58 = vmul.f32 %v3879_v17, %v3879_v17 }
 0x201   : > { %v2740_v54 = vadd.f32 %v2739_v51, %v2709_v55  ;;  %v3187_v57 = vpack.c.bf16 %v3883_v62, %v3875_v52  ;;  %v2672_v43 = vadd.f32 %v3883_v62, %v2671_v48  ;;  %v2710_v46 = vmul.f32 %v3883_v62, %v3883_v62  ;;  %v3632_v7 = vpop.f32.mrb[120].mxu0 }
 0x202   : > { %3271 = vst [vmem:[%s5155_s17 + $0x18] sm:$0xff] %v3192_v0   ;;  %v3633_v23 = vpop.f32.mrb[121].mxu0 }
 0x203   : > { %3270 = vst [vmem:[%s5155_s17 + $0x10] sm:$0xff] %v3187_v57   ;;  %v2673_v11 = vadd.f32 %v3871_v33, %v2672_v43  ;;  %v2741_v44 = vadd.f32 %v2740_v54, %v2710_v46  ;;  %v3814_v8 = vpop.f32.mrb[88].mxu1  ;;  %v3634_v30 = vadd.f32 %v3633_v23, %v3632_v7  ;;  %v3635_v63 = vpop.f32.mrb[122].mxu0 }
 0x204   : > { %v3887_v38 = vadd.f32 %v5130_v28, %v3814_v8  ;;  %v2381_v35 = vpop.f32.mrb[89].mxu1  ;;  %v3636_v5 = vpop.f32.mrb[123].mxu0 }
 0x205   : > { %v2742_v12 = vadd.f32 %v2741_v44, %v2711_v26  ;;  %v3891_v24 = vadd.f32 %v5125_v40, %v2381_v35  ;;  %v2674_v61 = vadd.f32 %v3879_v17, %v2673_v11  ;;  %v3815_v6 = vpop.f32.mrb[90].mxu1  ;;  %v3637_v3 = vadd.f32 %v3636_v5, %v3635_v63 }
 0x206   : > { %v3895_v53 = vadd.f32 %v5133_v16, %v3815_v6  ;;  %v2384_v18 = vpop.f32.mrb[91].mxu1  ;;  %v5179_v14 = vadd.f32 %v5008_v47, %v3634_v30  ;;  %v2715_v34 = vmul.f32 %v3887_v38, %v3887_v38 }
 0x207   : > { %v2675_v33 = vadd.f32 %v3891_v24, %v2674_v61  ;;  %v2713_v2 = vmul.f32 %v3891_v24, %v3891_v24  ;;  %v2743_v9 = vadd.f32 %v2742_v12, %v2712_v58  ;;  %v3899_v28 = vadd.f32 %v5127_v25, %v2384_v18 }
 0x208   : > { %v3202_v13 = vpack.c.bf16 %v3895_v53, %v3887_v38  ;;  %v5183_v52 = vadd.f32 %v5010_v42, %v3637_v3  ;;  %v2716_v0 = vmul.f32 %v3895_v53, %v3895_v53 }
 0x209   : > { %v2744_v40 = vadd.f32 %v2743_v9, %v2713_v2  ;;  %v3197_v27 = vpack.c.bf16 %v3899_v28, %v3891_v24  ;;  %v2676_v21 = vadd.f32 %v3899_v28, %v2675_v33  ;;  %v2714_v4 = vmul.f32 %v3899_v28, %v3899_v28  ;;  %v3638_v17 = vpop.f32.mrb[124].mxu0 }
 0x20a   : > { %3273 = vst [vmem:[%s5155_s17 + $0x28] sm:$0xff] %v3202_v13   ;;  %v3639_v16 = vpop.f32.mrb[125].mxu0 }
 0x20b   : > { %3272 = vst [vmem:[%s5155_s17 + $0x20] sm:$0xff] %v3197_v27   ;;  %v2677_v47 = vadd.f32 %v3887_v38, %v2676_v21  ;;  %v2745_v48 = vadd.f32 %v2744_v40, %v2714_v4  ;;  %v3818_v55 = vpop.f32.mrb[92].mxu1  ;;  %v3640_v51 = vadd.f32 %v3639_v16, %v3638_v17  ;;  %v3641_v62 = vpop.f32.mrb[126].mxu0 }
 0x20c   : > { %v3903_v25 = vadd.f32 %v5141_v20, %v3818_v55  ;;  %v2397_v56 = vpop.f32.mrb[93].mxu1  ;;  %v3642_v42 = vpop.f32.mrb[127].mxu0 }
 0x20d   : > { %v2746_v54 = vadd.f32 %v2745_v48, %v2715_v34  ;;  %v3907_v57 = vadd.f32 %v5136_v45, %v2397_v56  ;;  %v2678_v43 = vadd.f32 %v3895_v53, %v2677_v47  ;;  %v3819_v46 = vpop.f32.mrb[94].mxu1  ;;  %v3643_v7 = vadd.f32 %v3642_v42, %v3641_v62 }
 0x20e   : > { %v3911_v23 = vadd.f32 %v5144_v1, %v3819_v46  ;;  %v2400_v26 = vpop.f32.mrb[95].mxu1  ;;  %v3929_v11 = vadd.f32 %v5016_v50, %v3640_v51  ;;  %v2719_v1 = vmul.f32 %v3903_v25, %v3903_v25 }
 0x20f   : > { %v2679_v44 = vadd.f32 %v3907_v57, %v2678_v43  ;;  %v2717_v8 = vmul.f32 %v3907_v57, %v3907_v57  ;;  %v2747_v30 = vadd.f32 %v2746_v54, %v2716_v0  ;;  %v3915_v20 = vadd.f32 %v5138_v60, %v2400_v26 }
 0x210   : > { %v3212_v63 = vpack.c.bf16 %v3911_v23, %v3903_v25  ;;  %v3935_v58 = vadd.f32 %v5018_v22, %v3643_v7  ;;  %v2720_v18 = vmul.f32 %v3911_v23, %v3911_v23 }
 0x211   : > { %v2748_v38 = vadd.f32 %v2747_v30, %v2717_v8  ;;  %v3207_v45 = vpack.c.bf16 %v3915_v20, %v3907_v57  ;;  %v2680_v35 = vadd.f32 %v3915_v20, %v2679_v44  ;;  %v2718_v5 = vmul.f32 %v3915_v20, %v3915_v20  ;;  %v3644_v12 = vpop.f32.mrb[128].mxu0 }
 0x212   : > { %3275 = vst [vmem:[%s5155_s17 + $0x38] sm:$0xff] %v3212_v63   ;;  %v3645_v24 = vpop.f32.mrb[129].mxu0 }
 0x213   : > { %3274 = vst [vmem:[%s5155_s17 + $0x30] sm:$0xff] %v3207_v45   ;;  %v2681_v61 = vadd.f32 %v3903_v25, %v2680_v35  ;;  %v2749_v6 = vadd.f32 %v2748_v38, %v2718_v5  ;;  %v3822_v50 = vpop.f32.mrb[0].mxu1  ;;  %v3646_v3 = vadd.f32 %v3645_v24, %v3644_v12  ;;  %v3647_v53 = vpop.f32.mrb[130].mxu0 }
 0x214   : > { %v3918_v60 = vadd.f32 %v5167_v41, %v3822_v50  ;;  %v2413_v33 = vpop.f32.mrb[1].mxu1  ;;  %v3648_v2 = vpop.f32.mrb[131].mxu0 }
 0x215   : > { %v2750_v22 = vadd.f32 %v2749_v6, %v2719_v1  ;;  %v3921_v9 = vadd.f32 %v5148_v59, %v2413_v33  ;;  %v2682_v28 = vadd.f32 %v3911_v23, %v2681_v61  ;;  %v3823_v13 = vpop.f32.mrb[2].mxu1  ;;  %v3649_v40 = vadd.f32 %v3648_v2, %v3647_v53 }
 0x216   : > { %v3924_v27 = vadd.f32 %v5171_v15, %v3823_v13  ;;  %v2416_v21 = vpop.f32.mrb[3].mxu1  ;;  %v3944_v4 = vadd.f32 %v5034_v32, %v3646_v3  ;;  %v2723_v15 = vmul.f32 %v3918_v60, %v3918_v60 }
 0x217   : > { %v2683_v17 = vadd.f32 %v3921_v9, %v2682_v28  ;;  %v2721_v16 = vmul.f32 %v3921_v9, %v3921_v9  ;;  %v2751_v34 = vadd.f32 %v2750_v22, %v2720_v18  ;;  %v3927_v41 = vadd.f32 %v5159_v29, %v2416_v21 }
 0x218   : > { %v3222_v47 = vpack.c.bf16 %v3924_v27, %v3918_v60  ;;  %v3950_v48 = vadd.f32 %v5040_v49, %v3649_v40  ;;  %v2724_v43 = vmul.f32 %v3924_v27, %v3924_v27 }
 0x219   : > { %v2752_v55 = vadd.f32 %v2751_v34, %v2721_v16  ;;  %v3217_v59 = vpack.c.bf16 %v3927_v41, %v3921_v9  ;;  %v2684_v51 = vadd.f32 %v3927_v41, %v2683_v17  ;;  %v2722_v62 = vmul.f32 %v3927_v41, %v3927_v41  ;;  %v3650_v0 = vpop.f32.mrb[132].mxu0 }
 0x21a   : > { %3277 = vst [vmem:[%s5155_s17 + $0x48] sm:$0xff] %v3222_v47   ;;  %v3651_v25 = vpop.f32.mrb[133].mxu0 }
 0x21b   : > { %3276 = vst [vmem:[%s5155_s17 + $0x40] sm:$0xff] %v3217_v59   ;;  %v2685_v56 = vadd.f32 %v3918_v60, %v2684_v51  ;;  %v2753_v42 = vadd.f32 %v2752_v55, %v2722_v62  ;;  %v3826_v32 = vpop.f32.mrb[4].mxu1  ;;  %v3652_v54 = vadd.f32 %v3651_v25, %v3650_v0  ;;  %v3653_v57 = vpop.f32.mrb[134].mxu0 }
 0x21c   : > { %v3930_v46 = vadd.f32 %v3929_v11, %v3826_v32  ;;  %v2429_v29 = vpop.f32.mrb[5].mxu1  ;;  %v3654_v7 = vpop.f32.mrb[135].mxu0 }
 0x21d   : > { %v2754_v23 = vadd.f32 %v2753_v42, %v2723_v15  ;;  %v3933_v49 = vadd.f32 %v5179_v14, %v2429_v29  ;;  %v2686_v26 = vadd.f32 %v3924_v27, %v2685_v56  ;;  %v3827_v44 = vpop.f32.mrb[6].mxu1  ;;  %v3655_v8 = vadd.f32 %v3654_v7, %v3653_v57 }
 0x21e   : > { %v3936_v30 = vadd.f32 %v3935_v58, %v3827_v44  ;;  %v2432_v20 = vpop.f32.mrb[7].mxu1  ;;  %v3941_v63 = vadd.f32 %v5056_v31, %v3652_v54  ;;  %v2727_v58 = vmul.f32 %v3930_v46, %v3930_v46 }
 0x21f   : > { %v2687_v38 = vadd.f32 %v3933_v49, %v2686_v26  ;;  %v2725_v45 = vmul.f32 %v3933_v49, %v3933_v49  ;;  %v2755_v35 = vadd.f32 %v2754_v23, %v2724_v43  ;;  %v3939_v5 = vadd.f32 %v5183_v52, %v2432_v20 }
 0x220   : > { %v3232_v11 = vpack.c.bf16 %v3936_v30, %v3930_v46  ;;  %v3947_v12 = vadd.f32 %v5062_v37, %v3655_v8  ;;  %v2728_v33 = vmul.f32 %v3936_v30, %v3936_v30 }
 0x221   : > { %v2756_v24 = vadd.f32 %v2755_v35, %v2725_v45  ;;  %v3227_v1 = vpack.c.bf16 %v3939_v5, %v3933_v49  ;;  %v2688_v14 = vadd.f32 %v3939_v5, %v2687_v38  ;;  %v2726_v61 = vmul.f32 %v3939_v5, %v3939_v5  ;;  %v3656_v6 = vpop.f32.mrb[136].mxu0 }
 0x222   : > { %3279 = vst [vmem:[%s5155_s17 + $0x58] sm:$0xff] %v3232_v11   ;;  %v3657_v50 = vpop.f32.mrb[137].mxu0 }
 0x223   : > { %3278 = vst [vmem:[%s5155_s17 + $0x50] sm:$0xff] %v3227_v1   ;;  %v2689_v3 = vadd.f32 %v3930_v46, %v2688_v14  ;;  %v2757_v53 = vadd.f32 %v2756_v24, %v2726_v61  ;;  %v3830_v31 = vpop.f32.mrb[8].mxu1  ;;  %v3658_v18 = vadd.f32 %v3657_v50, %v3656_v6  ;;  %v3659_v60 = vpop.f32.mrb[138].mxu0 }
 0x224   : > { %v3942_v2 = vadd.f32 %v3941_v63, %v3830_v31  ;;  %v2445_v52 = vpop.f32.mrb[9].mxu1  ;;  %v3660_v22 = vpop.f32.mrb[139].mxu0 }
 0x225   : > { %v2758_v9 = vadd.f32 %v2757_v53, %v2727_v58  ;;  %v3945_v37 = vadd.f32 %v3944_v4, %v2445_v52  ;;  %v2690_v28 = vadd.f32 %v3936_v30, %v2689_v3  ;;  %v3831_v13 = vpop.f32.mrb[10].mxu1  ;;  %v3661_v40 = vadd.f32 %v3660_v22, %v3659_v60 }
 0x226   : > { %v3948_v27 = vadd.f32 %v3947_v12, %v3831_v13  ;;  %v2448_v21 = vpop.f32.mrb[11].mxu1  ;;  %v3956_v17 = vadd.f32 %v5078_v19, %v3658_v18  ;;  %v2731_v56 = vmul.f32 %v3942_v2, %v3942_v2 }
 0x227   : > { %v2691_v16 = vadd.f32 %v3945_v37, %v2690_v28  ;;  %v2729_v34 = vmul.f32 %v3945_v37, %v3945_v37  ;;  %v2759_v41 = vadd.f32 %v2758_v9, %v2728_v33  ;;  %v3951_v47 = vadd.f32 %v3950_v48, %v2448_v21 }
 0x228   : > { %v3242_v55 = vpack.c.bf16 %v3948_v27, %v3942_v2  ;;  %v3962_v59 = vadd.f32 %v5082_v10, %v3661_v40  ;;  %v2732_v43 = vmul.f32 %v3948_v27, %v3948_v27 }
 0x229   : > { %v2760_v51 = vadd.f32 %v2759_v41, %v2729_v34  ;;  %v3237_v62 = vpack.c.bf16 %v3951_v47, %v3945_v37  ;;  %v2692_v0 = vadd.f32 %v3951_v47, %v2691_v16  ;;  %v2730_v4 = vmul.f32 %v3951_v47, %v3951_v47  ;;  %v3662_v25 = vpop.f32.mrb[140].mxu0 }
 0x22a   : > { %3281 = vst [vmem:[%s5155_s17 + $0x68] sm:$0xff] %v3242_v55   ;;  %v3663_v15 = vpop.f32.mrb[141].mxu0 }
 0x22b   : > { %3280 = vst [vmem:[%s5155_s17 + $0x60] sm:$0xff] %v3237_v62   ;;  %v2693_v42 = vadd.f32 %v3942_v2, %v2692_v0  ;;  %v2761_v32 = vadd.f32 %v2760_v51, %v2730_v4  ;;  %v3834_v54 = vpop.f32.mrb[12].mxu1  ;;  %v3664_v19 = vadd.f32 %v3663_v15, %v3662_v25  ;;  %v3665_v57 = vpop.f32.mrb[142].mxu0 }
 0x22c   : > { %v2461_v46 = vpop.f32.mrb[13].mxu1  ;;  %v3666_v48 = vpop.f32.mrb[143].mxu0 }
 0x22d   : > { %v2762_v29 = vadd.f32 %v2761_v32, %v2731_v56  ;;  %v3953_v10 = vadd.f32 %v5098_v36, %v3664_v19  ;;  %v3957_v7 = vadd.f32 %v3956_v17, %v2461_v46  ;;  %v2694_v23 = vadd.f32 %v3948_v27, %v2693_v42  ;;  %v3835_v49 = vpop.f32.mrb[14].mxu1 }
 0x22e   : > { %v3667_v26 = vadd.f32 %v3666_v48, %v3665_v57  ;;  %v2464_v44 = vpop.f32.mrb[15].mxu1 }
 0x22f   : > { %v3954_v8 = vadd.f32 %v3953_v10, %v3834_v54  ;;  %v2695_v30 = vadd.f32 %v3957_v7, %v2694_v23  ;;  %v2733_v20 = vmul.f32 %v3957_v7, %v3957_v7  ;;  %v2763_v63 = vadd.f32 %v2762_v29, %v2732_v43 }
 0x230   : > { %v3959_v38 = vadd.f32 %v5102_v39, %v3667_v26  ;;  %v3963_v45 = vadd.f32 %v3962_v59, %v2464_v44 }
 0x231   : > { %v2735_v35 = vmul.f32 %v3954_v8, %v3954_v8  ;;  %v2764_v5 = vadd.f32 %v2763_v63, %v2733_v20 }
 0x232   : > { %v3960_v11 = vadd.f32 %v3959_v38, %v3835_v49  ;;  %v3247_v12 = vpack.c.bf16 %v3963_v45, %v3957_v7  ;;  %v2696_v24 = vadd.f32 %v3963_v45, %v2695_v30  ;;  %v2734_v36 = vmul.f32 %v3963_v45, %v3963_v45 }
 0x234   : > { %v3252_v1 = vpack.c.bf16 %v3960_v11, %v3954_v8  ;;  %v2736_v14 = vmul.f32 %v3960_v11, %v3960_v11  ;;  %3282 = vst [vmem:[%s5155_s17 + $0x70] sm:$0xff] %v3247_v12   ;;  %v2697_v61 = vadd.f32 %v3954_v8, %v2696_v24  ;;  %v2765_v6 = vadd.f32 %v2764_v5, %v2734_v36 }
 0x236   : > { %3283 = vst [vmem:[%s5155_s17 + $0x78] sm:$0xff] %v3252_v1   ;;  %v2698_v50 = vadd.f32 %v3960_v11, %v2697_v61  ;;  %v2766_v58 = vadd.f32 %v2765_v6, %v2735_v35 }
 0x238   : > { %v2699_v3 = vrot.slane %v2698_v50, 4  ;;  %v2767_v53 = vadd.f32 %v2766_v58, %v2736_v14 }
 0x23a   : > { %v2700_v31 = vadd.f32 %v2699_v3, %v2698_v50  ;;  %v2768_v39 = vrot.slane %v2767_v53, 4 }
 0x23c   : > { %v2701_v18 = vrot.slane %v2700_v31, 2  ;;  %v2769_v60 = vadd.f32 %v2768_v39, %v2767_v53 }
 0x23e   : > { %v2702_v33 = vadd.f32 %v2701_v18, %v2700_v31  ;;  %v2770_v2 = vrot.slane %v2769_v60, 2 }
 0x240   : > { %v2703_v52 = vrot.slane %v2702_v33, 1  ;;  %v2771_v22 = vadd.f32 %v2770_v2, %v2769_v60 }
 0x242   : > { %v2704_v9 = vadd.f32 %v2703_v52, %v2702_v33  ;;  %v2772_v37 = vrot.slane %v2771_v22, 1 }
 0x244   : > { %v2773_v28 = vadd.f32 %v2772_v37, %v2771_v22  ;;  %2774 = vst [vmem:[%s235_s22] sm:$0x1] %v2704_v9 }
 0x246   : > { %2775 = vst [vmem:[%s235_s22 + $0x1] sm:$0x1] %v2773_v28 }
 0x247 PF: > { %s16_s18 = sadd.s32 1, %s4100_s18  }
 0x248   : > { %p13_p4 = scmp.ge.s32.totalorder %s16_s18, 4  }
 0x24a   :  { %15 = sbr.rel (!%p13_p4) target bundleno = 1 (0x1), region = 81 }

</bundles_post_ra>
